<compile_context>
chip_gen: v7x
topology: tpu7x:2x2x1
jax: 0.10.0
libtpu: 0.0.40
codegen_flags: <defaults>
</compile_context>

<pallas_src>
import jax
import jax.numpy as jnp
from jax import lax
from jax.experimental import pallas as pl
from jax.experimental.pallas import tpu as pltpu

IMG = 64    # smallest spatial size the conv stack accepts (6 exact halvings)
PATCH = 16  # composed stage-1 conv: 16x16 / stride 16


# ----------------------------------------------------------------------------
# Original-module parameters (deterministic, PyTorch-like uniform ranges)
# ----------------------------------------------------------------------------
CONV_DEFS = [
    # (Cin, Cout, kernel, stride)
    (3, 8, 1, 1), (8, 16, 2, 2), (16, 16, 1, 1), (16, 32, 2, 2),
    (32, 32, 1, 1), (32, 64, 2, 2), (64, 64, 1, 1), (64, 128, 2, 2),
    (128, 128, 1, 1), (128, 256, 2, 2), (256, 256, 1, 1), (256, 384, 2, 2),
    (384, 384, 1, 1), (384, 512, 1, 2), (512, 512, 1, 2),
]
LSTM_DEFS = [(512, 128), (128, 32), (32, 1)]


def init_raw_params(key):
    keys = jax.random.split(key, 64)
    ki = 0
    conv_params = []
    for (cin, cout, k, s) in CONV_DEFS:
        bound = 1.0 / jnp.sqrt(cin * k * k)
        w = jax.random.uniform(keys[ki], (cout, cin, k, k), jnp.float32, -bound, bound); ki += 1
        b = jax.random.uniform(keys[ki], (cout,), jnp.float32, -bound, bound); ki += 1
        conv_params.append((w, b, k, s))
    lstm_params = []
    for (din, h) in LSTM_DEFS:
        bound = 1.0 / jnp.sqrt(h)
        w_ih = jax.random.uniform(keys[ki], (4 * h, din), jnp.float32, -bound, bound); ki += 1
        w_hh = jax.random.uniform(keys[ki], (4 * h, h), jnp.float32, -bound, bound); ki += 1
        b_ih = jax.random.uniform(keys[ki], (4 * h,), jnp.float32, -bound, bound); ki += 1
        b_hh = jax.random.uniform(keys[ki], (4 * h,), jnp.float32, -bound, bound); ki += 1
        lstm_params.append((w_ih, w_hh, b_ih, b_hh))
    dw = jax.random.uniform(keys[ki], (1, 1), jnp.float32, -1.0, 1.0); ki += 1
    db = jax.random.uniform(keys[ki], (1,), jnp.float32, -1.0, 1.0); ki += 1
    return conv_params, lstm_params, (dw, db)


# ----------------------------------------------------------------------------
# One-time weight composition (init-time only, exact affine folding)
# ----------------------------------------------------------------------------
def _run_conv_stack(x, params):
    """Run a sub-stack of the original convs in f32 (init-time only)."""
    for (w, b, k, s) in params:
        x = lax.conv_general_dilated(
            x, w, window_strides=(s, s), padding="VALID",
            dimension_numbers=("NCHW", "OIHW", "NCHW"))
        x = x + b.reshape(1, -1, 1, 1)
    return x


def _compose_affine(params, basis_nchw):
    """Fold an affine conv sub-stack into (W, b) with y_flat = x_flat @ W + b."""
    beta = _run_conv_stack(jnp.zeros_like(basis_nchw[:1]), params)   # bias term
    cols = _run_conv_stack(basis_nchw, params)                       # columns + bias
    k = basis_nchw.shape[0]
    cout = beta.shape[1]
    w = (cols - beta).reshape(k, cout)
    b = beta.reshape(1, cout)
    return w, b


def prepare_params(conv_params, lstm_params, dense_params):
    # Stage 1: convs 1..8  -> (768, 128) matmul on 16x16x3 patches.
    # Patch-row column order: col = c*256 + dy*16 + dx  (matches _preprocess).
    basis1 = jnp.eye(3 * PATCH * PATCH, dtype=jnp.float32).reshape(-1, 3, PATCH, PATCH)
    w1, b1 = _compose_affine(conv_params[:8], basis1)               # (768,128), (1,128)

    # Stage 2: convs 9..15 -> (2048, 512) matmul on the flattened 4x4x128 map.
    # Column order: col = (py*4+px)*128 + c  (matches the in-kernel lane packing).
    n2 = 16 * 128
    basis2 = jnp.eye(n2, dtype=jnp.float32).reshape(n2, 16, 128)
    basis2 = jnp.transpose(basis2, (0, 2, 1)).reshape(n2, 128, 4, 4)
    w2, b2 = _compose_affine(conv_params[8:], basis2)               # (2048,512), (1,512)

    kargs = [w1.astype(jnp.bfloat16), b1.astype(jnp.float32),
             w2.astype(jnp.bfloat16), b2.astype(jnp.float32)]

    for (w_ih, w_hh, b_ih, b_hh) in lstm_params:
        kargs.append(w_ih.T.astype(jnp.bfloat16))                        # (In, 4H)
        kargs.append(w_hh.T.astype(jnp.bfloat16))                        # (H, 4H)
        kargs.append((b_ih + b_hh).reshape(1, -1).astype(jnp.float32))   # (1, 4H)

    dw, db = dense_params
    kargs.append(dw.reshape(1, 1).astype(jnp.float32))
    kargs.append(db.reshape(1, 1).astype(jnp.float32))
    return tuple(kargs)


# ----------------------------------------------------------------------------
# Fused kernel: composed conv stack + flatten + 3 LSTMs + Linear(1,1)
# ----------------------------------------------------------------------------
def _fused_kernel(
    xp_ref,
    w1_ref, b1_ref, w2_ref, b2_ref,
    wih1_ref, whh1_ref, bl1_ref,
    wih2_ref, whh2_ref, bl2_ref,
    wih3_ref, whh3_ref, bl3_ref,
    wdn_ref, bdn_ref,
    out_ref,
    hbuf, gxbuf,
):
    f32 = jnp.float32
    bf16 = jnp.bfloat16
    batch = out_ref.shape[0]

    # ---- conv stack: two composed matmuls, activations stay in registers ----
    # Stage 1: (16B, 768) @ (768, 128); rows are (patch p, image b), p-major.
    y1 = jnp.dot(xp_ref[...], w1_ref[...], preferred_element_type=f32) + b1_ref[...]
    y1 = y1.astype(bf16)
    # Lane-pack the 16 patch outputs of each image -> (B, 2048), lane-dense.
    z = jnp.concatenate([y1[p * batch:(p + 1) * batch, :] for p in range(16)], axis=1)
    # Stage 2: (B, 2048) @ (2048, 512) == Flatten output of the conv stack.
    feat = jnp.dot(z, w2_ref[...], preferred_element_type=f32) + b2_ref[...]

    # ---- LSTM stack: PyTorch treats the 2-D (B, 512) input as an UNBATCHED
    #      sequence (T = B).  Gate order: i, f, g, o. ----
    def lstm(x, wih_ref, whh_ref, b_ref):
        hdim = whh_ref.shape[0]
        g4 = 4 * hdim
        seq = x.shape[0]
        # Input projection hoisted out of the recurrence (one fused-gate matmul).
        gx = jnp.dot(x.astype(bf16), wih_ref[...], preferred_element_type=f32) + b_ref[...]

        def step(g_t, h, c):
            if hdim > 1:
                rec = jnp.dot(h.astype(bf16), whh_ref[...], preferred_element_type=f32)
                g = g_t + rec
                i_g = jax.nn.sigmoid(g[:, 0:hdim])
                f_g = jax.nn.sigmoid(g[:, hdim:2 * hdim])
                g_g = jnp.tanh(g[:, 2 * hdim:3 * hdim])
                o_g = jax.nn.sigmoid(g[:, 3 * hdim:4 * hdim])
            else:
                # H == 1: keep the 4 gate lanes together; 2 EUP ops per step.
                g = g_t + h * whh_ref[...].astype(f32)
                sig = jax.nn.sigmoid(g)
                th = jnp.tanh(g)
                i_g, f_g, g_g, o_g = sig[:, 0:1], sig[:, 1:2], th[:, 2:3], sig[:, 3:4]
            c = f_g * c + i_g * g_g
            h = o_g * jnp.tanh(c)
            return h, c

        h0 = jnp.zeros((1, hdim), f32)
        c0 = jnp.zeros((1, hdim), f32)

        if seq <= 8:
            # Short sequence: fully unrolled, hidden states kept in registers.
            h, c = h0, c0
            hs = []
            for t in range(seq):
                h, c = step(gx[t:t + 1, :], h, c)
                hs.append(h)
            return jnp.concatenate(hs, axis=0)

        # Long sequence: fori_loop bounds code size / vreg pressure; the
        # pre-computed gates and the hidden outputs live in VMEM scratch.
        gxbuf[:, :g4] = gx

        def body(t, carry):
            h, c = carry
            h, c = step(gxbuf[pl.ds(t, 1), :g4], h, c)
            hbuf[pl.ds(t, 1), :hdim] = h
            return (h, c)

        lax.fori_loop(0, seq, body, (h0, c0))
        return hbuf[:, :hdim]

    h1 = lstm(feat, wih1_ref, whh1_ref, bl1_ref)
    # TODO(synk): nn.Dropout(0.3) layers are eval-mode identities here.
    h2 = lstm(h1, wih2_ref, whh2_ref, bl2_ref)
    h3 = lstm(h2, wih3_ref, whh3_ref, bl3_ref)              # (B, 1)

    # Linear(1, 1): scalar affine on the VPU.
    out_ref[...] = h3 * wdn_ref[...] + bdn_ref[...]


# ----------------------------------------------------------------------------
# Host-side preprocessing (pure reshape/transpose, no gather) + fused call
# ----------------------------------------------------------------------------
def _preprocess(x):
    """(B,3,64,64) NCHW -> (16*B, 768) bf16 patch rows.
    Row = (py*4+px)*B + b ; column = c*256 + dy*16 + dx (16x16 patch contents)."""
    b = x.shape[0]
    xr = x.reshape(b, 3, 4, PATCH, 4, PATCH)          # (b, c, py, dy, px, dx)
    xr = jnp.transpose(xr, (2, 4, 0, 1, 3, 5))        # (py, px, b, c, dy, dx)
    return xr.reshape(16 * b, 3 * PATCH * PATCH).astype(jnp.bfloat16)


def forward(x, kargs):
    assert x.shape[1:] == (3, IMG, IMG), x.shape
    batch = x.shape[0]
    xp = _preprocess(x)
    return pl.pallas_call(
        _fused_kernel,
        out_shape=jax.ShapeDtypeStruct((batch, 1), jnp.float32),
        # No grid: single invocation, every operand lives whole in VMEM and is
        # single-buffered (nothing to pipeline, no weight double-buffering).
        scratch_shapes=[
            pltpu.VMEM((batch, 128), jnp.float32),    # LSTM hidden rows (fori path)
            pltpu.VMEM((batch, 512), jnp.float32),    # LSTM fused-gate rows (fori path)
        ],
        compiler_params=pltpu.CompilerParams(vmem_limit_bytes=32 * 1024 * 1024),
    )(xp, *kargs)


forward_jit = jax.jit(forward)


if __name__ == "__main__":
    key = jax.random.PRNGKey(0)
    pkey, xkey = jax.random.split(key)

    conv_params, lstm_params, dense_params = init_raw_params(pkey)
    kargs = prepare_params(conv_params, lstm_params, dense_params)

    x = jax.random.normal(xkey, (2, 3, IMG, IMG), jnp.float32)

    y = forward_jit(x, kargs)
    y = jax.block_until_ready(y)

    assert y.shape == (2, 1), y.shape
    assert bool(jnp.all(jnp.isfinite(y)))
    print("KERNEL_OK")
</pallas_src>

<mosaic_0001>
module attributes {stable_mosaic.version = 11 : i64} {
  func.func @_fused_kernel(%arg0: memref<32x768xbf16, #tpu.memory_space<vmem>>, %arg1: memref<768x128xbf16, #tpu.memory_space<vmem>>, %arg2: memref<1x128xf32, #tpu.memory_space<vmem>>, %arg3: memref<2048x512xbf16, #tpu.memory_space<vmem>>, %arg4: memref<1x512xf32, #tpu.memory_space<vmem>>, %arg5: memref<512x512xbf16, #tpu.memory_space<vmem>>, %arg6: memref<128x512xbf16, #tpu.memory_space<vmem>>, %arg7: memref<1x512xf32, #tpu.memory_space<vmem>>, %arg8: memref<128x128xbf16, #tpu.memory_space<vmem>>, %arg9: memref<32x128xbf16, #tpu.memory_space<vmem>>, %arg10: memref<1x128xf32, #tpu.memory_space<vmem>>, %arg11: memref<32x4xbf16, #tpu.memory_space<vmem>>, %arg12: memref<1x4xbf16, #tpu.memory_space<vmem>>, %arg13: memref<1x4xf32, #tpu.memory_space<vmem>>, %arg14: memref<1x1xf32, #tpu.memory_space<vmem>>, %arg15: memref<1x1xf32, #tpu.memory_space<vmem>>, %arg16: memref<2x1xf32, #tpu.memory_space<vmem>>, %arg17: memref<2x128xf32, #tpu.memory_space<vmem>>, %arg18: memref<2x512xf32, #tpu.memory_space<vmem>>) attributes {dimension_semantics = [], scalar_prefetch = 0 : i64, scratch_operands = 2 : i64, tpu.core_type = #tpu.core_type<tc>} {
    %c0 = arith.constant 0 : index
    %c0_0 = arith.constant 0 : index
    %0 = vector.load %arg0[%c0, %c0_0] : memref<32x768xbf16, #tpu.memory_space<vmem>>, vector<32x768xbf16>
    %c0_1 = arith.constant 0 : index
    %c0_2 = arith.constant 0 : index
    %1 = vector.load %arg1[%c0_1, %c0_2] : memref<768x128xbf16, #tpu.memory_space<vmem>>, vector<768x128xbf16>
    %cst = arith.constant dense<0.000000e+00> : vector<32x128xf32>
    %2 = tpu.matmul %0, %1, %cst {dimension_numbers = #tpu.dot_dimension_numbers<[1], [0], [0], [1], [0, 0, 1, 1], [], []>} : vector<32x768xbf16>, vector<768x128xbf16>, vector<32x128xf32> -> vector<32x128xf32>
    %c0_3 = arith.constant 0 : index
    %c0_4 = arith.constant 0 : index
    %3 = vector.load %arg2[%c0_3, %c0_4] : memref<1x128xf32, #tpu.memory_space<vmem>>, vector<1x128xf32>
    %4 = vector.broadcast %3 : vector<1x128xf32> to vector<32x128xf32>
    %5 = arith.addf %2, %4 : vector<32x128xf32>
    %6 = arith.truncf %5 : vector<32x128xf32> to vector<32x128xbf16>
    %7 = vector.extract_strided_slice %6 {offsets = [0, 0], sizes = [2, 128], strides = [1, 1]} : vector<32x128xbf16> to vector<2x128xbf16>
    %8 = vector.extract_strided_slice %6 {offsets = [2, 0], sizes = [2, 128], strides = [1, 1]} : vector<32x128xbf16> to vector<2x128xbf16>
    %9 = vector.extract_strided_slice %6 {offsets = [4, 0], sizes = [2, 128], strides = [1, 1]} : vector<32x128xbf16> to vector<2x128xbf16>
    %10 = vector.extract_strided_slice %6 {offsets = [6, 0], sizes = [2, 128], strides = [1, 1]} : vector<32x128xbf16> to vector<2x128xbf16>
    %11 = vector.extract_strided_slice %6 {offsets = [8, 0], sizes = [2, 128], strides = [1, 1]} : vector<32x128xbf16> to vector<2x128xbf16>
    %12 = vector.extract_strided_slice %6 {offsets = [10, 0], sizes = [2, 128], strides = [1, 1]} : vector<32x128xbf16> to vector<2x128xbf16>
    %13 = vector.extract_strided_slice %6 {offsets = [12, 0], sizes = [2, 128], strides = [1, 1]} : vector<32x128xbf16> to vector<2x128xbf16>
    %14 = vector.extract_strided_slice %6 {offsets = [14, 0], sizes = [2, 128], strides = [1, 1]} : vector<32x128xbf16> to vector<2x128xbf16>
    %15 = vector.extract_strided_slice %6 {offsets = [16, 0], sizes = [2, 128], strides = [1, 1]} : vector<32x128xbf16> to vector<2x128xbf16>
    %16 = vector.extract_strided_slice %6 {offsets = [18, 0], sizes = [2, 128], strides = [1, 1]} : vector<32x128xbf16> to vector<2x128xbf16>
    %17 = vector.extract_strided_slice %6 {offsets = [20, 0], sizes = [2, 128], strides = [1, 1]} : vector<32x128xbf16> to vector<2x128xbf16>
    %18 = vector.extract_strided_slice %6 {offsets = [22, 0], sizes = [2, 128], strides = [1, 1]} : vector<32x128xbf16> to vector<2x128xbf16>
    %19 = vector.extract_strided_slice %6 {offsets = [24, 0], sizes = [2, 128], strides = [1, 1]} : vector<32x128xbf16> to vector<2x128xbf16>
    %20 = vector.extract_strided_slice %6 {offsets = [26, 0], sizes = [2, 128], strides = [1, 1]} : vector<32x128xbf16> to vector<2x128xbf16>
    %21 = vector.extract_strided_slice %6 {offsets = [28, 0], sizes = [2, 128], strides = [1, 1]} : vector<32x128xbf16> to vector<2x128xbf16>
    %22 = vector.extract_strided_slice %6 {offsets = [30, 0], sizes = [2, 128], strides = [1, 1]} : vector<32x128xbf16> to vector<2x128xbf16>
    %23 = tpu.concatenate %7, %8, %9, %10, %11, %12, %13, %14, %15, %16, %17, %18, %19, %20, %21, %22 in 1 : vector<2x128xbf16>, vector<2x128xbf16>, vector<2x128xbf16>, vector<2x128xbf16>, vector<2x128xbf16>, vector<2x128xbf16>, vector<2x128xbf16>, vector<2x128xbf16>, vector<2x128xbf16>, vector<2x128xbf16>, vector<2x128xbf16>, vector<2x128xbf16>, vector<2x128xbf16>, vector<2x128xbf16>, vector<2x128xbf16>, vector<2x128xbf16> -> vector<2x2048xbf16>
    %c0_5 = arith.constant 0 : index
    %c0_6 = arith.constant 0 : index
    %24 = vector.load %arg3[%c0_5, %c0_6] : memref<2048x512xbf16, #tpu.memory_space<vmem>>, vector<2048x512xbf16>
    %cst_7 = arith.constant dense<0.000000e+00> : vector<2x512xf32>
    %25 = tpu.matmul %23, %24, %cst_7 {dimension_numbers = #tpu.dot_dimension_numbers<[1], [0], [0], [1], [0, 0, 1, 1], [], []>} : vector<2x2048xbf16>, vector<2048x512xbf16>, vector<2x512xf32> -> vector<2x512xf32>
    %c0_8 = arith.constant 0 : index
    %c0_9 = arith.constant 0 : index
    %26 = vector.load %arg4[%c0_8, %c0_9] : memref<1x512xf32, #tpu.memory_space<vmem>>, vector<1x512xf32>
    %27 = vector.broadcast %26 : vector<1x512xf32> to vector<2x512xf32>
    %28 = arith.addf %25, %27 : vector<2x512xf32>
    %29 = arith.truncf %28 : vector<2x512xf32> to vector<2x512xbf16>
    %c0_10 = arith.constant 0 : index
    %c0_11 = arith.constant 0 : index
    %30 = vector.load %arg5[%c0_10, %c0_11] : memref<512x512xbf16, #tpu.memory_space<vmem>>, vector<512x512xbf16>
    %cst_12 = arith.constant dense<0.000000e+00> : vector<2x512xf32>
    %31 = tpu.matmul %29, %30, %cst_12 {dimension_numbers = #tpu.dot_dimension_numbers<[1], [0], [0], [1], [0, 0, 1, 1], [], []>} : vector<2x512xbf16>, vector<512x512xbf16>, vector<2x512xf32> -> vector<2x512xf32>
    %c0_13 = arith.constant 0 : index
    %c0_14 = arith.constant 0 : index
    %32 = vector.load %arg7[%c0_13, %c0_14] : memref<1x512xf32, #tpu.memory_space<vmem>>, vector<1x512xf32>
    %33 = vector.broadcast %32 : vector<1x512xf32> to vector<2x512xf32>
    %34 = arith.addf %31, %33 : vector<2x512xf32>
    %cst_15 = arith.constant 0.000000e+00 : f32
    %35 = vector.broadcast %cst_15 : f32 to vector<1x128xf32>
    %cst_16 = arith.constant 0.000000e+00 : f32
    %36 = vector.broadcast %cst_16 : f32 to vector<1x128xf32>
    %37 = vector.extract_strided_slice %34 {offsets = [0, 0], sizes = [1, 512], strides = [1, 1]} : vector<2x512xf32> to vector<1x512xf32>
    %38 = arith.truncf %35 : vector<1x128xf32> to vector<1x128xbf16>
    %c0_17 = arith.constant 0 : index
    %c0_18 = arith.constant 0 : index
    %39 = vector.load %arg6[%c0_17, %c0_18] : memref<128x512xbf16, #tpu.memory_space<vmem>>, vector<128x512xbf16>
    %cst_19 = arith.constant dense<0.000000e+00> : vector<1x512xf32>
    %40 = tpu.matmul %38, %39, %cst_19 {dimension_numbers = #tpu.dot_dimension_numbers<[1], [0], [0], [1], [0, 0, 1, 1], [], []>} : vector<1x128xbf16>, vector<128x512xbf16>, vector<1x512xf32> -> vector<1x512xf32>
    %41 = arith.addf %37, %40 : vector<1x512xf32>
    %42 = vector.extract_strided_slice %41 {offsets = [0, 0], sizes = [1, 128], strides = [1, 1]} : vector<1x512xf32> to vector<1x128xf32>
    %43 = arith.negf %42 : vector<1x128xf32>
    %44 = math.exp %43 : vector<1x128xf32>
    %cst_20 = arith.constant 1.000000e+00 : f32
    %45 = vector.broadcast %cst_20 : f32 to vector<1x128xf32>
    %46 = arith.addf %45, %44 : vector<1x128xf32>
    %47 = arith.divf %45, %46 : vector<1x128xf32>
    %48 = vector.extract_strided_slice %41 {offsets = [0, 128], sizes = [1, 128], strides = [1, 1]} : vector<1x512xf32> to vector<1x128xf32>
    %49 = arith.negf %48 : vector<1x128xf32>
    %50 = math.exp %49 : vector<1x128xf32>
    %cst_21 = arith.constant 1.000000e+00 : f32
    %51 = vector.broadcast %cst_21 : f32 to vector<1x128xf32>
    %52 = arith.addf %51, %50 : vector<1x128xf32>
    %53 = arith.divf %51, %52 : vector<1x128xf32>
    %54 = vector.extract_strided_slice %41 {offsets = [0, 256], sizes = [1, 128], strides = [1, 1]} : vector<1x512xf32> to vector<1x128xf32>
    %55 = math.tanh %54 : vector<1x128xf32>
    %56 = vector.extract_strided_slice %41 {offsets = [0, 384], sizes = [1, 128], strides = [1, 1]} : vector<1x512xf32> to vector<1x128xf32>
    %57 = arith.negf %56 : vector<1x128xf32>
    %58 = math.exp %57 : vector<1x128xf32>
    %cst_22 = arith.constant 1.000000e+00 : f32
    %59 = vector.broadcast %cst_22 : f32 to vector<1x128xf32>
    %60 = arith.addf %59, %58 : vector<1x128xf32>
    %61 = arith.divf %59, %60 : vector<1x128xf32>
    %62 = arith.mulf %53, %36 : vector<1x128xf32>
    %63 = arith.mulf %47, %55 : vector<1x128xf32>
    %64 = arith.addf %62, %63 : vector<1x128xf32>
    %65 = math.tanh %64 : vector<1x128xf32>
    %66 = arith.mulf %61, %65 : vector<1x128xf32>
    %67 = vector.extract_strided_slice %34 {offsets = [1, 0], sizes = [1, 512], strides = [1, 1]} : vector<2x512xf32> to vector<1x512xf32>
    %68 = arith.truncf %66 : vector<1x128xf32> to vector<1x128xbf16>
    %c0_23 = arith.constant 0 : index
    %c0_24 = arith.constant 0 : index
    %69 = vector.load %arg6[%c0_23, %c0_24] : memref<128x512xbf16, #tpu.memory_space<vmem>>, vector<128x512xbf16>
    %cst_25 = arith.constant dense<0.000000e+00> : vector<1x512xf32>
    %70 = tpu.matmul %68, %69, %cst_25 {dimension_numbers = #tpu.dot_dimension_numbers<[1], [0], [0], [1], [0, 0, 1, 1], [], []>} : vector<1x128xbf16>, vector<128x512xbf16>, vector<1x512xf32> -> vector<1x512xf32>
    %71 = arith.addf %67, %70 : vector<1x512xf32>
    %72 = vector.extract_strided_slice %71 {offsets = [0, 0], sizes = [1, 128], strides = [1, 1]} : vector<1x512xf32> to vector<1x128xf32>
    %73 = arith.negf %72 : vector<1x128xf32>
    %74 = math.exp %73 : vector<1x128xf32>
    %cst_26 = arith.constant 1.000000e+00 : f32
    %75 = vector.broadcast %cst_26 : f32 to vector<1x128xf32>
    %76 = arith.addf %75, %74 : vector<1x128xf32>
    %77 = arith.divf %75, %76 : vector<1x128xf32>
    %78 = vector.extract_strided_slice %71 {offsets = [0, 128], sizes = [1, 128], strides = [1, 1]} : vector<1x512xf32> to vector<1x128xf32>
    %79 = arith.negf %78 : vector<1x128xf32>
    %80 = math.exp %79 : vector<1x128xf32>
    %cst_27 = arith.constant 1.000000e+00 : f32
    %81 = vector.broadcast %cst_27 : f32 to vector<1x128xf32>
    %82 = arith.addf %81, %80 : vector<1x128xf32>
    %83 = arith.divf %81, %82 : vector<1x128xf32>
    %84 = vector.extract_strided_slice %71 {offsets = [0, 256], sizes = [1, 128], strides = [1, 1]} : vector<1x512xf32> to vector<1x128xf32>
    %85 = math.tanh %84 : vector<1x128xf32>
    %86 = vector.extract_strided_slice %71 {offsets = [0, 384], sizes = [1, 128], strides = [1, 1]} : vector<1x512xf32> to vector<1x128xf32>
    %87 = arith.negf %86 : vector<1x128xf32>
    %88 = math.exp %87 : vector<1x128xf32>
    %cst_28 = arith.constant 1.000000e+00 : f32
    %89 = vector.broadcast %cst_28 : f32 to vector<1x128xf32>
    %90 = arith.addf %89, %88 : vector<1x128xf32>
    %91 = arith.divf %89, %90 : vector<1x128xf32>
    %92 = arith.mulf %83, %64 : vector<1x128xf32>
    %93 = arith.mulf %77, %85 : vector<1x128xf32>
    %94 = arith.addf %92, %93 : vector<1x128xf32>
    %95 = math.tanh %94 : vector<1x128xf32>
    %96 = arith.mulf %91, %95 : vector<1x128xf32>
    %97 = tpu.concatenate %66, %96 in 0 : vector<1x128xf32>, vector<1x128xf32> -> vector<2x128xf32>
    %98 = arith.truncf %97 : vector<2x128xf32> to vector<2x128xbf16>
    %c0_29 = arith.constant 0 : index
    %c0_30 = arith.constant 0 : index
    %99 = vector.load %arg8[%c0_29, %c0_30] : memref<128x128xbf16, #tpu.memory_space<vmem>>, vector<128x128xbf16>
    %cst_31 = arith.constant dense<0.000000e+00> : vector<2x128xf32>
    %100 = tpu.matmul %98, %99, %cst_31 {dimension_numbers = #tpu.dot_dimension_numbers<[1], [0], [0], [1], [0, 0, 1, 1], [], []>} : vector<2x128xbf16>, vector<128x128xbf16>, vector<2x128xf32> -> vector<2x128xf32>
    %c0_32 = arith.constant 0 : index
    %c0_33 = arith.constant 0 : index
    %101 = vector.load %arg10[%c0_32, %c0_33] : memref<1x128xf32, #tpu.memory_space<vmem>>, vector<1x128xf32>
    %102 = vector.broadcast %101 : vector<1x128xf32> to vector<2x128xf32>
    %103 = arith.addf %100, %102 : vector<2x128xf32>
    %cst_34 = arith.constant 0.000000e+00 : f32
    %104 = vector.broadcast %cst_34 : f32 to vector<1x32xf32>
    %cst_35 = arith.constant 0.000000e+00 : f32
    %105 = vector.broadcast %cst_35 : f32 to vector<1x32xf32>
    %106 = vector.extract_strided_slice %103 {offsets = [0, 0], sizes = [1, 128], strides = [1, 1]} : vector<2x128xf32> to vector<1x128xf32>
    %107 = arith.truncf %104 : vector<1x32xf32> to vector<1x32xbf16>
    %c0_36 = arith.constant 0 : index
    %c0_37 = arith.constant 0 : index
    %108 = vector.load %arg9[%c0_36, %c0_37] : memref<32x128xbf16, #tpu.memory_space<vmem>>, vector<32x128xbf16>
    %cst_38 = arith.constant dense<0.000000e+00> : vector<1x128xf32>
    %109 = tpu.matmul %107, %108, %cst_38 {dimension_numbers = #tpu.dot_dimension_numbers<[1], [0], [0], [1], [0, 0, 1, 1], [], []>} : vector<1x32xbf16>, vector<32x128xbf16>, vector<1x128xf32> -> vector<1x128xf32>
    %110 = arith.addf %106, %109 : vector<1x128xf32>
    %111 = vector.extract_strided_slice %110 {offsets = [0, 0], sizes = [1, 32], strides = [1, 1]} : vector<1x128xf32> to vector<1x32xf32>
    %112 = arith.negf %111 : vector<1x32xf32>
    %113 = math.exp %112 : vector<1x32xf32>
    %cst_39 = arith.constant 1.000000e+00 : f32
    %114 = vector.broadcast %cst_39 : f32 to vector<1x32xf32>
    %115 = arith.addf %114, %113 : vector<1x32xf32>
    %116 = arith.divf %114, %115 : vector<1x32xf32>
    %117 = vector.extract_strided_slice %110 {offsets = [0, 32], sizes = [1, 32], strides = [1, 1]} : vector<1x128xf32> to vector<1x32xf32>
    %118 = arith.negf %117 : vector<1x32xf32>
    %119 = math.exp %118 : vector<1x32xf32>
    %cst_40 = arith.constant 1.000000e+00 : f32
    %120 = vector.broadcast %cst_40 : f32 to vector<1x32xf32>
    %121 = arith.addf %120, %119 : vector<1x32xf32>
    %122 = arith.divf %120, %121 : vector<1x32xf32>
    %123 = vector.extract_strided_slice %110 {offsets = [0, 64], sizes = [1, 32], strides = [1, 1]} : vector<1x128xf32> to vector<1x32xf32>
    %124 = math.tanh %123 : vector<1x32xf32>
    %125 = vector.extract_strided_slice %110 {offsets = [0, 96], sizes = [1, 32], strides = [1, 1]} : vector<1x128xf32> to vector<1x32xf32>
    %126 = arith.negf %125 : vector<1x32xf32>
    %127 = math.exp %126 : vector<1x32xf32>
    %cst_41 = arith.constant 1.000000e+00 : f32
    %128 = vector.broadcast %cst_41 : f32 to vector<1x32xf32>
    %129 = arith.addf %128, %127 : vector<1x32xf32>
    %130 = arith.divf %128, %129 : vector<1x32xf32>
    %131 = arith.mulf %122, %105 : vector<1x32xf32>
    %132 = arith.mulf %116, %124 : vector<1x32xf32>
    %133 = arith.addf %131, %132 : vector<1x32xf32>
    %134 = math.tanh %133 : vector<1x32xf32>
    %135 = arith.mulf %130, %134 : vector<1x32xf32>
    %136 = vector.extract_strided_slice %103 {offsets = [1, 0], sizes = [1, 128], strides = [1, 1]} : vector<2x128xf32> to vector<1x128xf32>
    %137 = arith.truncf %135 : vector<1x32xf32> to vector<1x32xbf16>
    %c0_42 = arith.constant 0 : index
    %c0_43 = arith.constant 0 : index
    %138 = vector.load %arg9[%c0_42, %c0_43] : memref<32x128xbf16, #tpu.memory_space<vmem>>, vector<32x128xbf16>
    %cst_44 = arith.constant dense<0.000000e+00> : vector<1x128xf32>
    %139 = tpu.matmul %137, %138, %cst_44 {dimension_numbers = #tpu.dot_dimension_numbers<[1], [0], [0], [1], [0, 0, 1, 1], [], []>} : vector<1x32xbf16>, vector<32x128xbf16>, vector<1x128xf32> -> vector<1x128xf32>
    %140 = arith.addf %136, %139 : vector<1x128xf32>
    %141 = vector.extract_strided_slice %140 {offsets = [0, 0], sizes = [1, 32], strides = [1, 1]} : vector<1x128xf32> to vector<1x32xf32>
    %142 = arith.negf %141 : vector<1x32xf32>
    %143 = math.exp %142 : vector<1x32xf32>
    %cst_45 = arith.constant 1.000000e+00 : f32
    %144 = vector.broadcast %cst_45 : f32 to vector<1x32xf32>
    %145 = arith.addf %144, %143 : vector<1x32xf32>
    %146 = arith.divf %144, %145 : vector<1x32xf32>
    %147 = vector.extract_strided_slice %140 {offsets = [0, 32], sizes = [1, 32], strides = [1, 1]} : vector<1x128xf32> to vector<1x32xf32>
    %148 = arith.negf %147 : vector<1x32xf32>
    %149 = math.exp %148 : vector<1x32xf32>
    %cst_46 = arith.constant 1.000000e+00 : f32
    %150 = vector.broadcast %cst_46 : f32 to vector<1x32xf32>
    %151 = arith.addf %150, %149 : vector<1x32xf32>
    %152 = arith.divf %150, %151 : vector<1x32xf32>
    %153 = vector.extract_strided_slice %140 {offsets = [0, 64], sizes = [1, 32], strides = [1, 1]} : vector<1x128xf32> to vector<1x32xf32>
    %154 = math.tanh %153 : vector<1x32xf32>
    %155 = vector.extract_strided_slice %140 {offsets = [0, 96], sizes = [1, 32], strides = [1, 1]} : vector<1x128xf32> to vector<1x32xf32>
    %156 = arith.negf %155 : vector<1x32xf32>
    %157 = math.exp %156 : vector<1x32xf32>
    %cst_47 = arith.constant 1.000000e+00 : f32
    %158 = vector.broadcast %cst_47 : f32 to vector<1x32xf32>
    %159 = arith.addf %158, %157 : vector<1x32xf32>
    %160 = arith.divf %158, %159 : vector<1x32xf32>
    %161 = arith.mulf %152, %133 : vector<1x32xf32>
    %162 = arith.mulf %146, %154 : vector<1x32xf32>
    %163 = arith.addf %161, %162 : vector<1x32xf32>
    %164 = math.tanh %163 : vector<1x32xf32>
    %165 = arith.mulf %160, %164 : vector<1x32xf32>
    %166 = tpu.concatenate %135, %165 in 0 : vector<1x32xf32>, vector<1x32xf32> -> vector<2x32xf32>
    %167 = arith.truncf %166 : vector<2x32xf32> to vector<2x32xbf16>
    %c0_48 = arith.constant 0 : index
    %c0_49 = arith.constant 0 : index
    %168 = vector.load %arg11[%c0_48, %c0_49] : memref<32x4xbf16, #tpu.memory_space<vmem>>, vector<32x4xbf16>
    %cst_50 = arith.constant dense<0.000000e+00> : vector<2x4xf32>
    %169 = tpu.matmul %167, %168, %cst_50 {dimension_numbers = #tpu.dot_dimension_numbers<[1], [0], [0], [1], [0, 0, 1, 1], [], []>} : vector<2x32xbf16>, vector<32x4xbf16>, vector<2x4xf32> -> vector<2x4xf32>
    %c0_51 = arith.constant 0 : index
    %c0_52 = arith.constant 0 : index
    %170 = vector.load %arg13[%c0_51, %c0_52] : memref<1x4xf32, #tpu.memory_space<vmem>>, vector<1x4xf32>
    %171 = vector.broadcast %170 : vector<1x4xf32> to vector<2x4xf32>
    %172 = arith.addf %169, %171 : vector<2x4xf32>
    %cst_53 = arith.constant 0.000000e+00 : f32
    %173 = vector.broadcast %cst_53 : f32 to vector<1x1xf32>
    %cst_54 = arith.constant 0.000000e+00 : f32
    %174 = vector.broadcast %cst_54 : f32 to vector<1x1xf32>
    %175 = vector.extract_strided_slice %172 {offsets = [0, 0], sizes = [1, 4], strides = [1, 1]} : vector<2x4xf32> to vector<1x4xf32>
    %c0_55 = arith.constant 0 : index
    %c0_56 = arith.constant 0 : index
    %176 = vector.load %arg12[%c0_55, %c0_56] : memref<1x4xbf16, #tpu.memory_space<vmem>>, vector<1x4xbf16>
    %177 = arith.extf %176 : vector<1x4xbf16> to vector<1x4xf32>
    %178 = vector.broadcast %173 : vector<1x1xf32> to vector<1x4xf32>
    %179 = arith.mulf %178, %177 : vector<1x4xf32>
    %180 = arith.addf %175, %179 : vector<1x4xf32>
    %181 = arith.negf %180 : vector<1x4xf32>
    %182 = math.exp %181 : vector<1x4xf32>
    %cst_57 = arith.constant 1.000000e+00 : f32
    %183 = vector.broadcast %cst_57 : f32 to vector<1x4xf32>
    %184 = arith.addf %183, %182 : vector<1x4xf32>
    %185 = arith.divf %183, %184 : vector<1x4xf32>
    %186 = math.tanh %180 : vector<1x4xf32>
    %187 = vector.extract_strided_slice %185 {offsets = [0, 0], sizes = [1, 1], strides = [1, 1]} : vector<1x4xf32> to vector<1x1xf32>
    %188 = vector.extract_strided_slice %185 {offsets = [0, 1], sizes = [1, 1], strides = [1, 1]} : vector<1x4xf32> to vector<1x1xf32>
    %189 = vector.extract_strided_slice %186 {offsets = [0, 2], sizes = [1, 1], strides = [1, 1]} : vector<1x4xf32> to vector<1x1xf32>
    %190 = vector.extract_strided_slice %185 {offsets = [0, 3], sizes = [1, 1], strides = [1, 1]} : vector<1x4xf32> to vector<1x1xf32>
    %191 = arith.mulf %188, %174 : vector<1x1xf32>
    %192 = arith.mulf %187, %189 : vector<1x1xf32>
    %193 = arith.addf %191, %192 : vector<1x1xf32>
    %194 = math.tanh %193 : vector<1x1xf32>
    %195 = arith.mulf %190, %194 : vector<1x1xf32>
    %196 = vector.extract_strided_slice %172 {offsets = [1, 0], sizes = [1, 4], strides = [1, 1]} : vector<2x4xf32> to vector<1x4xf32>
    %c0_58 = arith.constant 0 : index
    %c0_59 = arith.constant 0 : index
    %197 = vector.load %arg12[%c0_58, %c0_59] : memref<1x4xbf16, #tpu.memory_space<vmem>>, vector<1x4xbf16>
    %198 = arith.extf %197 : vector<1x4xbf16> to vector<1x4xf32>
    %199 = vector.broadcast %195 : vector<1x1xf32> to vector<1x4xf32>
    %200 = arith.mulf %199, %198 : vector<1x4xf32>
    %201 = arith.addf %196, %200 : vector<1x4xf32>
    %202 = arith.negf %201 : vector<1x4xf32>
    %203 = math.exp %202 : vector<1x4xf32>
    %cst_60 = arith.constant 1.000000e+00 : f32
    %204 = vector.broadcast %cst_60 : f32 to vector<1x4xf32>
    %205 = arith.addf %204, %203 : vector<1x4xf32>
    %206 = arith.divf %204, %205 : vector<1x4xf32>
    %207 = math.tanh %201 : vector<1x4xf32>
    %208 = vector.extract_strided_slice %206 {offsets = [0, 0], sizes = [1, 1], strides = [1, 1]} : vector<1x4xf32> to vector<1x1xf32>
    %209 = vector.extract_strided_slice %206 {offsets = [0, 1], sizes = [1, 1], strides = [1, 1]} : vector<1x4xf32> to vector<1x1xf32>
    %210 = vector.extract_strided_slice %207 {offsets = [0, 2], sizes = [1, 1], strides = [1, 1]} : vector<1x4xf32> to vector<1x1xf32>
    %211 = vector.extract_strided_slice %206 {offsets = [0, 3], sizes = [1, 1], strides = [1, 1]} : vector<1x4xf32> to vector<1x1xf32>
    %212 = arith.mulf %209, %193 : vector<1x1xf32>
    %213 = arith.mulf %208, %210 : vector<1x1xf32>
    %214 = arith.addf %212, %213 : vector<1x1xf32>
    %215 = math.tanh %214 : vector<1x1xf32>
    %216 = arith.mulf %211, %215 : vector<1x1xf32>
    %217 = tpu.concatenate %195, %216 in 0 : vector<1x1xf32>, vector<1x1xf32> -> vector<2x1xf32>
    %c0_61 = arith.constant 0 : index
    %c0_62 = arith.constant 0 : index
    %218 = vector.load %arg14[%c0_61, %c0_62] : memref<1x1xf32, #tpu.memory_space<vmem>>, vector<1x1xf32>
    %219 = vector.broadcast %218 : vector<1x1xf32> to vector<2x1xf32>
    %220 = arith.mulf %217, %219 : vector<2x1xf32>
    %c0_63 = arith.constant 0 : index
    %c0_64 = arith.constant 0 : index
    %221 = vector.load %arg15[%c0_63, %c0_64] : memref<1x1xf32, #tpu.memory_space<vmem>>, vector<1x1xf32>
    %222 = vector.broadcast %221 : vector<1x1xf32> to vector<2x1xf32>
    %223 = arith.addf %220, %222 : vector<2x1xf32>
    %c0_65 = arith.constant 0 : index
    %c0_66 = arith.constant 0 : index
    %224 = vector.load %arg16[%c0_65, %c0_66] : memref<2x1xf32, #tpu.memory_space<vmem>>, vector<2x1xf32>
    tpu.vector_store %arg16[%c0_65, %c0_66], %223 {strides = array<i32>} : memref<2x1xf32, #tpu.memory_space<vmem>>, vector<2x1xf32>,
    return
  }
}

</mosaic_0001>

<bundles_post_ra>
// kernel: forward.1
= control target key start
LH: loop header
LB: loop body
LE: loop exit
PB: predicated region body
PF: predicated region fallthrough
CT: control target
= control target key end

     0   :  { %s9832_s0 = inlined_call_operand.vmem [shape: bf16[32,768], index: 0, kind: input, shape index: {}]   ;;  %s9833_s1 = inlined_call_operand.vmem [shape: bf16[768,128], index: 1, kind: input, shape index: {}]   ;;  %s9834_s2 = inlined_call_operand.hbm [shape: f32[1,128], index: 2, kind: input, shape index: {}]   ;;  %s9835_s3 = inlined_call_operand.hbm [shape: bf16[2048,512], index: 3, kind: input, shape index: {}]   ;;  %s9836_s4 = inlined_call_operand.hbm [shape: f32[1,512], index: 4, kind: input, shape index: {}]   ;;  %s9837_s5 = inlined_call_operand.vmem [shape: bf16[512,512], index: 5, kind: input, shape index: {}]   ;;  %s9838_s6 = inlined_call_operand.vmem [shape: bf16[128,512], index: 6, kind: input, shape index: {}]   ;;  %s9839_s7 = inlined_call_operand.hbm [shape: f32[1,512], index: 7, kind: input, shape index: {}]   ;;  %s9840_s8 = inlined_call_operand.hbm [shape: bf16[128,128], index: 8, kind: input, shape index: {}]   ;;  %s9841_s9 = inlined_call_operand.hbm [shape: bf16[32,128], index: 9, kind: input, shape index: {}]   ;;  %s9842_s10 = inlined_call_operand.hbm [shape: f32[1,128], index: 10, kind: input, shape index: {}]   ;;  %s9843_s11 = inlined_call_operand.vmem [shape: bf16[32,4], index: 11, kind: input, shape index: {}]   ;;  %s9844_s12 = inlined_call_operand.hbm [shape: bf16[1,4], index: 12, kind: input, shape index: {}]   ;;  %s9845_s13 = inlined_call_operand.hbm [shape: f32[1,4], index: 13, kind: input, shape index: {}]   ;;  %s9846_s14 = inlined_call_operand.<no memory space> [shape: f32[1,1], index: 14, kind: input, shape index: {}]   ;;  %s9847_s16 = inlined_call_operand.vmem [shape: f32[2,1], index: 16, kind: output, shape index: {}]   ;;  %s9848_s15 = inlined_call_operand.<no memory space> [shape: f32[1,1], index: 15, kind: input, shape index: {}]  }
   0x1   :  { %9850 = sst [smem:[#allocation25_spill]] %s9832_s0  ;;  %v21_v0 = vstv %s9846_s14  ;;  %v23_v1 = vstv %s9848_s15 }
   0x2   :  { %22 = vst [vmem:[#allocation4] sm:$0x1] %v21_v0  ;;  %24 = vst [vmem:[#allocation5] sm:$0x1] %v23_v1 }
   0x3   :  { %25 = vsyncpa [#allocation7], 0 }
   0x4   :  { %26 = vsyncpa [#allocation9], 0 }
   0x5   :  { %27 = vsyncpa [#allocation12], 0 }
   0x6   :  { %28 = vsyncpa [#allocation15], 0 }
   0x7   :  { %29 = vsyncpa [#allocation18], 0  ;;  %s8757_s25 = smov [#allocation8]   ;;  %s8549_s29 = scalar_lea.hbm %s9835_s3, 65536 }
   0x8   :  { %s49_s26 = sshll.u32 %s8757_s25, 4  ;;  %p8550_p0 = scmp.ne.s32.totalorder %s9835_s3, %s8549_s29  ;;  %s50_s26 = int_to_ptr.vmem [resolvable:$true] %s49_s26 }
   0x9   :  { %p8553_p1 = scmp.lt.u32.totalorder %s8549_s29, %s9835_s3 }
   0xb   :  { %p8555_p2 = pnand %p8553_p1, %p8550_p0 }
   0xd   :  { %8558 = shalt.err (!%p8555_p2)
}
   0xe   :  { %s8559_s17 = scalar_lea.vmem %s50_s26, 65536  ;;  %p8564_p4 = scmp.lt.s32.totalorder %s50_s26, %s50_s26 }
   0xf   :  { %p8560_p3 = scmp.ne.s32.totalorder %s50_s26, %s8559_s17  ;;  %p8565_p5 = scmp.lt.s32.totalorder %s8559_s17, %s8559_s17 }
  0x11   :  { %p8566_p6 = por %p8565_p5, %p8564_p4 }
  0x13   :  { %p8567_p7 = pnand %p8566_p6, %p8560_p3 }
  0x15   :  { %8570 = shalt.err (!%p8567_p7)
}
  0x16   :  { %s8758_s18 = smov 256   ;;  %s8759_s19 = smov 16  }
  0x17   :  { %55 = dma.hbm_to_vmem [thread:$0]  %s9835_s3, 65536, %s50_s26, [#allocation9], %s8758_s18, %s8758_s18, %s8759_s19  }
  0x18   :  { %s8760_s22 = smov [#allocation11]   ;;  %s8571_s27 = scalar_lea.hbm %s9839_s7, 64 }
  0x19   :  { %s76_s23 = sshll.u32 %s8760_s22, 4  ;;  %p8572_p8 = scmp.ne.s32.totalorder %s9839_s7, %s8571_s27  ;;  %s77_s23 = int_to_ptr.vmem [resolvable:$true] %s76_s23 }
  0x1a   :  { %p8575_p9 = scmp.lt.u32.totalorder %s8571_s27, %s9839_s7 }
  0x1c   :  { %p8577_p10 = pnand %p8575_p9, %p8572_p8 }
  0x1e   :  { %8580 = shalt.err (!%p8577_p10)
}
  0x1f   :  { %s8581_s0 = scalar_lea.vmem %s77_s23, 64  ;;  %p8586_p12 = scmp.lt.s32.totalorder %s77_s23, %s77_s23 }
  0x20   :  { %p8582_p11 = scmp.ne.s32.totalorder %s77_s23, %s8581_s0  ;;  %p8587_p13 = scmp.lt.s32.totalorder %s8581_s0, %s8581_s0 }
  0x22   :  { %p8588_p0 = por %p8587_p13, %p8586_p12 }
  0x24   :  { %p8589_p1 = pnand %p8588_p0, %p8582_p11 }
  0x26   :  { %8592 = shalt.err (!%p8589_p1)
}
  0x27   :  { %79 = dma.hbm_to_vmem [thread:$0]  %s9839_s7, 64, %s77_s23, [#allocation12]  }
  0x28   :  { %s8761_s15 = smov [#allocation14]   ;;  %s8762_s18 = smov [#allocation17]  }
  0x29   :  { %s97_s17 = sshll.u32 %s8761_s15, 4  ;;  %s122_s19 = sshll.u32 %s8762_s18, 4  ;;  %s98_s17 = int_to_ptr.vmem [resolvable:$true] %s97_s17  ;;  %s8895_s19 = int_to_ptr.vmem [resolvable:$true] %s122_s19 }
  0x2a   :  { %s8593_s22 = scalar_lea.hbm %s9841_s9, 256 }
  0x2b   :  { %p8594_p2 = scmp.ne.s32.totalorder %s9841_s9, %s8593_s22  ;;  %p8597_p3 = scmp.lt.u32.totalorder %s8593_s22, %s9841_s9 }
  0x2d   :  { %p8599_p4 = pnand %p8597_p3, %p8594_p2 }
  0x2f   :  { %8602 = shalt.err (!%p8599_p4)
}
  0x30   :  { %s8603_s7 = scalar_lea.vmem %s98_s17, 256  ;;  %p8608_p6 = scmp.lt.s32.totalorder %s98_s17, %s98_s17 }
  0x31   :  { %p8604_p5 = scmp.ne.s32.totalorder %s98_s17, %s8603_s7  ;;  %p8609_p7 = scmp.lt.s32.totalorder %s8603_s7, %s8603_s7 }
  0x33   :  { %p8610_p8 = por %p8609_p7, %p8608_p6 }
  0x35   :  { %p8611_p9 = pnand %p8610_p8, %p8604_p5 }
  0x37   :  { %8614 = shalt.err (!%p8611_p9)
}
  0x38   :  { %s8763_s23 = smov 64   ;;  %s8764_s29 = smov 4  }
  0x39   :  { %103 = dma.hbm_to_vmem [thread:$0]  %s9841_s9, 256, %s98_s17, [#allocation15], %s8763_s23, %s8763_s23, %s8764_s29  }
  0x3a   :  { %s8615_s26 = scalar_lea.hbm %s9844_s12, 16 }
  0x3b   :  { %p8616_p10 = scmp.ne.s32.totalorder %s9844_s12, %s8615_s26  ;;  %p8619_p11 = scmp.lt.u32.totalorder %s8615_s26, %s9844_s12 }
  0x3d   :  { %p8621_p12 = pnand %p8619_p11, %p8616_p10 }
  0x3f   :  { %8624 = shalt.err (!%p8621_p12)
}
  0x40   :  { %s8625_s22 = scalar_lea.vmem %s8895_s19, 16  ;;  %s8629_s9 = scalar_lea.vmem %s8895_s19, 32 }
  0x41   :  { %p8626_p13 = scmp.ne.s32.totalorder %s8895_s19, %s8625_s22  ;;  %p8630_p0 = scmp.lt.s32.totalorder %s8895_s19, %s8895_s19 }
  0x42   :  { %p8631_p1 = scmp.lt.s32.totalorder %s8629_s9, %s8625_s22 }
  0x44   :  { %p8632_p2 = por %p8631_p1, %p8630_p0 }
  0x46   :  { %p8633_p3 = pnand %p8632_p2, %p8626_p13 }
  0x48   :  { %8636 = shalt.err (!%p8633_p3)
}
  0x49   :  { %125 = dma.hbm_to_vmem [thread:$0]  %s9844_s12, 16, %s8895_s19, [#allocation18]  }
  0x4a   :  { %s8765_s25 = smov [#allocation6]   ;;  %s8766_s28 = smov [#allocation10]  }
  0x4b   :  { %s40_s27 = sshll.u32 %s8765_s25, 4  ;;  %s62_s7 = sshll.u32 %s8766_s28, 4  ;;  %s41_s27 = int_to_ptr.vmem [resolvable:$true] %s40_s27  ;;  %s63_s7 = int_to_ptr.vmem [resolvable:$true] %s62_s7 }
  0x4c   :  { %s8637_s0 = scalar_lea.hbm %s9834_s2, 16 }
  0x4d   :  { %p8638_p4 = scmp.ne.s32.totalorder %s9834_s2, %s8637_s0  ;;  %p8641_p5 = scmp.lt.u32.totalorder %s8637_s0, %s9834_s2 }
  0x4f   :  { %p8643_p6 = pnand %p8641_p5, %p8638_p4 }
  0x51   :  { %8646 = shalt.err (!%p8643_p6)
}
  0x52   :  { %s8647_s12 = scalar_lea.vmem %s41_s27, 16  ;;  %s8651_s19 = scalar_lea.vmem %s41_s27, 32 }
  0x53   :  { %p8648_p7 = scmp.ne.s32.totalorder %s41_s27, %s8647_s12  ;;  %p8652_p8 = scmp.lt.s32.totalorder %s41_s27, %s41_s27 }
  0x54   :  { %p8653_p9 = scmp.lt.s32.totalorder %s8651_s19, %s8647_s12 }
  0x56   :  { %p8654_p10 = por %p8653_p9, %p8652_p8 }
  0x58   :  { %p8655_p11 = pnand %p8654_p10, %p8648_p7 }
  0x5a   :  { %8658 = shalt.err (!%p8655_p11)
}
  0x5b   :  { %43 = dma.hbm_to_vmem [thread:$0]  %s9834_s2, 16, %s41_s27, [#allocation7]  }
  0x5c   :  { %s8659_s17 = scalar_lea.hbm %s9836_s4, 64 }
  0x5d   :  { %p8660_p12 = scmp.ne.s32.totalorder %s9836_s4, %s8659_s17  ;;  %p8663_p13 = scmp.lt.u32.totalorder %s8659_s17, %s9836_s4 }
  0x5f   :  { %p8665_p0 = pnand %p8663_p13, %p8660_p12 }
  0x61   :  { %8668 = shalt.err (!%p8665_p0)
}
  0x62   :  { %s8669_s14 = scalar_lea.vmem %s63_s7, 64  ;;  %p8674_p2 = scmp.lt.s32.totalorder %s63_s7, %s63_s7 }
  0x63   :  { %p8670_p1 = scmp.ne.s32.totalorder %s63_s7, %s8669_s14  ;;  %p8675_p3 = scmp.lt.s32.totalorder %s8669_s14, %s8669_s14 }
  0x65   :  { %p8676_p4 = por %p8675_p3, %p8674_p2 }
  0x67   :  { %p8677_p5 = pnand %p8676_p4, %p8670_p1 }
  0x69   :  { %8680 = shalt.err (!%p8677_p5)
}
  0x6a   :  { %65 = dma.hbm_to_vmem [thread:$0]  %s9836_s4, 64, %s63_s7, [#allocation9]  }
  0x6b   :  { %s8767_s0 = smov [#allocation13]   ;;  %s8768_s26 = smov [#allocation16]  }
  0x6c   :  { %s85_s3 = sshll.u32 %s8767_s0, 4  ;;  %s110_s15 = sshll.u32 %s8768_s26, 4  ;;  %s86_s3 = int_to_ptr.vmem [resolvable:$true] %s85_s3  ;;  %s111_s15 = int_to_ptr.vmem [resolvable:$true] %s110_s15 }
  0x6d   :  { %s8681_s19 = scalar_lea.hbm %s9840_s8, 1024 }
  0x6e   :  { %p8682_p6 = scmp.ne.s32.totalorder %s9840_s8, %s8681_s19  ;;  %p8685_p7 = scmp.lt.u32.totalorder %s8681_s19, %s9840_s8 }
  0x70   :  { %p8687_p8 = pnand %p8685_p7, %p8682_p6 }
  0x72   :  { %8690 = shalt.err (!%p8687_p8)
}
  0x73   :  { %s8691_s4 = scalar_lea.vmem %s86_s3, 1024  ;;  %p8696_p10 = scmp.lt.s32.totalorder %s86_s3, %s86_s3 }
  0x74   :  { %p8692_p9 = scmp.ne.s32.totalorder %s86_s3, %s8691_s4  ;;  %p8697_p11 = scmp.lt.s32.totalorder %s8691_s4, %s8691_s4 }
  0x76   :  { %p8698_p12 = por %p8697_p11, %p8696_p10 }
  0x78   :  { %p8699_p13 = pnand %p8698_p12, %p8692_p9 }
  0x7a   :  { %8702 = shalt.err (!%p8699_p13)
}
  0x7b   :  { %91 = dma.hbm_to_vmem [thread:$0]  %s9840_s8, 1024, %s86_s3, [#allocation12], %s8763_s23, %s8763_s23, %s8764_s29  }
  0x7c   :  { %s8703_s28 = scalar_lea.hbm %s9842_s10, 16 }
  0x7d   :  { %p8704_p0 = scmp.ne.s32.totalorder %s9842_s10, %s8703_s28  ;;  %p8707_p1 = scmp.lt.u32.totalorder %s8703_s28, %s9842_s10 }
  0x7f   :  { %p8709_p2 = pnand %p8707_p1, %p8704_p0 }
  0x81   :  { %8712 = shalt.err (!%p8709_p2)
}
  0x82   :  { %s8713_s0 = scalar_lea.vmem %s111_s15, 16  ;;  %s8717_s26 = scalar_lea.vmem %s111_s15, 32 }
  0x83   :  { %p8714_p3 = scmp.ne.s32.totalorder %s111_s15, %s8713_s0  ;;  %p8718_p4 = scmp.lt.s32.totalorder %s111_s15, %s111_s15 }
  0x84   :  { %p8719_p5 = scmp.lt.s32.totalorder %s8717_s26, %s8713_s0 }
  0x86   :  { %p8720_p6 = por %p8719_p5, %p8718_p4 }
  0x88   :  { %p8721_p7 = pnand %p8720_p6, %p8714_p3 }
  0x8a   :  { %8724 = shalt.err (!%p8721_p7)
}
  0x8b   :  { %113 = dma.hbm_to_vmem [thread:$0]  %s9842_s10, 16, %s111_s15, [#allocation15]  }
  0x8c   :  { %s8769_s3 = smov [#allocation19]   ;;  %s8725_s20 = scalar_lea.hbm %s9845_s13, 16 }
  0x8d   :  { %s132_s18 = sshll.u32 %s8769_s3, 4  ;;  %p8726_p8 = scmp.ne.s32.totalorder %s9845_s13, %s8725_s20  ;;  %s133_s18 = int_to_ptr.vmem [resolvable:$true] %s132_s18 }
  0x8e   :  { %p8729_p9 = scmp.lt.u32.totalorder %s8725_s20, %s9845_s13 }
  0x90   :  { %p8731_p10 = pnand %p8729_p9, %p8726_p8 }
  0x92   :  { %8734 = shalt.err (!%p8731_p10)
}
  0x93   :  { %s8735_s7 = scalar_lea.vmem %s133_s18, 16  ;;  %s8739_s10 = scalar_lea.vmem %s133_s18, 32 }
  0x94   :  { %p8736_p11 = scmp.ne.s32.totalorder %s133_s18, %s8735_s7  ;;  %p8740_p12 = scmp.lt.s32.totalorder %s133_s18, %s133_s18 }
  0x95   :  { %p8741_p13 = scmp.lt.s32.totalorder %s8739_s10, %s8735_s7 }
  0x97   :  { %p8742_p0 = por %p8741_p13, %p8740_p12 }
  0x99   :  { %p8743_p1 = pnand %p8742_p0, %p8736_p11 }
  0x9b   :  { %8746 = shalt.err (!%p8743_p1)
}
  0x9c   :  { %135 = dma.hbm_to_vmem [thread:$0]  %s9845_s13, 16, %s133_s18, [#allocation18]  }
  0x9d   :  { %8747 = dma.done.wait [#allocation7], 16  }
  0x9e   :  { %8748 = vsyncadd [#allocation7], 4294967280 }
  0x9f   :  { %8749 = dma.done.wait [#allocation9], 65600  }
  0xa0   :  { %8750 = vsyncadd [#allocation9], 4294901696 }
  0xa1   :  { %8751 = dma.done.wait [#allocation12], 1088  }
  0xa2   :  { %8752 = vsyncadd [#allocation12], 4294966208 }
  0xa3   :  { %8753 = dma.done.wait [#allocation15], 272  }
  0xa4   :  { %8754 = vsyncadd [#allocation15], 4294967024 }
  0xa5   :  { %8755 = dma.done.wait [#allocation18], 32  }
  0xa6   :  { %8756 = vsyncadd [#allocation18], 4294967264  ;;  %v7399_v2 = vld [vmem:[%s9833_s1 + $0x40] sm:$0xff]   ;;  %v7403_v6 = vld [vmem:[%s9833_s1 + $0x48] sm:$0xff]   ;;  %s9851_s12 = sld [smem:[#allocation25_spill]]  ;;  %vm8772_vm0 = vmmov 0  }
  0xa7   :  { %v7400_v3 = vld [vmem:[%s9833_s1] sm:$0xff]   ;;  %7156 = vmatprep.subr.bf16.mxu0 %v7399_v2  ;;  %v7404_v7 = vld [vmem:[%s9833_s1 + $0x8] sm:$0xff]   ;;  %v7407_v10 = vld [vmem:[%s9833_s1 + $0x50] sm:$0xff]   ;;  %vm5946_vm1 = vcmask 1040384   ;;  %vm6076_vm2 = vcmask 261120   ;;  %s8777_s14 = smov 2  }
  0xa8   :  { %v7401_v4 = vld [vmem:[%s9833_s1 + $0xc0] sm:$0xff]   ;;  %7157 = vmatpush3.bf16.msra.mxu0 %v7400_v3  ;;  %v7405_v8 = vld [vmem:[%s9833_s1 + $0xc8] sm:$0xff]   ;;  %v7408_v11 = vld [vmem:[%s9833_s1 + $0x10] sm:$0xff]   ;;  %s8778_s2 = smov 3   ;;  %s8779_s27 = smov 125   ;;  %vm6384_vm3 = vcmask 1024  }
  0xa9   :  { %v7402_v5 = vld [vmem:[%s9833_s1 + $0x80] sm:$0xff]   ;;  %7184 = vmatprep.subr.bf16.mxu1 %v7401_v4  ;;  %7158 = vmatprep.subr.bf16.mxu0 %v7403_v6  ;;  %v7406_v9 = vld [vmem:[%s9833_s1 + $0x88] sm:$0xff]   ;;  %v7409_v12 = vld [vmem:[%s9833_s1 + $0xd0] sm:$0xff]  }
  0xaa   :  { %7185 = vmatpush3.bf16.msra.mxu1 %v7402_v5  ;;  %v7410_v13 = vld [vmem:[%s9833_s1 + $0x90] sm:$0xff]   ;;  %v7411_v14 = vld [vmem:[%s9833_s1 + $0x58] sm:$0xff]   ;;  %v7415_v18 = vld [vmem:[%s9833_s1 + $0x60] sm:$0xff]  }
  0xab   :  { %7186 = vmatprep.subr.bf16.mxu1 %v7405_v8  ;;  %v7412_v15 = vld [vmem:[%s9833_s1 + $0x18] sm:$0xff]   ;;  %v7416_v19 = vld [vmem:[%s9833_s1 + $0x20] sm:$0xff]   ;;  %v7419_v22 = vld [vmem:[%s9833_s1 + $0x68] sm:$0xff]  }
  0xac   :  { %7159 = vmatpush3.bf16.msra.mxu0 %v7404_v7  ;;  %v7413_v16 = vld [vmem:[%s9833_s1 + $0xd8] sm:$0xff]   ;;  %v7417_v20 = vld [vmem:[%s9833_s1 + $0xe0] sm:$0xff]   ;;  %v7420_v23 = vld [vmem:[%s9833_s1 + $0x28] sm:$0xff]  }
  0xad   :  { %7160 = vmatprep.subr.bf16.mxu0 %v7407_v10  ;;  %v7414_v17 = vld [vmem:[%s9833_s1 + $0x98] sm:$0xff]   ;;  %v7418_v21 = vld [vmem:[%s9833_s1 + $0xa0] sm:$0xff]   ;;  %v7421_v24 = vld [vmem:[%s9833_s1 + $0xe8] sm:$0xff]  }
  0xae   :  { %7187 = vmatpush3.bf16.msra.mxu1 %v7406_v9  ;;  %v7422_v25 = vld [vmem:[%s9833_s1 + $0xa8] sm:$0xff]   ;;  %v7423_v26 = vld [vmem:[%s9833_s1 + $0x70] sm:$0xff]   ;;  %v7427_v30 = vld [vmem:[%s9833_s1 + $0x78] sm:$0xff]  }
  0xaf   :  { %7188 = vmatprep.subr.bf16.mxu1 %v7409_v12  ;;  %v7424_v27 = vld [vmem:[%s9833_s1 + $0x30] sm:$0xff]   ;;  %v7428_v31 = vld [vmem:[%s9833_s1 + $0x38] sm:$0xff]   ;;  %v7434_v36 = vld [vmem:[%s9833_s1 + $0x140] sm:$0xff]  }
  0xb0   :  { %7161 = vmatpush3.bf16.msra.mxu0 %v7408_v11  ;;  %v7425_v28 = vld [vmem:[%s9833_s1 + $0xf0] sm:$0xff]   ;;  %v7429_v32 = vld [vmem:[%s9833_s1 + $0xf8] sm:$0xff]   ;;  %v7435_v37 = vld [vmem:[%s9851_s12 + $0x8] ss:$24 sps:$4 sm:$0xff]  }
  0xb1   :  { %7162 = vmatprep.subr.bf16.mxu0 %v7411_v14  ;;  %v7426_v29 = vld [vmem:[%s9833_s1 + $0xb0] sm:$0xff]   ;;  %v7430_v33 = vld [vmem:[%s9851_s12] ss:$24 sps:$4 sm:$0xff]   ;;  %v7432_v34 = vld [vmem:[%s9851_s12 + $0x4] ss:$24 sps:$4 sm:$0xff]  }
  0xb2   :  { %7189 = vmatpush3.bf16.msra.mxu1 %v7410_v13  ;;  %v7433_v35 = vld [vmem:[%s9833_s1 + $0xb8] sm:$0xff]   ;;  %663 = vmatprep.mubr.bf16.mxu0 %v7432_v34  ;;  %v7437_v38 = vld [vmem:[%s9851_s12 + $0xc] ss:$24 sps:$4 sm:$0xff]   ;;  %v7441_v42 = vld [vmem:[%s9833_s1 + $0x150] sm:$0xff]  }
  0xb3   :  { %7190 = vmatprep.subr.bf16.mxu1 %v7413_v16  ;;  %v7438_v39 = vld [vmem:[%s9833_s1 + $0x100] sm:$0xff]   ;;  %712 = vmatprep.mubr.bf16.mxu1 %v7437_v38  ;;  %v7439_v40 = vld [vmem:[%s9833_s1 + $0x148] sm:$0xff]   ;;  %v7442_v43 = vld [vmem:[%s9833_s1 + $0x110] sm:$0xff]  }
  0xb4   :  { %7163 = vmatpush3.bf16.msra.mxu0 %v7412_v15  ;;  %v7440_v41 = vld [vmem:[%s9833_s1 + $0x108] sm:$0xff]   ;;  %v7443_v44 = vld [vmem:[%s9833_s1 + $0x158] sm:$0xff]   ;;  %v7445_v48 = vld [vmem:[%s9833_s1 + $0x160] sm:$0xff]  }
  0xb5   :  { %7164 = vmatprep.subr.bf16.mxu0 %v7415_v18  ;;  %v7447_v45 = vld [vmem:[%s9851_s12 + $0x34] ss:$24 sps:$4 sm:$0xff]   ;;  %v7444_v46 = vld [vmem:[%s9833_s1 + $0x118] sm:$0xff]   ;;  %v7450_v47 = vld [vmem:[%s9851_s12 + $0x30] ss:$24 sps:$4 sm:$0xff]  }
  0xb6   :  { %7191 = vmatpush3.bf16.msra.mxu1 %v7414_v17  ;;  %v7452_v49 = vld [vmem:[%s9851_s12 + $0x3c] ss:$24 sps:$4 sm:$0xff]   ;;  %v7454_v50 = vld [vmem:[%s9851_s12 + $0x38] ss:$24 sps:$4 sm:$0xff]   ;;  %v7446_v51 = vld [vmem:[%s9833_s1 + $0x120] sm:$0xff]  }
  0xb7   :  { %7192 = vmatprep.subr.bf16.mxu1 %v7417_v20  ;;  %v7449_v52 = vld [vmem:[%s9833_s1 + $0x168] sm:$0xff]   ;;  %v7455_v55 = vld [vmem:[%s9833_s1 + $0x170] sm:$0xff]   ;;  %v7457_v59 = vld [vmem:[%s9833_s1 + $0x178] sm:$0xff]  }
  0xb8   :  { %7165 = vmatpush3.bf16.msra.mxu0 %v7416_v19  ;;  %v7451_v53 = vld [vmem:[%s9833_s1 + $0x128] sm:$0xff]   ;;  %v7465_v56 = vld [vmem:[#allocation8] ss:$16 sps:$4 sm:$0xff]   ;;  %v7458_v62 = vld [vmem:[%s9833_s1 + $0x138] sm:$0xff]  }
  0xb9   :  { %7166 = vmatprep.subr.bf16.mxu0 %v7419_v22  ;;  %v7461_v54 = vld [vmem:[%s9851_s12 + $0x14] ss:$24 sps:$4 sm:$0xff]   ;;  %v7467_v57 = vld [vmem:[#allocation8 + $0x4] ss:$16 sps:$4 sm:$0xff]   ;;  %v7470_v1 = vld [vmem:[#allocation8 + $0xc] ss:$16 sps:$4 sm:$0xff]  }
  0xba   :  { %7193 = vmatpush3.bf16.msra.mxu1 %v7418_v21  ;;  %v7456_v58 = vld [vmem:[%s9833_s1 + $0x130] sm:$0xff]   ;;  %v7473_v60 = vld [vmem:[#allocation8 + $0x24] ss:$16 sps:$4 sm:$0xff]   ;;  %v7462_v4 = vld [vmem:[%s9851_s12 + $0x44] ss:$24 sps:$4 sm:$0xff]  }
  0xbb   :  { %7194 = vmatprep.subr.bf16.mxu1 %v7421_v24  ;;  %v7471_v61 = vld [vmem:[#allocation8 + $0x20] ss:$16 sps:$4 sm:$0xff]   ;;  %v7479_v63 = vld [vmem:[#allocation8 + $0x44] ss:$16 sps:$4 sm:$0xff]   ;;  %v7468_v5 = vld [vmem:[#allocation8 + $0x8] ss:$16 sps:$4 sm:$0xff]  }
  0xbc   :  { %7167 = vmatpush3.bf16.msra.mxu0 %v7420_v23  ;;  %v7459_v0 = vld [vmem:[%s9851_s12 + $0x10] ss:$24 sps:$4 sm:$0xff]   ;;  %v7477_v2 = vld [vmem:[#allocation8 + $0x40] ss:$16 sps:$4 sm:$0xff]   ;;  %v7474_v7 = vld [vmem:[#allocation8 + $0x28] ss:$16 sps:$4 sm:$0xff]  }
  0xbd   :  { %7168 = vmatprep.subr.bf16.mxu0 %v7423_v26  ;;  %v7485_v3 = vld [vmem:[#allocation8 + $0x64] ss:$16 sps:$4 sm:$0xff]   ;;  %v7476_v6 = vld [vmem:[#allocation8 + $0x2c] ss:$16 sps:$4 sm:$0xff]   ;;  %v7483_v8 = vld [vmem:[#allocation8 + $0x60] ss:$16 sps:$4 sm:$0xff]  }
  0xbe   :  { %7195 = vmatpush3.bf16.msra.mxu1 %v7422_v25  ;;  %v7482_v9 = vld [vmem:[#allocation8 + $0x4c] ss:$16 sps:$4 sm:$0xff]   ;;  %v7491_v10 = vld [vmem:[#allocation8 + $0x84] ss:$16 sps:$4 sm:$0xff]   ;;  %v7489_v11 = vld [vmem:[#allocation8 + $0x80] ss:$16 sps:$4 sm:$0xff]  }
  0xbf   :  { %7196 = vmatprep.subr.bf16.mxu1 %v7425_v28  ;;  %v7464_v12 = vld [vmem:[%s9851_s12 + $0x40] ss:$24 sps:$4 sm:$0xff]   ;;  %v7480_v13 = vld [vmem:[#allocation8 + $0x48] ss:$16 sps:$4 sm:$0xff]   ;;  %v7495_v18 = vld [vmem:[#allocation8 + $0xa0] ss:$16 sps:$4 sm:$0xff]  }
  0xc0   :  { %7169 = vmatpush3.bf16.msra.mxu0 %v7424_v27  ;;  %v7488_v14 = vld [vmem:[#allocation8 + $0x6c] ss:$16 sps:$4 sm:$0xff]   ;;  %v7486_v15 = vld [vmem:[#allocation8 + $0x68] ss:$16 sps:$4 sm:$0xff]   ;;  %v7497_v19 = vld [vmem:[#allocation8 + $0xa4] ss:$16 sps:$4 sm:$0xff]  }
  0xc1   :  { %7170 = vmatprep.subr.bf16.mxu0 %v7427_v30  ;;  %v7494_v16 = vld [vmem:[#allocation8 + $0x8c] ss:$16 sps:$4 sm:$0xff]   ;;  %v7492_v17 = vld [vmem:[#allocation8 + $0x88] ss:$16 sps:$4 sm:$0xff]   ;;  %v7503_v22 = vld [vmem:[#allocation8 + $0xc4] ss:$16 sps:$4 sm:$0xff]  }
  0xc2   :  { %7197 = vmatpush3.bf16.msra.mxu1 %v7426_v29  ;;  %v7498_v20 = vld [vmem:[#allocation8 + $0xa8] ss:$16 sps:$4 sm:$0xff]   ;;  %v7500_v21 = vld [vmem:[#allocation8 + $0xac] ss:$16 sps:$4 sm:$0xff]   ;;  %v7501_v24 = vld [vmem:[#allocation8 + $0xc0] ss:$16 sps:$4 sm:$0xff]  }
  0xc3   :  { %7198 = vmatprep.subr.bf16.mxu1 %v7429_v32  ;;  %v7506_v23 = vld [vmem:[#allocation8 + $0xcc] ss:$16 sps:$4 sm:$0xff]   ;;  %v7504_v25 = vld [vmem:[#allocation8 + $0xc8] ss:$16 sps:$4 sm:$0xff]   ;;  %v7509_v26 = vld [vmem:[#allocation8 + $0xe4] ss:$16 sps:$4 sm:$0xff]  }
  0xc4   :  { %7171 = vmatpush3.bf16.msra.mxu0 %v7428_v31  ;;  %v7512_v27 = vld [vmem:[#allocation8 + $0xec] ss:$16 sps:$4 sm:$0xff]   ;;  %v7507_v28 = vld [vmem:[#allocation8 + $0xe0] ss:$16 sps:$4 sm:$0xff]   ;;  %v7510_v29 = vld [vmem:[#allocation8 + $0xe8] ss:$16 sps:$4 sm:$0xff]  }
  0xc5   :  { %7212 = vmatprep.subr.bf16.mxu0 %v7434_v36  ;;  %v7515_v30 = vld [vmem:[#allocation8 + $0x104] ss:$16 sps:$4 sm:$0xff]   ;;  %v7518_v31 = vld [vmem:[#allocation8 + $0x10c] ss:$16 sps:$4 sm:$0xff]   ;;  %v7513_v32 = vld [vmem:[#allocation8 + $0x100] ss:$16 sps:$4 sm:$0xff]  }
  0xc6   :  { %7199 = vmatpush3.bf16.msra.mxu1 %v7433_v35  ;;  %v7521_v34 = vld [vmem:[#allocation8 + $0x124] ss:$16 sps:$4 sm:$0xff]   ;;  %v7519_v35 = vld [vmem:[#allocation8 + $0x120] ss:$16 sps:$4 sm:$0xff]   ;;  %v7524_v36 = vld [vmem:[#allocation8 + $0x12c] ss:$16 sps:$4 sm:$0xff]  }
  0xc7   :  { %664 = vmatmul.mubr.bf16.vlgmr.msra.gmra.mrb[0].mxu0 %v7430_v33  ;;  %3904 = vmatprep.subr.bf16.mxu1 %v7467_v57  ;;  %v7516_v33 = vld [vmem:[#allocation8 + $0x108] ss:$16 sps:$4 sm:$0xff]   ;;  %v7527_v38 = vld [vmem:[#allocation8 + $0x144] ss:$16 sps:$4 sm:$0xff]  }
  0xc8   :  { %7213 = vmatpush3.bf16.msra.mxu0 %v7438_v39  ;;  %671 = vmatprep.mubr.bf16.mxu0 %v7447_v45  ;;  %v7530_v39 = vld [vmem:[#allocation8 + $0x14c] ss:$16 sps:$4 sm:$0xff]   ;;  %v7534_v45 = vld [vmem:[#allocation8 + $0x168] ss:$16 sps:$4 sm:$0xff]  }
  0xc9   :  { %713 = vmatmul.mubr.bf16.vlgmr.msra.gmra.mrb[0].mxu1 %v7435_v37  ;;  %7214 = vmatprep.subr.bf16.mxu0 %v7439_v40  ;;  %v7522_v37 = vld [vmem:[#allocation8 + $0x128] ss:$16 sps:$4 sm:$0xff]   ;;  %v7525_v40 = vld [vmem:[#allocation8 + $0x140] ss:$16 sps:$4 sm:$0xff]  }
  0xca   :  { %720 = vmatprep.mubr.bf16.mxu1 %v7452_v49  ;;  %3905 = vmatpush1.bf16.msra.mxu1 %v7465_v56  ;;  %v7540_v49 = vld [vmem:[#allocation8 + $0x188] ss:$16 sps:$4 sm:$0xff]   ;;  %v7549_v56 = vld [vmem:[#allocation8 + $0x1c0] ss:$16 sps:$4 sm:$0xff]  }
  0xcb   :  { %3906 = vmatprep.subr.bf16.mxu1 %v7473_v60  ;;  %v7552_v57 = vld [vmem:[#allocation8 + $0x1c8] ss:$16 sps:$4 sm:$0xff]   ;;  %v7555_v60 = vld [vmem:[#allocation8 + $0x1e0] ss:$16 sps:$4 sm:$0xff]  }
  0xcc   :  { %7215 = vmatpush3.bf16.msra.mxu0 %v7440_v41  ;;  %v7528_v41 = vld [vmem:[#allocation8 + $0x148] ss:$16 sps:$4 sm:$0xff]  }
  0xcd   :  { %7216 = vmatprep.subr.bf16.mxu0 %v7441_v42  ;;  %v7533_v42 = vld [vmem:[#allocation8 + $0x164] ss:$16 sps:$4 sm:$0xff]  }
  0xce   :  { %3907 = vmatpush1.bf16.msra.mxu1 %v7471_v61  ;;  %v7558_v61 = vld [vmem:[#allocation8 + $0x1e8] ss:$16 sps:$4 sm:$0xff]  }
  0xcf   :  { %672 = vmatmul.mubr.bf16.gmra.mrb[4].mxu0 %v7450_v47  ;;  %3908 = vmatprep.subr.bf16.mxu1 %v7479_v63  ;;  %v7542_v47 = vld [vmem:[#allocation8 + $0x18c] ss:$16 sps:$4 sm:$0xff]  }
  0xd0   :  { %7217 = vmatpush3.bf16.msra.mxu0 %v7442_v43  ;;  %761 = vmatprep.mubr.bf16.mxu0 %v7461_v54  ;;  %v7536_v43 = vld [vmem:[#allocation8 + $0x16c] ss:$16 sps:$4 sm:$0xff]   ;;  %v7551_v54 = vld [vmem:[#allocation8 + $0x1c4] ss:$16 sps:$4 sm:$0xff]  }
  0xd1   :  { %7218 = vmatprep.subr.bf16.mxu0 %v7443_v44  ;;  %721 = vmatmul.mubr.bf16.gmra.mrb[4].mxu1 %v7454_v50  ;;  %v7531_v44 = vld [vmem:[#allocation8 + $0x160] ss:$16 sps:$4 sm:$0xff]   ;;  %v7545_v50 = vld [vmem:[#allocation8 + $0x1a4] ss:$16 sps:$4 sm:$0xff]   ;;  %v7566_v63 = vld [vmem:[#allocation8 + $0x20c] ss:$16 sps:$4 sm:$0xff]  }
  0xd2   :  { %3909 = vmatpush1.bf16.msra.mxu1 %v7477_v2 }
  0xd3   :  { %3910 = vmatprep.subr.bf16.mxu1 %v7485_v3 }
  0xd4   :  { %7219 = vmatpush3.bf16.msra.mxu0 %v7444_v46  ;;  %v7539_v46 = vld [vmem:[#allocation8 + $0x184] ss:$16 sps:$4 sm:$0xff]  }
  0xd5   :  { %7220 = vmatprep.subr.bf16.mxu0 %v7445_v48  ;;  %v7537_v48 = vld [vmem:[#allocation8 + $0x180] ss:$16 sps:$4 sm:$0xff]  }
  0xd6   :  { %3911 = vmatpush1.bf16.msra.mxu1 %v7483_v8 }
  0xd7   :  { %3912 = vmatprep.subr.bf16.mxu1 %v7491_v10 }
  0xd8   :  { %7221 = vmatpush3.bf16.msra.mxu0 %v7446_v51  ;;  %v7548_v51 = vld [vmem:[#allocation8 + $0x1ac] ss:$16 sps:$4 sm:$0xff]  }
  0xd9   :  { %7222 = vmatprep.subr.bf16.mxu0 %v7449_v52  ;;  %v7543_v52 = vld [vmem:[#allocation8 + $0x1a0] ss:$16 sps:$4 sm:$0xff]  }
  0xda   :  { %3913 = vmatpush1.bf16.msra.mxu1 %v7489_v11 }
  0xdb   :  { %3914 = vmatprep.subr.bf16.mxu1 %v7497_v19 }
  0xdc   :  { %7223 = vmatpush3.bf16.msra.mxu0 %v7451_v53  ;;  %v7546_v53 = vld [vmem:[#allocation8 + $0x1a8] ss:$16 sps:$4 sm:$0xff]  }
  0xdd   :  { %7224 = vmatprep.subr.bf16.mxu0 %v7455_v55  ;;  %v7554_v55 = vld [vmem:[#allocation8 + $0x1cc] ss:$16 sps:$4 sm:$0xff]  }
  0xde   :  { %3915 = vmatpush1.bf16.msra.mxu1 %v7495_v18 }
  0xdf   :  { %3916 = vmatprep.subr.bf16.mxu1 %v7503_v22 }
  0xe0   :  { %7225 = vmatpush3.bf16.msra.mxu0 %v7456_v58  ;;  %v7557_v58 = vld [vmem:[#allocation8 + $0x1e4] ss:$16 sps:$4 sm:$0xff]  }
  0xe1   :  { %7226 = vmatprep.subr.bf16.mxu0 %v7457_v59  ;;  %v7560_v59 = vld [vmem:[#allocation8 + $0x1ec] ss:$16 sps:$4 sm:$0xff]  }
  0xe2   :  { %3917 = vmatpush1.bf16.msra.mxu1 %v7501_v24 }
  0xe3   :  { %3918 = vmatprep.subr.bf16.mxu1 %v7509_v26 }
  0xe4   :  { %7227 = vmatpush3.bf16.msra.mxu0 %v7458_v62  ;;  %v7563_v62 = vld [vmem:[#allocation8 + $0x204] ss:$16 sps:$4 sm:$0xff]  }
  0xe5   :  { %4232 = vmatprep.subr.bf16.mxu0 %v7470_v1  ;;  %v6395_v1 = vld [vmem:[#allocation6] ss:$0 sm:$0xff] }
  0xe6   :  { %3919 = vmatpush1.bf16.msra.mxu1 %v7507_v28 }
  0xe7   :  { %762 = vmatmul.mubr.bf16.vlgmr.msra.gmra.mrb[8].mxu0 %v7459_v0  ;;  %3920 = vmatprep.subr.bf16.mxu1 %v7515_v30 }
  0xe8   :  { %769 = vmatprep.mubr.bf16.mxu0 %v7462_v4  ;;  %4233 = vmatpush1.bf16.msra.mxu0 %v7468_v5 }
  0xe9   :  { %4234 = vmatprep.subr.bf16.mxu0 %v7476_v6 }
  0xea   :  { %3921 = vmatpush1.bf16.msra.mxu1 %v7513_v32 }
  0xeb   :  { %3922 = vmatprep.subr.bf16.mxu1 %v7521_v34 }
  0xec   :  { %4235 = vmatpush1.bf16.msra.mxu0 %v7474_v7 }
  0xed   :  { %4236 = vmatprep.subr.bf16.mxu0 %v7482_v9 }
  0xee   :  { %3923 = vmatpush1.bf16.msra.mxu1 %v7519_v35 }
  0xef   :  { %770 = vmatmul.mubr.bf16.gmra.mrb[12].mxu0 %v7464_v12  ;;  %3924 = vmatprep.subr.bf16.mxu1 %v7527_v38 }
  0xf0   :  { %4237 = vmatpush1.bf16.msra.mxu0 %v7480_v13 }
  0xf1   :  { %4238 = vmatprep.subr.bf16.mxu0 %v7488_v14 }
  0xf2   :  { %3925 = vmatpush1.bf16.msra.mxu1 %v7525_v40 }
  0xf3   :  { %3926 = vmatprep.subr.bf16.mxu1 %v7533_v42 }
  0xf4   :  { %4239 = vmatpush1.bf16.msra.mxu0 %v7486_v15 }
  0xf5   :  { %4240 = vmatprep.subr.bf16.mxu0 %v7494_v16 }
  0xf6   :  { %3927 = vmatpush1.bf16.msra.mxu1 %v7531_v44 }
  0xf7   :  { %3928 = vmatprep.subr.bf16.mxu1 %v7539_v46 }
  0xf8   :  { %4241 = vmatpush1.bf16.msra.mxu0 %v7492_v17 }
  0xf9   :  { %4242 = vmatprep.subr.bf16.mxu0 %v7500_v21 }
  0xfa   :  { %3929 = vmatpush1.bf16.msra.mxu1 %v7537_v48  ;;  %v7564_v48 = vld [vmem:[#allocation8 + $0x208] ss:$16 sps:$4 sm:$0xff]  }
  0xfb   :  { %3930 = vmatprep.subr.bf16.mxu1 %v7545_v50  ;;  %v7569_v50 = vld [vmem:[#allocation8 + $0x224] ss:$16 sps:$4 sm:$0xff]  }
  0xfc   :  { %4243 = vmatpush1.bf16.msra.mxu0 %v7498_v20 }
  0xfd   :  { %4244 = vmatprep.subr.bf16.mxu0 %v7506_v23 }
  0xfe   :  { %3931 = vmatpush1.bf16.msra.mxu1 %v7543_v52 }
  0xff   :  { %3932 = vmatprep.subr.bf16.mxu1 %v7551_v54  ;;  %v7567_v54 = vld [vmem:[#allocation8 + $0x220] ss:$16 sps:$4 sm:$0xff]  }
 0x100   :  { %4245 = vmatpush1.bf16.msra.mxu0 %v7504_v25 }
 0x101   :  { %4246 = vmatprep.subr.bf16.mxu0 %v7512_v27 }
 0x102   :  { %3933 = vmatpush1.bf16.msra.mxu1 %v7549_v56 }
 0x103   :  { %3934 = vmatprep.subr.bf16.mxu1 %v7557_v58  ;;  %v7578_v58 = vld [vmem:[#allocation8 + $0x24c] ss:$16 sps:$4 sm:$0xff]  }
 0x104   :  { %4247 = vmatpush1.bf16.msra.mxu0 %v7510_v29 }
 0x105   :  { %4248 = vmatprep.subr.bf16.mxu0 %v7518_v31 }
 0x106   :  { %3935 = vmatpush1.bf16.msra.mxu1 %v7555_v60 }
 0x107   :  { %3945 = vmatprep.subr.bf16.mxu1 %v7563_v62  ;;  %v7576_v62 = vld [vmem:[#allocation8 + $0x248] ss:$16 sps:$4 sm:$0xff]  }
 0x108   :  { %4249 = vmatpush1.bf16.msra.mxu0 %v7516_v33 }
 0x109   :  { %4250 = vmatprep.subr.bf16.mxu0 %v7524_v36 }
 0x10c   :  { %4251 = vmatpush1.bf16.msra.mxu0 %v7522_v37 }
 0x10d   :  { %4252 = vmatprep.subr.bf16.mxu0 %v7530_v39 }
 0x110   :  { %4253 = vmatpush1.bf16.msra.mxu0 %v7528_v41 }
 0x111   :  { %4254 = vmatprep.subr.bf16.mxu0 %v7536_v43  ;;  %v7561_v43 = vld [vmem:[#allocation8 + $0x200] ss:$16 sps:$4 sm:$0xff]  }
 0x114   :  { %4255 = vmatpush1.bf16.msra.mxu0 %v7534_v45 }
 0x115   :  { %4256 = vmatprep.subr.bf16.mxu0 %v7542_v47 }
 0x118   :  { %4257 = vmatpush1.bf16.msra.mxu0 %v7540_v49 }
 0x119   :  { %4258 = vmatprep.subr.bf16.mxu0 %v7548_v51  ;;  %v7572_v51 = vld [vmem:[#allocation8 + $0x22c] ss:$16 sps:$4 sm:$0xff]  }
 0x11c   :  { %4259 = vmatpush1.bf16.msra.mxu0 %v7546_v53 }
 0x11d   :  { %4260 = vmatprep.subr.bf16.mxu0 %v7554_v55  ;;  %v7570_v55 = vld [vmem:[#allocation8 + $0x228] ss:$16 sps:$4 sm:$0xff]  }
 0x120   :  { %4261 = vmatpush1.bf16.msra.mxu0 %v7552_v57  ;;  %v7575_v57 = vld [vmem:[#allocation8 + $0x244] ss:$16 sps:$4 sm:$0xff]  }
 0x121   :  { %4262 = vmatprep.subr.bf16.mxu0 %v7560_v59 }
 0x124   :  { %4263 = vmatpush1.bf16.msra.mxu0 %v7558_v61  ;;  %v7573_v61 = vld [vmem:[#allocation8 + $0x240] ss:$16 sps:$4 sm:$0xff]  }
 0x125   :  { %4273 = vmatprep.subr.bf16.mxu0 %v7566_v63  ;;  %v7581_v63 = vld [vmem:[#allocation8 + $0x264] ss:$16 sps:$4 sm:$0xff]  }
 0x19a   :  { %v7172_v0 = vpop.f32.mrb[0].mxu0 }
 0x19b   :  { %v7173_v2 = vpop.f32.mrb[1].mxu0 }
 0x19c   :  { %v7174_v3 = vadd.f32 %v7173_v2, %v7172_v0  ;;  %v7175_v4 = vpop.f32.mrb[2].mxu0  ;;  %v7200_v5 = vpop.f32.mrb[0].mxu1  ;;  %v7584_v0 = vld [vmem:[#allocation8 + $0x26c] ss:$16 sps:$4 sm:$0xff]   ;;  %v7582_v2 = vld [vmem:[#allocation8 + $0x268] ss:$16 sps:$4 sm:$0xff]  }
 0x19d   :  { %v7176_v6 = vpop.f32.mrb[3].mxu0  ;;  %v7201_v9 = vpop.f32.mrb[1].mxu1 }
 0x19e   :  { %v666_v7 = vadd.f32 %v7174_v3, %v6395_v1  ;;  %v7177_v8 = vadd.f32 %v7176_v6, %v7175_v4  ;;  %v7202_v10 = vadd.f32 %v7201_v9, %v7200_v5  ;;  %v7203_v11 = vpop.f32.mrb[2].mxu1  ;;  %v7587_v3 = vld [vmem:[#allocation8 + $0x284] ss:$16 sps:$4 sm:$0xff]   ;;  %v7590_v4 = vld [vmem:[#allocation8 + $0x28c] ss:$16 sps:$4 sm:$0xff]  }
 0x19f   :  { %v7204_v13 = vpop.f32.mrb[3].mxu1  ;;  %v7585_v5 = vld [vmem:[#allocation8 + $0x280] ss:$16 sps:$4 sm:$0xff]   ;;  %v7588_v6 = vld [vmem:[#allocation8 + $0x288] ss:$16 sps:$4 sm:$0xff]  }
 0x1a0   :  { %v669_v12 = vadd.f32 %v7177_v8, %v6395_v1  ;;  %v715_v14 = vadd.f32 %v7202_v10, %v666_v7  ;;  %v7205_v15 = vadd.f32 %v7204_v13, %v7203_v11  ;;  %v7593_v7 = vld [vmem:[#allocation8 + $0x2a4] ss:$16 sps:$4 sm:$0xff]   ;;  %v7596_v8 = vld [vmem:[#allocation8 + $0x2ac] ss:$16 sps:$4 sm:$0xff]   ;;  %v7591_v9 = vld [vmem:[#allocation8 + $0x2a0] ss:$16 sps:$4 sm:$0xff]  }
 0x1a1   :  { %v7594_v10 = vld [vmem:[#allocation8 + $0x2a8] ss:$16 sps:$4 sm:$0xff]   ;;  %v7599_v11 = vld [vmem:[#allocation8 + $0x2c4] ss:$16 sps:$4 sm:$0xff]   ;;  %v7597_v13 = vld [vmem:[#allocation8 + $0x2c0] ss:$16 sps:$4 sm:$0xff]  }
 0x1a2   :  { %v718_v16 = vadd.f32 %v7205_v15, %v669_v12  ;;  %v7178_v17 = vpop.f32.mrb[4].mxu0  ;;  %v7602_v12 = vld [vmem:[#allocation8 + $0x2cc] ss:$16 sps:$4 sm:$0xff]   ;;  %v7605_v15 = vld [vmem:[#allocation8 + $0x2e4] ss:$16 sps:$4 sm:$0xff]  }
 0x1a3   :  { %v7179_v18 = vpop.f32.mrb[5].mxu0 }
 0x1a4   :  { %v7180_v19 = vadd.f32 %v7179_v18, %v7178_v17  ;;  %v7181_v20 = vpop.f32.mrb[6].mxu0  ;;  %v7206_v21 = vpop.f32.mrb[4].mxu1  ;;  %v7603_v17 = vld [vmem:[#allocation8 + $0x2e0] ss:$16 sps:$4 sm:$0xff]   ;;  %v7606_v18 = vld [vmem:[#allocation8 + $0x2e8] ss:$16 sps:$4 sm:$0xff]  }
 0x1a5   :  { %v7182_v22 = vpop.f32.mrb[7].mxu0  ;;  %v7207_v25 = vpop.f32.mrb[5].mxu1 }
 0x1a6   :  { %v674_v23 = vadd.f32 %v7180_v19, %v6395_v1  ;;  %v7183_v24 = vadd.f32 %v7182_v22, %v7181_v20  ;;  %v7208_v26 = vadd.f32 %v7207_v25, %v7206_v21  ;;  %v7209_v27 = vpop.f32.mrb[6].mxu1  ;;  %v7611_v19 = vld [vmem:[#allocation8 + $0x304] ss:$16 sps:$4 sm:$0xff]   ;;  %v7614_v20 = vld [vmem:[#allocation8 + $0x30c] ss:$16 sps:$4 sm:$0xff]  }
 0x1a7   :  { %v7210_v29 = vpop.f32.mrb[7].mxu1  ;;  %v7609_v21 = vld [vmem:[#allocation8 + $0x300] ss:$16 sps:$4 sm:$0xff]   ;;  %v7612_v22 = vld [vmem:[#allocation8 + $0x308] ss:$16 sps:$4 sm:$0xff]  }
 0x1a8   :  { %v677_v28 = vadd.f32 %v7183_v24, %v6395_v1  ;;  %v723_v30 = vadd.f32 %v7208_v26, %v674_v23  ;;  %v7211_v31 = vadd.f32 %v7210_v29, %v7209_v27  ;;  %v7579_v1 = vld [vmem:[#allocation8 + $0x260] ss:$16 sps:$4 sm:$0xff]   ;;  %v7617_v23 = vld [vmem:[#allocation8 + $0x324] ss:$16 sps:$4 sm:$0xff]   ;;  %v7620_v24 = vld [vmem:[#allocation8 + $0x32c] ss:$16 sps:$4 sm:$0xff]  }
 0x1a9   :  { %v7615_v25 = vld [vmem:[#allocation8 + $0x320] ss:$16 sps:$4 sm:$0xff]   ;;  %v7618_v26 = vld [vmem:[#allocation8 + $0x328] ss:$16 sps:$4 sm:$0xff]   ;;  %v7623_v27 = vld [vmem:[#allocation8 + $0x344] ss:$16 sps:$4 sm:$0xff]  }
 0x1aa   :  { %v726_v32 = vadd.f32 %v7211_v31, %v677_v28  ;;  %v7626_v28 = vld [vmem:[#allocation8 + $0x34c] ss:$16 sps:$4 sm:$0xff]   ;;  %v7621_v29 = vld [vmem:[#allocation8 + $0x340] ss:$16 sps:$4 sm:$0xff]   ;;  %v7629_v31 = vld [vmem:[#allocation8 + $0x364] ss:$16 sps:$4 sm:$0xff]  }
 0x1ba   :  { %v7228_v33 = vpop.f32.mrb[8].mxu0 }
 0x1bb   :  { %v7229_v34 = vpop.f32.mrb[9].mxu0 }
 0x1bc   :  { %v7230_v35 = vadd.f32 %v7229_v34, %v7228_v33  ;;  %v7231_v36 = vpop.f32.mrb[10].mxu0  ;;  %v7627_v33 = vld [vmem:[#allocation8 + $0x360] ss:$16 sps:$4 sm:$0xff]   ;;  %v7630_v34 = vld [vmem:[#allocation8 + $0x368] ss:$16 sps:$4 sm:$0xff]  }
 0x1bd   :  { %v7232_v37 = vpop.f32.mrb[11].mxu0 }
 0x1be   :  { %v764_v38 = vadd.f32 %v7230_v35, %v715_v14  ;;  %v7233_v39 = vadd.f32 %v7232_v37, %v7231_v36  ;;  %v7600_v14 = vld [vmem:[#allocation8 + $0x2c8] ss:$16 sps:$4 sm:$0xff]   ;;  %v7635_v35 = vld [vmem:[#allocation8 + $0x384] ss:$16 sps:$4 sm:$0xff]   ;;  %v7638_v36 = vld [vmem:[#allocation8 + $0x38c] ss:$16 sps:$4 sm:$0xff]  }
 0x1bf   :  { %v7633_v37 = vld [vmem:[#allocation8 + $0x380] ss:$16 sps:$4 sm:$0xff]  }
 0x1c0   :  { %v767_v40 = vadd.f32 %v7233_v39, %v718_v16  ;;  %v7608_v16 = vld [vmem:[#allocation8 + $0x2ec] ss:$16 sps:$4 sm:$0xff]   ;;  %v7641_v39 = vld [vmem:[#allocation8 + $0x3a4] ss:$16 sps:$4 sm:$0xff]  }
 0x1c2   :  { %v9173_v41 = vpack.c.bf16 %v767_v40, %v764_v38  ;;  %v7234_v42 = vpop.f32.mrb[12].mxu0  ;;  %v7636_v38 = vld [vmem:[#allocation8 + $0x388] ss:$16 sps:$4 sm:$0xff]   ;;  %v7644_v40 = vld [vmem:[#allocation8 + $0x3ac] ss:$16 sps:$4 sm:$0xff]  }
 0x1c3   :  { %v7235_v44 = vpop.f32.mrb[13].mxu0 }
 0x1c4   :  { %v7236_v45 = vadd.f32 %v7235_v44, %v7234_v42  ;;  %v7237_v46 = vpop.f32.mrb[14].mxu0  ;;  %v781_v47 = vrot.slane %v9173_v41, 1  ;;  %v785_v56 = vrot.slane %v9173_v41, 3  ;;  %v7639_v42 = vld [vmem:[#allocation8 + $0x3a0] ss:$16 sps:$4 sm:$0xff]  }
 0x1c5   :  { %v7238_v49 = vpop.f32.mrb[15].mxu0  ;;  %v7647_v44 = vld [vmem:[#allocation8 + $0x3c4] ss:$16 sps:$4 sm:$0xff]  }
 0x1c6   :  { %v772_v52 = vadd.f32 %v7236_v45, %v723_v30  ;;  %v7239_v53 = vadd.f32 %v7238_v49, %v7237_v46  ;;  %3936 = vmatprep.mubr.bf16.mxu1 %v781_v47  ;;  %4264 = vmatprep.mubr.bf16.mxu0 %v781_v47  ;;  %v7624_v30 = vld [vmem:[#allocation8 + $0x348] ss:$16 sps:$4 sm:$0xff]   ;;  %v7650_v45 = vld [vmem:[#allocation8 + $0x3cc] ss:$16 sps:$4 sm:$0xff]   ;;  %v7645_v46 = vld [vmem:[#allocation8 + $0x3c0] ss:$16 sps:$4 sm:$0xff]  }
 0x1c7   :  { %3937 = vmatmul.mubr.bf16.vlgmr.msra.gmra.mrb[8].mxu1 %v9173_v41  ;;  %4265 = vmatmul.mubr.bf16.vlgmr.msra.gmra.mrb[16].mxu0 %v9173_v41  ;;  %v7648_v47 = vld [vmem:[#allocation8 + $0x3c8] ss:$16 sps:$4 sm:$0xff]   ;;  %v7656_v49 = vld [vmem:[#allocation8 + $0x3ec] ss:$16 sps:$4 sm:$0xff]  }
 0x1c8   :  { %v775_v59 = vadd.f32 %v7239_v53, %v726_v32  ;;  %3946 = vmatpush1.bf16.msra.mxu1 %v7561_v43  ;;  %4274 = vmatpush1.bf16.msra.mxu0 %v7564_v48  ;;  %v7632_v32 = vld [vmem:[#allocation8 + $0x36c] ss:$16 sps:$4 sm:$0xff]   ;;  %v7642_v43 = vld [vmem:[#allocation8 + $0x3a8] ss:$16 sps:$4 sm:$0xff]   ;;  %v7653_v48 = vld [vmem:[#allocation8 + $0x3e4] ss:$16 sps:$4 sm:$0xff]  }
 0x1c9   :  { %3977 = vmatprep.mubr.bf16.mxu1 %v785_v56  ;;  %4305 = vmatprep.mubr.bf16.mxu0 %v785_v56  ;;  %v7662_v53 = vld [vmem:[#allocation8 + $0x40c] ss:$16 sps:$4 sm:$0xff]   ;;  %v7665_v56 = vld [vmem:[#allocation8 + $0x424] ss:$16 sps:$4 sm:$0xff]  }
 0x1ca   :  { %v9179_v60 = vpack.c.bf16 %v775_v59, %v772_v52  ;;  %3947 = vmatprep.subr.bf16.mxu1 %v7569_v50  ;;  %4275 = vmatprep.subr.bf16.mxu0 %v7572_v51  ;;  %v7651_v50 = vld [vmem:[#allocation8 + $0x3e0] ss:$16 sps:$4 sm:$0xff]   ;;  %v7654_v51 = vld [vmem:[#allocation8 + $0x3e8] ss:$16 sps:$4 sm:$0xff]   ;;  %v7659_v52 = vld [vmem:[#allocation8 + $0x404] ss:$16 sps:$4 sm:$0xff]  }
 0x1cb   :  { %v789_v59 = vrot.slane %v9173_v41, 5 }
 0x1cc   :  { %3948 = vmatpush1.bf16.msra.mxu1 %v7567_v54  ;;  %4276 = vmatpush1.bf16.msra.mxu0 %v7570_v55  ;;  %v7657_v54 = vld [vmem:[#allocation8 + $0x400] ss:$16 sps:$4 sm:$0xff]   ;;  %v7660_v55 = vld [vmem:[#allocation8 + $0x408] ss:$16 sps:$4 sm:$0xff]  }
 0x1cd   :  { %3949 = vmatprep.subr.bf16.mxu1 %v7575_v57  ;;  %4277 = vmatprep.subr.bf16.mxu0 %v7578_v58  ;;  %v7668_v57 = vld [vmem:[#allocation8 + $0x42c] ss:$16 sps:$4 sm:$0xff]   ;;  %v783_v58 = vrot.slane %v9173_v41, 2 }
 0x1d0   :  { %3950 = vmatpush1.bf16.msra.mxu1 %v7573_v61  ;;  %4278 = vmatpush1.bf16.msra.mxu0 %v7576_v62  ;;  %v7663_v61 = vld [vmem:[#allocation8 + $0x420] ss:$16 sps:$4 sm:$0xff]   ;;  %v7666_v62 = vld [vmem:[#allocation8 + $0x428] ss:$16 sps:$4 sm:$0xff]  }
 0x1d1   :  { %3951 = vmatprep.subr.bf16.mxu1 %v7581_v63  ;;  %4279 = vmatprep.subr.bf16.mxu0 %v7584_v0  ;;  %v7671_v63 = vld [vmem:[#allocation8 + $0x444] ss:$16 sps:$4 sm:$0xff]   ;;  %v7674_v0 = vld [vmem:[#allocation8 + $0x44c] ss:$16 sps:$4 sm:$0xff]  }
 0x1d4   :  { %3952 = vmatpush1.bf16.msra.mxu1 %v7579_v1  ;;  %4280 = vmatpush1.bf16.msra.mxu0 %v7582_v2  ;;  %v7669_v1 = vld [vmem:[#allocation8 + $0x440] ss:$16 sps:$4 sm:$0xff]   ;;  %v7672_v2 = vld [vmem:[#allocation8 + $0x448] ss:$16 sps:$4 sm:$0xff]  }
 0x1d5   :  { %3953 = vmatprep.subr.bf16.mxu1 %v7587_v3  ;;  %4281 = vmatprep.subr.bf16.mxu0 %v7590_v4  ;;  %v7677_v3 = vld [vmem:[#allocation8 + $0x464] ss:$16 sps:$4 sm:$0xff]   ;;  %v7675_v4 = vld [vmem:[#allocation8 + $0x460] ss:$16 sps:$4 sm:$0xff]  }
 0x1d8   :  { %3954 = vmatpush1.bf16.msra.mxu1 %v7585_v5  ;;  %4282 = vmatpush1.bf16.msra.mxu0 %v7588_v6  ;;  %v7680_v5 = vld [vmem:[#allocation8 + $0x46c] ss:$16 sps:$4 sm:$0xff]   ;;  %v7678_v6 = vld [vmem:[#allocation8 + $0x468] ss:$16 sps:$4 sm:$0xff]  }
 0x1d9   :  { %3955 = vmatprep.subr.bf16.mxu1 %v7593_v7  ;;  %4283 = vmatprep.subr.bf16.mxu0 %v7596_v8  ;;  %v7683_v7 = vld [vmem:[#allocation8 + $0x484] ss:$16 sps:$4 sm:$0xff]   ;;  %v7681_v8 = vld [vmem:[#allocation8 + $0x480] ss:$16 sps:$4 sm:$0xff]  }
 0x1dc   :  { %3956 = vmatpush1.bf16.msra.mxu1 %v7591_v9  ;;  %4284 = vmatpush1.bf16.msra.mxu0 %v7594_v10  ;;  %v7686_v9 = vld [vmem:[#allocation8 + $0x48c] ss:$16 sps:$4 sm:$0xff]   ;;  %v7684_v10 = vld [vmem:[#allocation8 + $0x488] ss:$16 sps:$4 sm:$0xff]  }
 0x1dd   :  { %3957 = vmatprep.subr.bf16.mxu1 %v7599_v11  ;;  %4285 = vmatprep.subr.bf16.mxu0 %v7602_v12  ;;  %v7689_v11 = vld [vmem:[#allocation8 + $0x4a4] ss:$16 sps:$4 sm:$0xff]   ;;  %v7687_v12 = vld [vmem:[#allocation8 + $0x4a0] ss:$16 sps:$4 sm:$0xff]  }
 0x1e0   :  { %3958 = vmatpush1.bf16.msra.mxu1 %v7597_v13  ;;  %4286 = vmatpush1.bf16.msra.mxu0 %v7600_v14  ;;  %v7692_v13 = vld [vmem:[#allocation8 + $0x4ac] ss:$16 sps:$4 sm:$0xff]   ;;  %v7690_v14 = vld [vmem:[#allocation8 + $0x4a8] ss:$16 sps:$4 sm:$0xff]  }
 0x1e1   :  { %3959 = vmatprep.subr.bf16.mxu1 %v7605_v15  ;;  %4287 = vmatprep.subr.bf16.mxu0 %v7608_v16  ;;  %v7695_v15 = vld [vmem:[#allocation8 + $0x4c4] ss:$16 sps:$4 sm:$0xff]   ;;  %v7693_v16 = vld [vmem:[#allocation8 + $0x4c0] ss:$16 sps:$4 sm:$0xff]  }
 0x1e4   :  { %3960 = vmatpush1.bf16.msra.mxu1 %v7603_v17  ;;  %4288 = vmatpush1.bf16.msra.mxu0 %v7606_v18  ;;  %v7698_v17 = vld [vmem:[#allocation8 + $0x4cc] ss:$16 sps:$4 sm:$0xff]   ;;  %v7696_v18 = vld [vmem:[#allocation8 + $0x4c8] ss:$16 sps:$4 sm:$0xff]  }
 0x1e5   :  { %3961 = vmatprep.subr.bf16.mxu1 %v7611_v19  ;;  %4289 = vmatprep.subr.bf16.mxu0 %v7614_v20  ;;  %v7701_v19 = vld [vmem:[#allocation8 + $0x4e4] ss:$16 sps:$4 sm:$0xff]   ;;  %v7699_v20 = vld [vmem:[#allocation8 + $0x4e0] ss:$16 sps:$4 sm:$0xff]  }
 0x1e8   :  { %3962 = vmatpush1.bf16.msra.mxu1 %v7609_v21  ;;  %4290 = vmatpush1.bf16.msra.mxu0 %v7612_v22  ;;  %v7704_v21 = vld [vmem:[#allocation8 + $0x4ec] ss:$16 sps:$4 sm:$0xff]   ;;  %v7702_v22 = vld [vmem:[#allocation8 + $0x4e8] ss:$16 sps:$4 sm:$0xff]  }
 0x1e9   :  { %3963 = vmatprep.subr.bf16.mxu1 %v7617_v23  ;;  %4291 = vmatprep.subr.bf16.mxu0 %v7620_v24  ;;  %v7707_v23 = vld [vmem:[#allocation8 + $0x504] ss:$16 sps:$4 sm:$0xff]   ;;  %v7710_v24 = vld [vmem:[#allocation8 + $0x50c] ss:$16 sps:$4 sm:$0xff]  }
 0x1ec   :  { %3964 = vmatpush1.bf16.msra.mxu1 %v7615_v25  ;;  %4292 = vmatpush1.bf16.msra.mxu0 %v7618_v26  ;;  %v7705_v25 = vld [vmem:[#allocation8 + $0x500] ss:$16 sps:$4 sm:$0xff]   ;;  %v7708_v26 = vld [vmem:[#allocation8 + $0x508] ss:$16 sps:$4 sm:$0xff]  }
 0x1ed   :  { %3965 = vmatprep.subr.bf16.mxu1 %v7623_v27  ;;  %4293 = vmatprep.subr.bf16.mxu0 %v7626_v28  ;;  %v7713_v27 = vld [vmem:[#allocation8 + $0x524] ss:$16 sps:$4 sm:$0xff]   ;;  %v7716_v28 = vld [vmem:[#allocation8 + $0x52c] ss:$16 sps:$4 sm:$0xff]  }
 0x1f0   :  { %3966 = vmatpush1.bf16.msra.mxu1 %v7621_v29  ;;  %4294 = vmatpush1.bf16.msra.mxu0 %v7624_v30  ;;  %v7711_v29 = vld [vmem:[#allocation8 + $0x520] ss:$16 sps:$4 sm:$0xff]   ;;  %v7714_v30 = vld [vmem:[#allocation8 + $0x528] ss:$16 sps:$4 sm:$0xff]  }
 0x1f1   :  { %3967 = vmatprep.subr.bf16.mxu1 %v7629_v31  ;;  %4295 = vmatprep.subr.bf16.mxu0 %v7632_v32  ;;  %v7719_v31 = vld [vmem:[#allocation8 + $0x544] ss:$16 sps:$4 sm:$0xff]   ;;  %v7722_v32 = vld [vmem:[#allocation8 + $0x54c] ss:$16 sps:$4 sm:$0xff]  }
 0x1f4   :  { %3968 = vmatpush1.bf16.msra.mxu1 %v7627_v33  ;;  %4296 = vmatpush1.bf16.msra.mxu0 %v7630_v34  ;;  %v7717_v33 = vld [vmem:[#allocation8 + $0x540] ss:$16 sps:$4 sm:$0xff]   ;;  %v7720_v34 = vld [vmem:[#allocation8 + $0x548] ss:$16 sps:$4 sm:$0xff]  }
 0x1f5   :  { %3969 = vmatprep.subr.bf16.mxu1 %v7635_v35  ;;  %4297 = vmatprep.subr.bf16.mxu0 %v7638_v36  ;;  %v7725_v35 = vld [vmem:[#allocation8 + $0x564] ss:$16 sps:$4 sm:$0xff]   ;;  %v7728_v36 = vld [vmem:[#allocation8 + $0x56c] ss:$16 sps:$4 sm:$0xff]  }
 0x1f8   :  { %3970 = vmatpush1.bf16.msra.mxu1 %v7633_v37  ;;  %4298 = vmatpush1.bf16.msra.mxu0 %v7636_v38  ;;  %v7723_v37 = vld [vmem:[#allocation8 + $0x560] ss:$16 sps:$4 sm:$0xff]   ;;  %v7726_v38 = vld [vmem:[#allocation8 + $0x568] ss:$16 sps:$4 sm:$0xff]  }
 0x1f9   :  { %3971 = vmatprep.subr.bf16.mxu1 %v7641_v39  ;;  %4299 = vmatprep.subr.bf16.mxu0 %v7644_v40  ;;  %v7731_v39 = vld [vmem:[#allocation8 + $0x584] ss:$16 sps:$4 sm:$0xff]   ;;  %v7734_v40 = vld [vmem:[#allocation8 + $0x58c] ss:$16 sps:$4 sm:$0xff]  }
 0x1fc   :  { %3972 = vmatpush1.bf16.msra.mxu1 %v7639_v42  ;;  %4300 = vmatpush1.bf16.msra.mxu0 %v7642_v43  ;;  %v7729_v42 = vld [vmem:[#allocation8 + $0x580] ss:$16 sps:$4 sm:$0xff]   ;;  %v7732_v43 = vld [vmem:[#allocation8 + $0x588] ss:$16 sps:$4 sm:$0xff]  }
 0x1fd   :  { %3973 = vmatprep.subr.bf16.mxu1 %v7647_v44  ;;  %4301 = vmatprep.subr.bf16.mxu0 %v7650_v45  ;;  %v7737_v44 = vld [vmem:[#allocation8 + $0x5a4] ss:$16 sps:$4 sm:$0xff]   ;;  %v7740_v45 = vld [vmem:[#allocation8 + $0x5ac] ss:$16 sps:$4 sm:$0xff]  }
 0x200   :  { %3974 = vmatpush1.bf16.msra.mxu1 %v7645_v46  ;;  %4302 = vmatpush1.bf16.msra.mxu0 %v7648_v47  ;;  %v7735_v46 = vld [vmem:[#allocation8 + $0x5a0] ss:$16 sps:$4 sm:$0xff]   ;;  %v7738_v47 = vld [vmem:[#allocation8 + $0x5a8] ss:$16 sps:$4 sm:$0xff]  }
 0x201   :  { %3975 = vmatprep.subr.bf16.mxu1 %v7653_v48  ;;  %4303 = vmatprep.subr.bf16.mxu0 %v7656_v49  ;;  %v7743_v48 = vld [vmem:[#allocation8 + $0x5c4] ss:$16 sps:$4 sm:$0xff]   ;;  %v7746_v49 = vld [vmem:[#allocation8 + $0x5cc] ss:$16 sps:$4 sm:$0xff]  }
 0x204   :  { %3976 = vmatpush1.bf16.msra.mxu1 %v7651_v50  ;;  %4304 = vmatpush1.bf16.msra.mxu0 %v7654_v51  ;;  %v7741_v50 = vld [vmem:[#allocation8 + $0x5c0] ss:$16 sps:$4 sm:$0xff]   ;;  %v7744_v51 = vld [vmem:[#allocation8 + $0x5c8] ss:$16 sps:$4 sm:$0xff]  }
 0x205   :  { %3986 = vmatprep.subr.bf16.mxu1 %v7659_v52  ;;  %4314 = vmatprep.subr.bf16.mxu0 %v7662_v53  ;;  %v7749_v52 = vld [vmem:[#allocation8 + $0x5e4] ss:$16 sps:$4 sm:$0xff]   ;;  %v7752_v53 = vld [vmem:[#allocation8 + $0x5ec] ss:$16 sps:$4 sm:$0xff]  }
 0x207   :  { %3978 = vmatmul.mubr.bf16.vlgmr.msra.gmra.mrb[8].mxu1 %v783_v58  ;;  %4306 = vmatmul.mubr.bf16.vlgmr.msra.gmra.mrb[16].mxu0 %v783_v58  ;;  %v7753_v58 = vld [vmem:[#allocation8 + $0x600] ss:$16 sps:$4 sm:$0xff]  }
 0x208   :  { %3987 = vmatpush1.bf16.msra.mxu1 %v7657_v54  ;;  %4018 = vmatprep.mubr.bf16.mxu1 %v789_v59  ;;  %v7747_v54 = vld [vmem:[#allocation8 + $0x5e0] ss:$16 sps:$4 sm:$0xff]  }
 0x209   :  { %4315 = vmatpush1.bf16.msra.mxu0 %v7660_v55  ;;  %4346 = vmatprep.mubr.bf16.mxu0 %v789_v59  ;;  %v7750_v55 = vld [vmem:[#allocation8 + $0x5e8] ss:$16 sps:$4 sm:$0xff]   ;;  %v787_v59 = vrot.slane %v9173_v41, 4 }
 0x20a   :  { %3988 = vmatprep.subr.bf16.mxu1 %v7665_v56  ;;  %4316 = vmatprep.subr.bf16.mxu0 %v7668_v57  ;;  %v7755_v56 = vld [vmem:[#allocation8 + $0x604] ss:$16 sps:$4 sm:$0xff]   ;;  %v7758_v57 = vld [vmem:[#allocation8 + $0x60c] ss:$16 sps:$4 sm:$0xff]  }
 0x20c   :  { %3989 = vmatpush1.bf16.msra.mxu1 %v7663_v61  ;;  %v7756_v61 = vld [vmem:[#allocation8 + $0x608] ss:$16 sps:$4 sm:$0xff]  }
 0x20d   :  { %4317 = vmatpush1.bf16.msra.mxu0 %v7666_v62  ;;  %3990 = vmatprep.subr.bf16.mxu1 %v7671_v63  ;;  %v7761_v62 = vld [vmem:[#allocation8 + $0x624] ss:$16 sps:$4 sm:$0xff]   ;;  %v793_v63 = vrot.slane %v9173_v41, 7 }
 0x20e   :  { %4318 = vmatprep.subr.bf16.mxu0 %v7674_v0  ;;  %v7764_v0 = vld [vmem:[#allocation8 + $0x62c] ss:$16 sps:$4 sm:$0xff]  }
 0x210   :  { %3991 = vmatpush1.bf16.msra.mxu1 %v7669_v1  ;;  %v7759_v1 = vld [vmem:[#allocation8 + $0x620] ss:$16 sps:$4 sm:$0xff]  }
 0x211   :  { %4319 = vmatpush1.bf16.msra.mxu0 %v7672_v2  ;;  %3992 = vmatprep.subr.bf16.mxu1 %v7677_v3  ;;  %v7762_v2 = vld [vmem:[#allocation8 + $0x628] ss:$16 sps:$4 sm:$0xff]   ;;  %v7767_v3 = vld [vmem:[#allocation8 + $0x644] ss:$16 sps:$4 sm:$0xff]  }
 0x212   :  { %4320 = vmatprep.subr.bf16.mxu0 %v7680_v5  ;;  %v7765_v5 = vld [vmem:[#allocation8 + $0x640] ss:$16 sps:$4 sm:$0xff]  }
 0x214   :  { %3993 = vmatpush1.bf16.msra.mxu1 %v7675_v4  ;;  %v7770_v4 = vld [vmem:[#allocation8 + $0x64c] ss:$16 sps:$4 sm:$0xff]  }
 0x215   :  { %4321 = vmatpush1.bf16.msra.mxu0 %v7678_v6  ;;  %3994 = vmatprep.subr.bf16.mxu1 %v7683_v7  ;;  %v7768_v6 = vld [vmem:[#allocation8 + $0x648] ss:$16 sps:$4 sm:$0xff]   ;;  %v7773_v7 = vld [vmem:[#allocation8 + $0x664] ss:$16 sps:$4 sm:$0xff]  }
 0x216   :  { %4322 = vmatprep.subr.bf16.mxu0 %v7686_v9  ;;  %v7771_v9 = vld [vmem:[#allocation8 + $0x660] ss:$16 sps:$4 sm:$0xff]  }
 0x218   :  { %3995 = vmatpush1.bf16.msra.mxu1 %v7681_v8  ;;  %v7776_v8 = vld [vmem:[#allocation8 + $0x66c] ss:$16 sps:$4 sm:$0xff]  }
 0x219   :  { %4323 = vmatpush1.bf16.msra.mxu0 %v7684_v10  ;;  %3996 = vmatprep.subr.bf16.mxu1 %v7689_v11  ;;  %v7774_v10 = vld [vmem:[#allocation8 + $0x668] ss:$16 sps:$4 sm:$0xff]   ;;  %v7779_v11 = vld [vmem:[#allocation8 + $0x684] ss:$16 sps:$4 sm:$0xff]  }
 0x21a   :  { %4324 = vmatprep.subr.bf16.mxu0 %v7692_v13  ;;  %v7777_v13 = vld [vmem:[#allocation8 + $0x680] ss:$16 sps:$4 sm:$0xff]  }
 0x21c   :  { %3997 = vmatpush1.bf16.msra.mxu1 %v7687_v12  ;;  %v7782_v12 = vld [vmem:[#allocation8 + $0x68c] ss:$16 sps:$4 sm:$0xff]  }
 0x21d   :  { %4325 = vmatpush1.bf16.msra.mxu0 %v7690_v14  ;;  %3998 = vmatprep.subr.bf16.mxu1 %v7695_v15  ;;  %v7780_v14 = vld [vmem:[#allocation8 + $0x688] ss:$16 sps:$4 sm:$0xff]   ;;  %v7785_v15 = vld [vmem:[#allocation8 + $0x6a4] ss:$16 sps:$4 sm:$0xff]  }
 0x21e   :  { %4326 = vmatprep.subr.bf16.mxu0 %v7698_v17  ;;  %v7783_v17 = vld [vmem:[#allocation8 + $0x6a0] ss:$16 sps:$4 sm:$0xff]  }
 0x220   :  { %3999 = vmatpush1.bf16.msra.mxu1 %v7693_v16  ;;  %v7788_v16 = vld [vmem:[#allocation8 + $0x6ac] ss:$16 sps:$4 sm:$0xff]  }
 0x221   :  { %4327 = vmatpush1.bf16.msra.mxu0 %v7696_v18  ;;  %4000 = vmatprep.subr.bf16.mxu1 %v7701_v19  ;;  %v7786_v18 = vld [vmem:[#allocation8 + $0x6a8] ss:$16 sps:$4 sm:$0xff]   ;;  %v7791_v19 = vld [vmem:[#allocation8 + $0x6c4] ss:$16 sps:$4 sm:$0xff]  }
 0x222   :  { %4328 = vmatprep.subr.bf16.mxu0 %v7704_v21  ;;  %v7789_v21 = vld [vmem:[#allocation8 + $0x6c0] ss:$16 sps:$4 sm:$0xff]  }
 0x224   :  { %4001 = vmatpush1.bf16.msra.mxu1 %v7699_v20  ;;  %v7794_v20 = vld [vmem:[#allocation8 + $0x6cc] ss:$16 sps:$4 sm:$0xff]  }
 0x225   :  { %4329 = vmatpush1.bf16.msra.mxu0 %v7702_v22  ;;  %4002 = vmatprep.subr.bf16.mxu1 %v7707_v23  ;;  %v7792_v22 = vld [vmem:[#allocation8 + $0x6c8] ss:$16 sps:$4 sm:$0xff]   ;;  %v7797_v23 = vld [vmem:[#allocation8 + $0x6e4] ss:$16 sps:$4 sm:$0xff]  }
 0x226   :  { %4330 = vmatprep.subr.bf16.mxu0 %v7710_v24  ;;  %v7800_v24 = vld [vmem:[#allocation8 + $0x6ec] ss:$16 sps:$4 sm:$0xff]  }
 0x228   :  { %4003 = vmatpush1.bf16.msra.mxu1 %v7705_v25  ;;  %v7795_v25 = vld [vmem:[#allocation8 + $0x6e0] ss:$16 sps:$4 sm:$0xff]  }
 0x229   :  { %4331 = vmatpush1.bf16.msra.mxu0 %v7708_v26  ;;  %4004 = vmatprep.subr.bf16.mxu1 %v7713_v27  ;;  %v7798_v26 = vld [vmem:[#allocation8 + $0x6e8] ss:$16 sps:$4 sm:$0xff]   ;;  %v7803_v27 = vld [vmem:[#allocation8 + $0x704] ss:$16 sps:$4 sm:$0xff]  }
 0x22a   :  { %4332 = vmatprep.subr.bf16.mxu0 %v7716_v28  ;;  %v7806_v28 = vld [vmem:[#allocation8 + $0x70c] ss:$16 sps:$4 sm:$0xff]  }
 0x22c   :  { %4005 = vmatpush1.bf16.msra.mxu1 %v7711_v29  ;;  %v7801_v29 = vld [vmem:[#allocation8 + $0x700] ss:$16 sps:$4 sm:$0xff]  }
 0x22d   :  { %4333 = vmatpush1.bf16.msra.mxu0 %v7714_v30  ;;  %4006 = vmatprep.subr.bf16.mxu1 %v7719_v31  ;;  %v7804_v30 = vld [vmem:[#allocation8 + $0x708] ss:$16 sps:$4 sm:$0xff]   ;;  %v7809_v31 = vld [vmem:[#allocation8 + $0x724] ss:$16 sps:$4 sm:$0xff]  }
 0x22e   :  { %4334 = vmatprep.subr.bf16.mxu0 %v7722_v32  ;;  %v7812_v32 = vld [vmem:[#allocation8 + $0x72c] ss:$16 sps:$4 sm:$0xff]  }
 0x230   :  { %4007 = vmatpush1.bf16.msra.mxu1 %v7717_v33  ;;  %v7807_v33 = vld [vmem:[#allocation8 + $0x720] ss:$16 sps:$4 sm:$0xff]  }
 0x231   :  { %4335 = vmatpush1.bf16.msra.mxu0 %v7720_v34  ;;  %4008 = vmatprep.subr.bf16.mxu1 %v7725_v35  ;;  %v7810_v34 = vld [vmem:[#allocation8 + $0x728] ss:$16 sps:$4 sm:$0xff]   ;;  %v7815_v35 = vld [vmem:[#allocation8 + $0x744] ss:$16 sps:$4 sm:$0xff]  }
 0x232   :  { %4336 = vmatprep.subr.bf16.mxu0 %v7728_v36  ;;  %v7818_v36 = vld [vmem:[#allocation8 + $0x74c] ss:$16 sps:$4 sm:$0xff]  }
 0x234   :  { %4009 = vmatpush1.bf16.msra.mxu1 %v7723_v37  ;;  %v7813_v37 = vld [vmem:[#allocation8 + $0x740] ss:$16 sps:$4 sm:$0xff]  }
 0x235   :  { %4337 = vmatpush1.bf16.msra.mxu0 %v7726_v38  ;;  %4010 = vmatprep.subr.bf16.mxu1 %v7731_v39  ;;  %v7816_v38 = vld [vmem:[#allocation8 + $0x748] ss:$16 sps:$4 sm:$0xff]   ;;  %v7821_v39 = vld [vmem:[#allocation8 + $0x764] ss:$16 sps:$4 sm:$0xff]  }
 0x236   :  { %4338 = vmatprep.subr.bf16.mxu0 %v7734_v40  ;;  %v7824_v40 = vld [vmem:[#allocation8 + $0x76c] ss:$16 sps:$4 sm:$0xff]  }
 0x238   :  { %4011 = vmatpush1.bf16.msra.mxu1 %v7729_v42  ;;  %v7819_v42 = vld [vmem:[#allocation8 + $0x760] ss:$16 sps:$4 sm:$0xff]  }
 0x239   :  { %4339 = vmatpush1.bf16.msra.mxu0 %v7732_v43  ;;  %4012 = vmatprep.subr.bf16.mxu1 %v7737_v44  ;;  %v7822_v43 = vld [vmem:[#allocation8 + $0x768] ss:$16 sps:$4 sm:$0xff]   ;;  %v7827_v44 = vld [vmem:[#allocation8 + $0x784] ss:$16 sps:$4 sm:$0xff]  }
 0x23a   :  { %4340 = vmatprep.subr.bf16.mxu0 %v7740_v45  ;;  %v7830_v45 = vld [vmem:[#allocation8 + $0x78c] ss:$16 sps:$4 sm:$0xff]  }
 0x23c   :  { %4013 = vmatpush1.bf16.msra.mxu1 %v7735_v46  ;;  %v7825_v46 = vld [vmem:[#allocation8 + $0x780] ss:$16 sps:$4 sm:$0xff]  }
 0x23d   :  { %4341 = vmatpush1.bf16.msra.mxu0 %v7738_v47  ;;  %4014 = vmatprep.subr.bf16.mxu1 %v7743_v48  ;;  %v7828_v47 = vld [vmem:[#allocation8 + $0x788] ss:$16 sps:$4 sm:$0xff]   ;;  %v7833_v48 = vld [vmem:[#allocation8 + $0x7a4] ss:$16 sps:$4 sm:$0xff]  }
 0x23e   :  { %4342 = vmatprep.subr.bf16.mxu0 %v7746_v49  ;;  %v7836_v49 = vld [vmem:[#allocation8 + $0x7ac] ss:$16 sps:$4 sm:$0xff]  }
 0x240   :  { %4015 = vmatpush1.bf16.msra.mxu1 %v7741_v50  ;;  %v7831_v50 = vld [vmem:[#allocation8 + $0x7a0] ss:$16 sps:$4 sm:$0xff]  }
 0x241   :  { %4343 = vmatpush1.bf16.msra.mxu0 %v7744_v51  ;;  %4016 = vmatprep.subr.bf16.mxu1 %v7749_v52  ;;  %v7834_v51 = vld [vmem:[#allocation8 + $0x7a8] ss:$16 sps:$4 sm:$0xff]   ;;  %v7839_v52 = vld [vmem:[#allocation8 + $0x7c4] ss:$16 sps:$4 sm:$0xff]  }
 0x242   :  { %4344 = vmatprep.subr.bf16.mxu0 %v7752_v53  ;;  %v7842_v53 = vld [vmem:[#allocation8 + $0x7cc] ss:$16 sps:$4 sm:$0xff]  }
 0x244   :  { %4017 = vmatpush1.bf16.msra.mxu1 %v7747_v54  ;;  %v7837_v54 = vld [vmem:[#allocation8 + $0x7c0] ss:$16 sps:$4 sm:$0xff]  }
 0x245   :  { %4345 = vmatpush1.bf16.msra.mxu0 %v7750_v55  ;;  %4027 = vmatprep.subr.bf16.mxu1 %v7755_v56  ;;  %v7840_v55 = vld [vmem:[#allocation8 + $0x7c8] ss:$16 sps:$4 sm:$0xff]   ;;  %v7845_v56 = vld [vmem:[#allocation8 + $0x7e4] ss:$16 sps:$4 sm:$0xff]  }
 0x246   :  { %4355 = vmatprep.subr.bf16.mxu0 %v7758_v57  ;;  %v7848_v57 = vld [vmem:[#allocation8 + $0x7ec] ss:$16 sps:$4 sm:$0xff]  }
 0x247   :  { %4019 = vmatmul.mubr.bf16.vlgmr.msra.gmra.mrb[8].mxu1 %v787_v59 }
 0x248   :  { %4347 = vmatmul.mubr.bf16.vlgmr.msra.gmra.mrb[16].mxu0 %v787_v59  ;;  %4028 = vmatpush1.bf16.msra.mxu1 %v7753_v58  ;;  %v7843_v58 = vld [vmem:[#allocation8 + $0x7e0] ss:$16 sps:$4 sm:$0xff]   ;;  %v7846_v59 = vld [vmem:[#allocation8 + $0x7e8] ss:$16 sps:$4 sm:$0xff]  }
 0x249   :  { %4059 = vmatprep.mubr.bf16.mxu1 %v793_v63  ;;  %4356 = vmatpush1.bf16.msra.mxu0 %v7756_v61  ;;  %v7851_v61 = vld [vmem:[#allocation8 + $0x804] ss:$16 sps:$4 sm:$0xff]  }
 0x24a   :  { %4387 = vmatprep.mubr.bf16.mxu0 %v793_v63  ;;  %4029 = vmatprep.subr.bf16.mxu1 %v7761_v62  ;;  %v7854_v62 = vld [vmem:[#allocation8 + $0x80c] ss:$16 sps:$4 sm:$0xff]   ;;  %v7849_v63 = vld [vmem:[#allocation8 + $0x800] ss:$16 sps:$4 sm:$0xff]  }
 0x24b   :  { %4357 = vmatprep.subr.bf16.mxu0 %v7764_v0  ;;  %v791_v0 = vrot.slane %v9173_v41, 6  ;;  %v7861_v41 = vld [vmem:[#allocation8 + $0x840] ss:$16 sps:$4 sm:$0xff]  }
 0x24c   :  { %4030 = vmatpush1.bf16.msra.mxu1 %v7759_v1  ;;  %v7852_v1 = vld [vmem:[#allocation8 + $0x808] ss:$16 sps:$4 sm:$0xff]  }
 0x24d   :  { %4358 = vmatpush1.bf16.msra.mxu0 %v7762_v2  ;;  %4031 = vmatprep.subr.bf16.mxu1 %v7767_v3  ;;  %v7857_v2 = vld [vmem:[#allocation8 + $0x824] ss:$16 sps:$4 sm:$0xff]   ;;  %v796_v3 = vrot.slane %v9179_v60, 1 }
 0x24e   :  { %4359 = vmatprep.subr.bf16.mxu0 %v7770_v4  ;;  %v7860_v4 = vld [vmem:[#allocation8 + $0x82c] ss:$16 sps:$4 sm:$0xff]  }
 0x250   :  { %4032 = vmatpush1.bf16.msra.mxu1 %v7765_v5  ;;  %v7855_v5 = vld [vmem:[#allocation8 + $0x820] ss:$16 sps:$4 sm:$0xff]  }
 0x251   :  { %4360 = vmatpush1.bf16.msra.mxu0 %v7768_v6  ;;  %4033 = vmatprep.subr.bf16.mxu1 %v7773_v7  ;;  %v7858_v6 = vld [vmem:[#allocation8 + $0x828] ss:$16 sps:$4 sm:$0xff]   ;;  %v7863_v7 = vld [vmem:[#allocation8 + $0x844] ss:$16 sps:$4 sm:$0xff]  }
 0x252   :  { %4361 = vmatprep.subr.bf16.mxu0 %v7776_v8  ;;  %v7866_v8 = vld [vmem:[#allocation8 + $0x84c] ss:$16 sps:$4 sm:$0xff]  }
 0x254   :  { %4034 = vmatpush1.bf16.msra.mxu1 %v7771_v9  ;;  %v7864_v9 = vld [vmem:[#allocation8 + $0x848] ss:$16 sps:$4 sm:$0xff]  }
 0x255   :  { %4362 = vmatpush1.bf16.msra.mxu0 %v7774_v10  ;;  %4035 = vmatprep.subr.bf16.mxu1 %v7779_v11  ;;  %v7869_v10 = vld [vmem:[#allocation8 + $0x864] ss:$16 sps:$4 sm:$0xff]   ;;  %v7872_v11 = vld [vmem:[#allocation8 + $0x86c] ss:$16 sps:$4 sm:$0xff]  }
 0x256   :  { %4363 = vmatprep.subr.bf16.mxu0 %v7782_v12  ;;  %v7867_v12 = vld [vmem:[#allocation8 + $0x860] ss:$16 sps:$4 sm:$0xff]  }
 0x258   :  { %4036 = vmatpush1.bf16.msra.mxu1 %v7777_v13  ;;  %v7870_v13 = vld [vmem:[#allocation8 + $0x868] ss:$16 sps:$4 sm:$0xff]  }
 0x259   :  { %4364 = vmatpush1.bf16.msra.mxu0 %v7780_v14  ;;  %4037 = vmatprep.subr.bf16.mxu1 %v7785_v15  ;;  %v7875_v14 = vld [vmem:[#allocation8 + $0x884] ss:$16 sps:$4 sm:$0xff]   ;;  %v7878_v15 = vld [vmem:[#allocation8 + $0x88c] ss:$16 sps:$4 sm:$0xff]  }
 0x25a   :  { %4365 = vmatprep.subr.bf16.mxu0 %v7788_v16  ;;  %v7873_v16 = vld [vmem:[#allocation8 + $0x880] ss:$16 sps:$4 sm:$0xff]  }
 0x25c   :  { %4038 = vmatpush1.bf16.msra.mxu1 %v7783_v17  ;;  %v7876_v17 = vld [vmem:[#allocation8 + $0x888] ss:$16 sps:$4 sm:$0xff]  }
 0x25d   :  { %4366 = vmatpush1.bf16.msra.mxu0 %v7786_v18  ;;  %4039 = vmatprep.subr.bf16.mxu1 %v7791_v19  ;;  %v7881_v18 = vld [vmem:[#allocation8 + $0x8a4] ss:$16 sps:$4 sm:$0xff]   ;;  %v7884_v19 = vld [vmem:[#allocation8 + $0x8ac] ss:$16 sps:$4 sm:$0xff]  }
 0x25e   :  { %4367 = vmatprep.subr.bf16.mxu0 %v7794_v20  ;;  %v7879_v20 = vld [vmem:[#allocation8 + $0x8a0] ss:$16 sps:$4 sm:$0xff]  }
 0x260   :  { %4040 = vmatpush1.bf16.msra.mxu1 %v7789_v21  ;;  %v7882_v21 = vld [vmem:[#allocation8 + $0x8a8] ss:$16 sps:$4 sm:$0xff]  }
 0x261   :  { %4368 = vmatpush1.bf16.msra.mxu0 %v7792_v22  ;;  %4041 = vmatprep.subr.bf16.mxu1 %v7797_v23  ;;  %v7887_v22 = vld [vmem:[#allocation8 + $0x8c4] ss:$16 sps:$4 sm:$0xff]   ;;  %v7890_v23 = vld [vmem:[#allocation8 + $0x8cc] ss:$16 sps:$4 sm:$0xff]  }
 0x262   :  { %4369 = vmatprep.subr.bf16.mxu0 %v7800_v24  ;;  %v7885_v24 = vld [vmem:[#allocation8 + $0x8c0] ss:$16 sps:$4 sm:$0xff]  }
 0x264   :  { %4042 = vmatpush1.bf16.msra.mxu1 %v7795_v25  ;;  %v7888_v25 = vld [vmem:[#allocation8 + $0x8c8] ss:$16 sps:$4 sm:$0xff]  }
 0x265   :  { %4370 = vmatpush1.bf16.msra.mxu0 %v7798_v26  ;;  %4043 = vmatprep.subr.bf16.mxu1 %v7803_v27  ;;  %v7893_v26 = vld [vmem:[#allocation8 + $0x8e4] ss:$16 sps:$4 sm:$0xff]   ;;  %v7896_v27 = vld [vmem:[#allocation8 + $0x8ec] ss:$16 sps:$4 sm:$0xff]  }
 0x266   :  { %4371 = vmatprep.subr.bf16.mxu0 %v7806_v28  ;;  %v7891_v28 = vld [vmem:[#allocation8 + $0x8e0] ss:$16 sps:$4 sm:$0xff]  }
 0x268   :  { %4044 = vmatpush1.bf16.msra.mxu1 %v7801_v29  ;;  %v7894_v29 = vld [vmem:[#allocation8 + $0x8e8] ss:$16 sps:$4 sm:$0xff]  }
 0x269   :  { %4372 = vmatpush1.bf16.msra.mxu0 %v7804_v30  ;;  %4045 = vmatprep.subr.bf16.mxu1 %v7809_v31  ;;  %v7899_v30 = vld [vmem:[#allocation8 + $0x904] ss:$16 sps:$4 sm:$0xff]   ;;  %v7902_v31 = vld [vmem:[#allocation8 + $0x90c] ss:$16 sps:$4 sm:$0xff]  }
 0x26a   :  { %4373 = vmatprep.subr.bf16.mxu0 %v7812_v32  ;;  %v7897_v32 = vld [vmem:[#allocation8 + $0x900] ss:$16 sps:$4 sm:$0xff]  }
 0x26c   :  { %4046 = vmatpush1.bf16.msra.mxu1 %v7807_v33  ;;  %v7900_v33 = vld [vmem:[#allocation8 + $0x908] ss:$16 sps:$4 sm:$0xff]  }
 0x26d   :  { %4374 = vmatpush1.bf16.msra.mxu0 %v7810_v34  ;;  %4047 = vmatprep.subr.bf16.mxu1 %v7815_v35  ;;  %v7905_v34 = vld [vmem:[#allocation8 + $0x924] ss:$16 sps:$4 sm:$0xff]   ;;  %v7908_v35 = vld [vmem:[#allocation8 + $0x92c] ss:$16 sps:$4 sm:$0xff]  }
 0x26e   :  { %4375 = vmatprep.subr.bf16.mxu0 %v7818_v36  ;;  %v7903_v36 = vld [vmem:[#allocation8 + $0x920] ss:$16 sps:$4 sm:$0xff]  }
 0x270   :  { %4048 = vmatpush1.bf16.msra.mxu1 %v7813_v37  ;;  %v7906_v37 = vld [vmem:[#allocation8 + $0x928] ss:$16 sps:$4 sm:$0xff]  }
 0x271   :  { %4376 = vmatpush1.bf16.msra.mxu0 %v7816_v38  ;;  %4049 = vmatprep.subr.bf16.mxu1 %v7821_v39  ;;  %v7911_v38 = vld [vmem:[#allocation8 + $0x944] ss:$16 sps:$4 sm:$0xff]   ;;  %v7914_v39 = vld [vmem:[#allocation8 + $0x94c] ss:$16 sps:$4 sm:$0xff]  }
 0x272   :  { %4377 = vmatprep.subr.bf16.mxu0 %v7824_v40  ;;  %v7909_v40 = vld [vmem:[#allocation8 + $0x940] ss:$16 sps:$4 sm:$0xff]  }
 0x274   :  { %4050 = vmatpush1.bf16.msra.mxu1 %v7819_v42  ;;  %v7912_v42 = vld [vmem:[#allocation8 + $0x948] ss:$16 sps:$4 sm:$0xff]  }
 0x275   :  { %4378 = vmatpush1.bf16.msra.mxu0 %v7822_v43  ;;  %4051 = vmatprep.subr.bf16.mxu1 %v7827_v44  ;;  %v7917_v43 = vld [vmem:[#allocation8 + $0x964] ss:$16 sps:$4 sm:$0xff]   ;;  %v7920_v44 = vld [vmem:[#allocation8 + $0x96c] ss:$16 sps:$4 sm:$0xff]  }
 0x276   :  { %4379 = vmatprep.subr.bf16.mxu0 %v7830_v45  ;;  %v7915_v45 = vld [vmem:[#allocation8 + $0x960] ss:$16 sps:$4 sm:$0xff]  }
 0x278   :  { %4052 = vmatpush1.bf16.msra.mxu1 %v7825_v46  ;;  %v7918_v46 = vld [vmem:[#allocation8 + $0x968] ss:$16 sps:$4 sm:$0xff]  }
 0x279   :  { %4380 = vmatpush1.bf16.msra.mxu0 %v7828_v47  ;;  %4053 = vmatprep.subr.bf16.mxu1 %v7833_v48  ;;  %v7923_v47 = vld [vmem:[#allocation8 + $0x984] ss:$16 sps:$4 sm:$0xff]   ;;  %v7926_v48 = vld [vmem:[#allocation8 + $0x98c] ss:$16 sps:$4 sm:$0xff]  }
 0x27a   :  { %4381 = vmatprep.subr.bf16.mxu0 %v7836_v49  ;;  %v7921_v49 = vld [vmem:[#allocation8 + $0x980] ss:$16 sps:$4 sm:$0xff]  }
 0x27c   :  { %4054 = vmatpush1.bf16.msra.mxu1 %v7831_v50  ;;  %v7924_v50 = vld [vmem:[#allocation8 + $0x988] ss:$16 sps:$4 sm:$0xff]  }
 0x27d   :  { %4382 = vmatpush1.bf16.msra.mxu0 %v7834_v51  ;;  %4055 = vmatprep.subr.bf16.mxu1 %v7839_v52  ;;  %v7929_v51 = vld [vmem:[#allocation8 + $0x9a4] ss:$16 sps:$4 sm:$0xff]   ;;  %v7932_v52 = vld [vmem:[#allocation8 + $0x9ac] ss:$16 sps:$4 sm:$0xff]  }
 0x27e   :  { %4383 = vmatprep.subr.bf16.mxu0 %v7842_v53  ;;  %v7927_v53 = vld [vmem:[#allocation8 + $0x9a0] ss:$16 sps:$4 sm:$0xff]  }
 0x280   :  { %4056 = vmatpush1.bf16.msra.mxu1 %v7837_v54  ;;  %v7930_v54 = vld [vmem:[#allocation8 + $0x9a8] ss:$16 sps:$4 sm:$0xff]  }
 0x281   :  { %4384 = vmatpush1.bf16.msra.mxu0 %v7840_v55  ;;  %4057 = vmatprep.subr.bf16.mxu1 %v7845_v56  ;;  %v7935_v55 = vld [vmem:[#allocation8 + $0x9c4] ss:$16 sps:$4 sm:$0xff]   ;;  %v7938_v56 = vld [vmem:[#allocation8 + $0x9cc] ss:$16 sps:$4 sm:$0xff]  }
 0x282   :  { %4385 = vmatprep.subr.bf16.mxu0 %v7848_v57  ;;  %v7933_v57 = vld [vmem:[#allocation8 + $0x9c0] ss:$16 sps:$4 sm:$0xff]  }
 0x284   :  { %4058 = vmatpush1.bf16.msra.mxu1 %v7843_v58  ;;  %v7936_v58 = vld [vmem:[#allocation8 + $0x9c8] ss:$16 sps:$4 sm:$0xff]  }
 0x285   :  { %4386 = vmatpush1.bf16.msra.mxu0 %v7846_v59  ;;  %4068 = vmatprep.subr.bf16.mxu1 %v7851_v61  ;;  %v7941_v59 = vld [vmem:[#allocation8 + $0x9e4] ss:$16 sps:$4 sm:$0xff]   ;;  %v7944_v61 = vld [vmem:[#allocation8 + $0x9ec] ss:$16 sps:$4 sm:$0xff]  }
 0x286   :  { %4396 = vmatprep.subr.bf16.mxu0 %v7854_v62  ;;  %v7939_v62 = vld [vmem:[#allocation8 + $0x9e0] ss:$16 sps:$4 sm:$0xff]  }
 0x287   :  { %4060 = vmatmul.mubr.bf16.vlgmr.msra.gmra.mrb[8].mxu1 %v791_v0 }
 0x288   :  { %4388 = vmatmul.mubr.bf16.vlgmr.msra.gmra.mrb[16].mxu0 %v791_v0  ;;  %4069 = vmatpush1.bf16.msra.mxu1 %v7849_v63  ;;  %v7942_v63 = vld [vmem:[#allocation8 + $0x9e8] ss:$16 sps:$4 sm:$0xff]   ;;  %v7947_v0 = vld [vmem:[#allocation8 + $0xa04] ss:$16 sps:$4 sm:$0xff]  }
 0x289   :  { %4100 = vmatprep.mubr.bf16.mxu1 %v796_v3  ;;  %4397 = vmatpush1.bf16.msra.mxu0 %v7852_v1  ;;  %v7950_v1 = vld [vmem:[#allocation8 + $0xa0c] ss:$16 sps:$4 sm:$0xff]  }
 0x28a   :  { %4428 = vmatprep.mubr.bf16.mxu0 %v796_v3  ;;  %4070 = vmatprep.subr.bf16.mxu1 %v7857_v2  ;;  %v7945_v2 = vld [vmem:[#allocation8 + $0xa00] ss:$16 sps:$4 sm:$0xff]   ;;  %v7948_v3 = vld [vmem:[#allocation8 + $0xa08] ss:$16 sps:$4 sm:$0xff]  }
 0x28b   :  { %4398 = vmatprep.subr.bf16.mxu0 %v7860_v4  ;;  %v7953_v4 = vld [vmem:[#allocation8 + $0xa24] ss:$16 sps:$4 sm:$0xff]  }
 0x28c   :  { %4071 = vmatpush1.bf16.msra.mxu1 %v7855_v5  ;;  %v800_v5 = vrot.slane %v9179_v60, 3 }
 0x28d   :  { %4399 = vmatpush1.bf16.msra.mxu0 %v7858_v6  ;;  %4072 = vmatprep.subr.bf16.mxu1 %v7863_v7  ;;  %v7956_v6 = vld [vmem:[#allocation8 + $0xa2c] ss:$16 sps:$4 sm:$0xff]   ;;  %v7951_v7 = vld [vmem:[#allocation8 + $0xa20] ss:$16 sps:$4 sm:$0xff]  }
 0x28e   :  { %4400 = vmatprep.subr.bf16.mxu0 %v7866_v8  ;;  %v7954_v8 = vld [vmem:[#allocation8 + $0xa28] ss:$16 sps:$4 sm:$0xff]  }
 0x290   :  { %4073 = vmatpush1.bf16.msra.mxu1 %v7861_v41  ;;  %v7959_v41 = vld [vmem:[#allocation8 + $0xa44] ss:$16 sps:$4 sm:$0xff]  }
 0x291   :  { %4401 = vmatpush1.bf16.msra.mxu0 %v7864_v9  ;;  %4074 = vmatprep.subr.bf16.mxu1 %v7869_v10  ;;  %v7962_v9 = vld [vmem:[#allocation8 + $0xa4c] ss:$16 sps:$4 sm:$0xff]   ;;  %v7957_v10 = vld [vmem:[#allocation8 + $0xa40] ss:$16 sps:$4 sm:$0xff]  }
 0x292   :  { %4402 = vmatprep.subr.bf16.mxu0 %v7872_v11  ;;  %v7960_v11 = vld [vmem:[#allocation8 + $0xa48] ss:$16 sps:$4 sm:$0xff]  }
 0x294   :  { %4075 = vmatpush1.bf16.msra.mxu1 %v7867_v12  ;;  %v7965_v12 = vld [vmem:[#allocation8 + $0xa64] ss:$16 sps:$4 sm:$0xff]  }
 0x295   :  { %4403 = vmatpush1.bf16.msra.mxu0 %v7870_v13  ;;  %4076 = vmatprep.subr.bf16.mxu1 %v7875_v14  ;;  %v7968_v13 = vld [vmem:[#allocation8 + $0xa6c] ss:$16 sps:$4 sm:$0xff]   ;;  %v7963_v14 = vld [vmem:[#allocation8 + $0xa60] ss:$16 sps:$4 sm:$0xff]  }
 0x296   :  { %4404 = vmatprep.subr.bf16.mxu0 %v7878_v15  ;;  %v7966_v15 = vld [vmem:[#allocation8 + $0xa68] ss:$16 sps:$4 sm:$0xff]  }
 0x298   :  { %4077 = vmatpush1.bf16.msra.mxu1 %v7873_v16  ;;  %v7971_v16 = vld [vmem:[#allocation8 + $0xa84] ss:$16 sps:$4 sm:$0xff]  }
 0x299   :  { %4405 = vmatpush1.bf16.msra.mxu0 %v7876_v17  ;;  %4078 = vmatprep.subr.bf16.mxu1 %v7881_v18  ;;  %v7974_v17 = vld [vmem:[#allocation8 + $0xa8c] ss:$16 sps:$4 sm:$0xff]   ;;  %v7969_v18 = vld [vmem:[#allocation8 + $0xa80] ss:$16 sps:$4 sm:$0xff]  }
 0x29a   :  { %4406 = vmatprep.subr.bf16.mxu0 %v7884_v19  ;;  %v7972_v19 = vld [vmem:[#allocation8 + $0xa88] ss:$16 sps:$4 sm:$0xff]  }
 0x29c   :  { %4079 = vmatpush1.bf16.msra.mxu1 %v7879_v20  ;;  %v7977_v20 = vld [vmem:[#allocation8 + $0xaa4] ss:$16 sps:$4 sm:$0xff]  }
 0x29d   :  { %4407 = vmatpush1.bf16.msra.mxu0 %v7882_v21  ;;  %4080 = vmatprep.subr.bf16.mxu1 %v7887_v22  ;;  %v7980_v21 = vld [vmem:[#allocation8 + $0xaac] ss:$16 sps:$4 sm:$0xff]   ;;  %v7975_v22 = vld [vmem:[#allocation8 + $0xaa0] ss:$16 sps:$4 sm:$0xff]  }
 0x29e   :  { %4408 = vmatprep.subr.bf16.mxu0 %v7890_v23  ;;  %v7978_v23 = vld [vmem:[#allocation8 + $0xaa8] ss:$16 sps:$4 sm:$0xff]  }
 0x2a0   :  { %4081 = vmatpush1.bf16.msra.mxu1 %v7885_v24  ;;  %v7983_v24 = vld [vmem:[#allocation8 + $0xac4] ss:$16 sps:$4 sm:$0xff]  }
 0x2a1   :  { %4409 = vmatpush1.bf16.msra.mxu0 %v7888_v25  ;;  %4082 = vmatprep.subr.bf16.mxu1 %v7893_v26  ;;  %v7986_v25 = vld [vmem:[#allocation8 + $0xacc] ss:$16 sps:$4 sm:$0xff]   ;;  %v7981_v26 = vld [vmem:[#allocation8 + $0xac0] ss:$16 sps:$4 sm:$0xff]  }
 0x2a2   :  { %4410 = vmatprep.subr.bf16.mxu0 %v7896_v27  ;;  %v7984_v27 = vld [vmem:[#allocation8 + $0xac8] ss:$16 sps:$4 sm:$0xff]  }
 0x2a4   :  { %4083 = vmatpush1.bf16.msra.mxu1 %v7891_v28  ;;  %v7989_v28 = vld [vmem:[#allocation8 + $0xae4] ss:$16 sps:$4 sm:$0xff]  }
 0x2a5   :  { %4411 = vmatpush1.bf16.msra.mxu0 %v7894_v29  ;;  %4084 = vmatprep.subr.bf16.mxu1 %v7899_v30  ;;  %v7992_v29 = vld [vmem:[#allocation8 + $0xaec] ss:$16 sps:$4 sm:$0xff]   ;;  %v7987_v30 = vld [vmem:[#allocation8 + $0xae0] ss:$16 sps:$4 sm:$0xff]  }
 0x2a6   :  { %4412 = vmatprep.subr.bf16.mxu0 %v7902_v31  ;;  %v7990_v31 = vld [vmem:[#allocation8 + $0xae8] ss:$16 sps:$4 sm:$0xff]  }
 0x2a8   :  { %4085 = vmatpush1.bf16.msra.mxu1 %v7897_v32  ;;  %v7995_v32 = vld [vmem:[#allocation8 + $0xb04] ss:$16 sps:$4 sm:$0xff]  }
 0x2a9   :  { %4413 = vmatpush1.bf16.msra.mxu0 %v7900_v33  ;;  %4086 = vmatprep.subr.bf16.mxu1 %v7905_v34  ;;  %v7998_v33 = vld [vmem:[#allocation8 + $0xb0c] ss:$16 sps:$4 sm:$0xff]   ;;  %v7993_v34 = vld [vmem:[#allocation8 + $0xb00] ss:$16 sps:$4 sm:$0xff]  }
 0x2aa   :  { %4414 = vmatprep.subr.bf16.mxu0 %v7908_v35  ;;  %v7996_v35 = vld [vmem:[#allocation8 + $0xb08] ss:$16 sps:$4 sm:$0xff]  }
 0x2ac   :  { %4087 = vmatpush1.bf16.msra.mxu1 %v7903_v36  ;;  %v8001_v36 = vld [vmem:[#allocation8 + $0xb24] ss:$16 sps:$4 sm:$0xff]  }
 0x2ad   :  { %4415 = vmatpush1.bf16.msra.mxu0 %v7906_v37  ;;  %4088 = vmatprep.subr.bf16.mxu1 %v7911_v38  ;;  %v8004_v37 = vld [vmem:[#allocation8 + $0xb2c] ss:$16 sps:$4 sm:$0xff]   ;;  %v7999_v38 = vld [vmem:[#allocation8 + $0xb20] ss:$16 sps:$4 sm:$0xff]  }
 0x2ae   :  { %4416 = vmatprep.subr.bf16.mxu0 %v7914_v39  ;;  %v8002_v39 = vld [vmem:[#allocation8 + $0xb28] ss:$16 sps:$4 sm:$0xff]  }
 0x2b0   :  { %4089 = vmatpush1.bf16.msra.mxu1 %v7909_v40  ;;  %v8007_v40 = vld [vmem:[#allocation8 + $0xb44] ss:$16 sps:$4 sm:$0xff]  }
 0x2b1   :  { %4417 = vmatpush1.bf16.msra.mxu0 %v7912_v42  ;;  %4090 = vmatprep.subr.bf16.mxu1 %v7917_v43  ;;  %v8010_v42 = vld [vmem:[#allocation8 + $0xb4c] ss:$16 sps:$4 sm:$0xff]   ;;  %v8005_v43 = vld [vmem:[#allocation8 + $0xb40] ss:$16 sps:$4 sm:$0xff]  }
 0x2b2   :  { %4418 = vmatprep.subr.bf16.mxu0 %v7920_v44  ;;  %v8008_v44 = vld [vmem:[#allocation8 + $0xb48] ss:$16 sps:$4 sm:$0xff]  }
 0x2b4   :  { %4091 = vmatpush1.bf16.msra.mxu1 %v7915_v45  ;;  %v8013_v45 = vld [vmem:[#allocation8 + $0xb64] ss:$16 sps:$4 sm:$0xff]  }
 0x2b5   :  { %4419 = vmatpush1.bf16.msra.mxu0 %v7918_v46  ;;  %4092 = vmatprep.subr.bf16.mxu1 %v7923_v47  ;;  %v8016_v46 = vld [vmem:[#allocation8 + $0xb6c] ss:$16 sps:$4 sm:$0xff]   ;;  %v8011_v47 = vld [vmem:[#allocation8 + $0xb60] ss:$16 sps:$4 sm:$0xff]  }
 0x2b6   :  { %4420 = vmatprep.subr.bf16.mxu0 %v7926_v48  ;;  %v8014_v48 = vld [vmem:[#allocation8 + $0xb68] ss:$16 sps:$4 sm:$0xff]  }
 0x2b8   :  { %4093 = vmatpush1.bf16.msra.mxu1 %v7921_v49  ;;  %v8019_v49 = vld [vmem:[#allocation8 + $0xb84] ss:$16 sps:$4 sm:$0xff]  }
 0x2b9   :  { %4421 = vmatpush1.bf16.msra.mxu0 %v7924_v50  ;;  %4094 = vmatprep.subr.bf16.mxu1 %v7929_v51  ;;  %v8022_v50 = vld [vmem:[#allocation8 + $0xb8c] ss:$16 sps:$4 sm:$0xff]   ;;  %v8017_v51 = vld [vmem:[#allocation8 + $0xb80] ss:$16 sps:$4 sm:$0xff]  }
 0x2ba   :  { %4422 = vmatprep.subr.bf16.mxu0 %v7932_v52  ;;  %v8020_v52 = vld [vmem:[#allocation8 + $0xb88] ss:$16 sps:$4 sm:$0xff]  }
 0x2bc   :  { %4095 = vmatpush1.bf16.msra.mxu1 %v7927_v53  ;;  %v8025_v53 = vld [vmem:[#allocation8 + $0xba4] ss:$16 sps:$4 sm:$0xff]  }
 0x2bd   :  { %4423 = vmatpush1.bf16.msra.mxu0 %v7930_v54  ;;  %4096 = vmatprep.subr.bf16.mxu1 %v7935_v55  ;;  %v8028_v54 = vld [vmem:[#allocation8 + $0xbac] ss:$16 sps:$4 sm:$0xff]   ;;  %v8023_v55 = vld [vmem:[#allocation8 + $0xba0] ss:$16 sps:$4 sm:$0xff]  }
 0x2be   :  { %4424 = vmatprep.subr.bf16.mxu0 %v7938_v56  ;;  %v8026_v56 = vld [vmem:[#allocation8 + $0xba8] ss:$16 sps:$4 sm:$0xff]  }
 0x2c0   :  { %4097 = vmatpush1.bf16.msra.mxu1 %v7933_v57  ;;  %v8031_v57 = vld [vmem:[#allocation8 + $0xbc4] ss:$16 sps:$4 sm:$0xff]  }
 0x2c1   :  { %4425 = vmatpush1.bf16.msra.mxu0 %v7936_v58  ;;  %4098 = vmatprep.subr.bf16.mxu1 %v7941_v59  ;;  %v8034_v58 = vld [vmem:[#allocation8 + $0xbcc] ss:$16 sps:$4 sm:$0xff]   ;;  %v8029_v59 = vld [vmem:[#allocation8 + $0xbc0] ss:$16 sps:$4 sm:$0xff]  }
 0x2c2   :  { %4426 = vmatprep.subr.bf16.mxu0 %v7944_v61  ;;  %v8032_v61 = vld [vmem:[#allocation8 + $0xbc8] ss:$16 sps:$4 sm:$0xff]  }
 0x2c4   :  { %4099 = vmatpush1.bf16.msra.mxu1 %v7939_v62  ;;  %v8037_v62 = vld [vmem:[#allocation8 + $0xbe4] ss:$16 sps:$4 sm:$0xff]  }
 0x2c5   :  { %4427 = vmatpush1.bf16.msra.mxu0 %v7942_v63  ;;  %4109 = vmatprep.subr.bf16.mxu1 %v7947_v0  ;;  %v8040_v63 = vld [vmem:[#allocation8 + $0xbec] ss:$16 sps:$4 sm:$0xff]   ;;  %v8035_v0 = vld [vmem:[#allocation8 + $0xbe0] ss:$16 sps:$4 sm:$0xff]  }
 0x2c6   :  { %4437 = vmatprep.subr.bf16.mxu0 %v7950_v1  ;;  %v8038_v1 = vld [vmem:[#allocation8 + $0xbe8] ss:$16 sps:$4 sm:$0xff]  }
 0x2c7   :  { %4101 = vmatmul.mubr.bf16.vlgmr.msra.gmra.mrb[8].mxu1 %v9179_v60 }
 0x2c8   :  { %4429 = vmatmul.mubr.bf16.vlgmr.msra.gmra.mrb[16].mxu0 %v9179_v60  ;;  %4110 = vmatpush1.bf16.msra.mxu1 %v7945_v2  ;;  %v8043_v2 = vld [vmem:[#allocation8 + $0xc04] ss:$16 sps:$4 sm:$0xff]  }
 0x2c9   :  { %4141 = vmatprep.mubr.bf16.mxu1 %v800_v5  ;;  %4438 = vmatpush1.bf16.msra.mxu0 %v7948_v3  ;;  %v8046_v3 = vld [vmem:[#allocation8 + $0xc0c] ss:$16 sps:$4 sm:$0xff]  }
 0x2ca   :  { %4469 = vmatprep.mubr.bf16.mxu0 %v800_v5  ;;  %4111 = vmatprep.subr.bf16.mxu1 %v7953_v4  ;;  %v8041_v4 = vld [vmem:[#allocation8 + $0xc00] ss:$16 sps:$4 sm:$0xff]   ;;  %v798_v5 = vrot.slane %v9179_v60, 2 }
 0x2cb   :  { %4439 = vmatprep.subr.bf16.mxu0 %v7956_v6  ;;  %v8044_v6 = vld [vmem:[#allocation8 + $0xc08] ss:$16 sps:$4 sm:$0xff]  }
 0x2cc   :  { %4112 = vmatpush1.bf16.msra.mxu1 %v7951_v7  ;;  %v8049_v7 = vld [vmem:[#allocation8 + $0xc24] ss:$16 sps:$4 sm:$0xff]  }
 0x2cd   :  { %4440 = vmatpush1.bf16.msra.mxu0 %v7954_v8  ;;  %4113 = vmatprep.subr.bf16.mxu1 %v7959_v41  ;;  %v804_v8 = vrot.slane %v9179_v60, 5  ;;  %v8052_v41 = vld [vmem:[#allocation8 + $0xc2c] ss:$16 sps:$4 sm:$0xff]  }
 0x2ce   :  { %4441 = vmatprep.subr.bf16.mxu0 %v7962_v9  ;;  %v8047_v9 = vld [vmem:[#allocation8 + $0xc20] ss:$16 sps:$4 sm:$0xff]  }
 0x2d0   :  { %4114 = vmatpush1.bf16.msra.mxu1 %v7957_v10  ;;  %v8050_v10 = vld [vmem:[#allocation8 + $0xc28] ss:$16 sps:$4 sm:$0xff]  }
 0x2d1   :  { %4442 = vmatpush1.bf16.msra.mxu0 %v7960_v11  ;;  %4115 = vmatprep.subr.bf16.mxu1 %v7965_v12  ;;  %v8055_v11 = vld [vmem:[#allocation8 + $0xc44] ss:$16 sps:$4 sm:$0xff]   ;;  %v8058_v12 = vld [vmem:[#allocation8 + $0xc4c] ss:$16 sps:$4 sm:$0xff]  }
 0x2d2   :  { %4443 = vmatprep.subr.bf16.mxu0 %v7968_v13  ;;  %v8053_v13 = vld [vmem:[#allocation8 + $0xc40] ss:$16 sps:$4 sm:$0xff]  }
 0x2d4   :  { %4116 = vmatpush1.bf16.msra.mxu1 %v7963_v14  ;;  %v8056_v14 = vld [vmem:[#allocation8 + $0xc48] ss:$16 sps:$4 sm:$0xff]  }
 0x2d5   :  { %4444 = vmatpush1.bf16.msra.mxu0 %v7966_v15  ;;  %4117 = vmatprep.subr.bf16.mxu1 %v7971_v16  ;;  %v8061_v15 = vld [vmem:[#allocation8 + $0xc64] ss:$16 sps:$4 sm:$0xff]   ;;  %v8064_v16 = vld [vmem:[#allocation8 + $0xc6c] ss:$16 sps:$4 sm:$0xff]  }
 0x2d6   :  { %4445 = vmatprep.subr.bf16.mxu0 %v7974_v17  ;;  %v8059_v17 = vld [vmem:[#allocation8 + $0xc60] ss:$16 sps:$4 sm:$0xff]  }
 0x2d8   :  { %4118 = vmatpush1.bf16.msra.mxu1 %v7969_v18  ;;  %v8062_v18 = vld [vmem:[#allocation8 + $0xc68] ss:$16 sps:$4 sm:$0xff]  }
 0x2d9   :  { %4446 = vmatpush1.bf16.msra.mxu0 %v7972_v19  ;;  %4119 = vmatprep.subr.bf16.mxu1 %v7977_v20  ;;  %v8067_v19 = vld [vmem:[#allocation8 + $0xc84] ss:$16 sps:$4 sm:$0xff]   ;;  %v8070_v20 = vld [vmem:[#allocation8 + $0xc8c] ss:$16 sps:$4 sm:$0xff]  }
 0x2da   :  { %4447 = vmatprep.subr.bf16.mxu0 %v7980_v21  ;;  %v8065_v21 = vld [vmem:[#allocation8 + $0xc80] ss:$16 sps:$4 sm:$0xff]  }
 0x2dc   :  { %4120 = vmatpush1.bf16.msra.mxu1 %v7975_v22  ;;  %v8068_v22 = vld [vmem:[#allocation8 + $0xc88] ss:$16 sps:$4 sm:$0xff]  }
 0x2dd   :  { %4448 = vmatpush1.bf16.msra.mxu0 %v7978_v23  ;;  %4121 = vmatprep.subr.bf16.mxu1 %v7983_v24  ;;  %v8073_v23 = vld [vmem:[#allocation8 + $0xca4] ss:$16 sps:$4 sm:$0xff]   ;;  %v8076_v24 = vld [vmem:[#allocation8 + $0xcac] ss:$16 sps:$4 sm:$0xff]  }
 0x2de   :  { %4449 = vmatprep.subr.bf16.mxu0 %v7986_v25  ;;  %v8071_v25 = vld [vmem:[#allocation8 + $0xca0] ss:$16 sps:$4 sm:$0xff]  }
 0x2e0   :  { %4122 = vmatpush1.bf16.msra.mxu1 %v7981_v26  ;;  %v8074_v26 = vld [vmem:[#allocation8 + $0xca8] ss:$16 sps:$4 sm:$0xff]  }
 0x2e1   :  { %4450 = vmatpush1.bf16.msra.mxu0 %v7984_v27  ;;  %4123 = vmatprep.subr.bf16.mxu1 %v7989_v28  ;;  %v8079_v27 = vld [vmem:[#allocation8 + $0xcc4] ss:$16 sps:$4 sm:$0xff]   ;;  %v8082_v28 = vld [vmem:[#allocation8 + $0xccc] ss:$16 sps:$4 sm:$0xff]  }
 0x2e2   :  { %4451 = vmatprep.subr.bf16.mxu0 %v7992_v29  ;;  %v8077_v29 = vld [vmem:[#allocation8 + $0xcc0] ss:$16 sps:$4 sm:$0xff]  }
 0x2e4   :  { %4124 = vmatpush1.bf16.msra.mxu1 %v7987_v30  ;;  %v8080_v30 = vld [vmem:[#allocation8 + $0xcc8] ss:$16 sps:$4 sm:$0xff]  }
 0x2e5   :  { %4452 = vmatpush1.bf16.msra.mxu0 %v7990_v31  ;;  %4125 = vmatprep.subr.bf16.mxu1 %v7995_v32  ;;  %v8085_v31 = vld [vmem:[#allocation8 + $0xce4] ss:$16 sps:$4 sm:$0xff]   ;;  %v8088_v32 = vld [vmem:[#allocation8 + $0xcec] ss:$16 sps:$4 sm:$0xff]  }
 0x2e6   :  { %4453 = vmatprep.subr.bf16.mxu0 %v7998_v33  ;;  %v8083_v33 = vld [vmem:[#allocation8 + $0xce0] ss:$16 sps:$4 sm:$0xff]  }
 0x2e8   :  { %4126 = vmatpush1.bf16.msra.mxu1 %v7993_v34  ;;  %v8086_v34 = vld [vmem:[#allocation8 + $0xce8] ss:$16 sps:$4 sm:$0xff]  }
 0x2e9   :  { %4454 = vmatpush1.bf16.msra.mxu0 %v7996_v35  ;;  %4127 = vmatprep.subr.bf16.mxu1 %v8001_v36  ;;  %v8091_v35 = vld [vmem:[#allocation8 + $0xd04] ss:$16 sps:$4 sm:$0xff]   ;;  %v8094_v36 = vld [vmem:[#allocation8 + $0xd0c] ss:$16 sps:$4 sm:$0xff]  }
 0x2ea   :  { %4455 = vmatprep.subr.bf16.mxu0 %v8004_v37  ;;  %v8089_v37 = vld [vmem:[#allocation8 + $0xd00] ss:$16 sps:$4 sm:$0xff]  }
 0x2ec   :  { %4128 = vmatpush1.bf16.msra.mxu1 %v7999_v38  ;;  %v8092_v38 = vld [vmem:[#allocation8 + $0xd08] ss:$16 sps:$4 sm:$0xff]  }
 0x2ed   :  { %4456 = vmatpush1.bf16.msra.mxu0 %v8002_v39  ;;  %4129 = vmatprep.subr.bf16.mxu1 %v8007_v40  ;;  %v8097_v39 = vld [vmem:[#allocation8 + $0xd24] ss:$16 sps:$4 sm:$0xff]   ;;  %v8100_v40 = vld [vmem:[#allocation8 + $0xd2c] ss:$16 sps:$4 sm:$0xff]  }
 0x2ee   :  { %4457 = vmatprep.subr.bf16.mxu0 %v8010_v42  ;;  %v8095_v42 = vld [vmem:[#allocation8 + $0xd20] ss:$16 sps:$4 sm:$0xff]  }
 0x2f0   :  { %4130 = vmatpush1.bf16.msra.mxu1 %v8005_v43  ;;  %v8098_v43 = vld [vmem:[#allocation8 + $0xd28] ss:$16 sps:$4 sm:$0xff]  }
 0x2f1   :  { %4458 = vmatpush1.bf16.msra.mxu0 %v8008_v44  ;;  %4131 = vmatprep.subr.bf16.mxu1 %v8013_v45  ;;  %v8103_v44 = vld [vmem:[#allocation8 + $0xd44] ss:$16 sps:$4 sm:$0xff]   ;;  %v8106_v45 = vld [vmem:[#allocation8 + $0xd4c] ss:$16 sps:$4 sm:$0xff]  }
 0x2f2   :  { %4459 = vmatprep.subr.bf16.mxu0 %v8016_v46  ;;  %v8101_v46 = vld [vmem:[#allocation8 + $0xd40] ss:$16 sps:$4 sm:$0xff]  }
 0x2f4   :  { %4132 = vmatpush1.bf16.msra.mxu1 %v8011_v47  ;;  %v8104_v47 = vld [vmem:[#allocation8 + $0xd48] ss:$16 sps:$4 sm:$0xff]  }
 0x2f5   :  { %4460 = vmatpush1.bf16.msra.mxu0 %v8014_v48  ;;  %4133 = vmatprep.subr.bf16.mxu1 %v8019_v49  ;;  %v8109_v48 = vld [vmem:[#allocation8 + $0xd64] ss:$16 sps:$4 sm:$0xff]   ;;  %v8112_v49 = vld [vmem:[#allocation8 + $0xd6c] ss:$16 sps:$4 sm:$0xff]  }
 0x2f6   :  { %4461 = vmatprep.subr.bf16.mxu0 %v8022_v50  ;;  %v8107_v50 = vld [vmem:[#allocation8 + $0xd60] ss:$16 sps:$4 sm:$0xff]  }
 0x2f8   :  { %4134 = vmatpush1.bf16.msra.mxu1 %v8017_v51  ;;  %v8110_v51 = vld [vmem:[#allocation8 + $0xd68] ss:$16 sps:$4 sm:$0xff]  }
 0x2f9   :  { %4462 = vmatpush1.bf16.msra.mxu0 %v8020_v52  ;;  %4135 = vmatprep.subr.bf16.mxu1 %v8025_v53  ;;  %v8115_v52 = vld [vmem:[#allocation8 + $0xd84] ss:$16 sps:$4 sm:$0xff]   ;;  %v8118_v53 = vld [vmem:[#allocation8 + $0xd8c] ss:$16 sps:$4 sm:$0xff]  }
 0x2fa   :  { %4463 = vmatprep.subr.bf16.mxu0 %v8028_v54  ;;  %v8113_v54 = vld [vmem:[#allocation8 + $0xd80] ss:$16 sps:$4 sm:$0xff]  }
 0x2fc   :  { %4136 = vmatpush1.bf16.msra.mxu1 %v8023_v55  ;;  %v8116_v55 = vld [vmem:[#allocation8 + $0xd88] ss:$16 sps:$4 sm:$0xff]  }
 0x2fd   :  { %4464 = vmatpush1.bf16.msra.mxu0 %v8026_v56  ;;  %4137 = vmatprep.subr.bf16.mxu1 %v8031_v57  ;;  %v8121_v56 = vld [vmem:[#allocation8 + $0xda4] ss:$16 sps:$4 sm:$0xff]   ;;  %v8124_v57 = vld [vmem:[#allocation8 + $0xdac] ss:$16 sps:$4 sm:$0xff]  }
 0x2fe   :  { %4465 = vmatprep.subr.bf16.mxu0 %v8034_v58  ;;  %v8119_v58 = vld [vmem:[#allocation8 + $0xda0] ss:$16 sps:$4 sm:$0xff]  }
 0x300   :  { %4138 = vmatpush1.bf16.msra.mxu1 %v8029_v59  ;;  %v8122_v59 = vld [vmem:[#allocation8 + $0xda8] ss:$16 sps:$4 sm:$0xff]  }
 0x301   :  { %4466 = vmatpush1.bf16.msra.mxu0 %v8032_v61  ;;  %4139 = vmatprep.subr.bf16.mxu1 %v8037_v62  ;;  %v8127_v61 = vld [vmem:[#allocation8 + $0xdc4] ss:$16 sps:$4 sm:$0xff]   ;;  %v8130_v62 = vld [vmem:[#allocation8 + $0xdcc] ss:$16 sps:$4 sm:$0xff]  }
 0x302   :  { %4467 = vmatprep.subr.bf16.mxu0 %v8040_v63  ;;  %v8125_v63 = vld [vmem:[#allocation8 + $0xdc0] ss:$16 sps:$4 sm:$0xff]  }
 0x304   :  { %4140 = vmatpush1.bf16.msra.mxu1 %v8035_v0  ;;  %v8128_v0 = vld [vmem:[#allocation8 + $0xdc8] ss:$16 sps:$4 sm:$0xff]  }
 0x305   :  { %4468 = vmatpush1.bf16.msra.mxu0 %v8038_v1  ;;  %4150 = vmatprep.subr.bf16.mxu1 %v8043_v2  ;;  %v8133_v1 = vld [vmem:[#allocation8 + $0xde4] ss:$16 sps:$4 sm:$0xff]   ;;  %v8136_v2 = vld [vmem:[#allocation8 + $0xdec] ss:$16 sps:$4 sm:$0xff]  }
 0x306   :  { %4478 = vmatprep.subr.bf16.mxu0 %v8046_v3  ;;  %v8131_v3 = vld [vmem:[#allocation8 + $0xde0] ss:$16 sps:$4 sm:$0xff]  }
 0x307   :  { %4142 = vmatmul.mubr.bf16.vlgmr.msra.gmra.mrb[8].mxu1 %v798_v5 }
 0x308   :  { %4470 = vmatmul.mubr.bf16.vlgmr.msra.gmra.mrb[16].mxu0 %v798_v5  ;;  %4151 = vmatpush1.bf16.msra.mxu1 %v8041_v4  ;;  %v8134_v4 = vld [vmem:[#allocation8 + $0xde8] ss:$16 sps:$4 sm:$0xff]   ;;  %v8139_v5 = vld [vmem:[#allocation8 + $0xe04] ss:$16 sps:$4 sm:$0xff]  }
 0x309   :  { %4182 = vmatprep.mubr.bf16.mxu1 %v804_v8  ;;  %4479 = vmatpush1.bf16.msra.mxu0 %v8044_v6  ;;  %v8142_v6 = vld [vmem:[#allocation8 + $0xe0c] ss:$16 sps:$4 sm:$0xff]  }
 0x30a   :  { %4510 = vmatprep.mubr.bf16.mxu0 %v804_v8  ;;  %4152 = vmatprep.subr.bf16.mxu1 %v8049_v7  ;;  %v8137_v7 = vld [vmem:[#allocation8 + $0xe00] ss:$16 sps:$4 sm:$0xff]   ;;  %v802_v8 = vrot.slane %v9179_v60, 4 }
 0x30b   :  { %4480 = vmatprep.subr.bf16.mxu0 %v8052_v41  ;;  %v8140_v41 = vld [vmem:[#allocation8 + $0xe08] ss:$16 sps:$4 sm:$0xff]  }
 0x30c   :  { %4153 = vmatpush1.bf16.msra.mxu1 %v8047_v9  ;;  %v8145_v9 = vld [vmem:[#allocation8 + $0xe24] ss:$16 sps:$4 sm:$0xff]  }
 0x30d   :  { %4481 = vmatpush1.bf16.msra.mxu0 %v8050_v10  ;;  %4154 = vmatprep.subr.bf16.mxu1 %v8055_v11  ;;  %v808_v10 = vrot.slane %v9179_v60, 7  ;;  %v8148_v11 = vld [vmem:[#allocation8 + $0xe2c] ss:$16 sps:$4 sm:$0xff]  }
 0x30e   :  { %4482 = vmatprep.subr.bf16.mxu0 %v8058_v12  ;;  %v8143_v12 = vld [vmem:[#allocation8 + $0xe20] ss:$16 sps:$4 sm:$0xff]  }
 0x310   :  { %4155 = vmatpush1.bf16.msra.mxu1 %v8053_v13  ;;  %v8146_v13 = vld [vmem:[#allocation8 + $0xe28] ss:$16 sps:$4 sm:$0xff]  }
 0x311   :  { %4483 = vmatpush1.bf16.msra.mxu0 %v8056_v14  ;;  %4156 = vmatprep.subr.bf16.mxu1 %v8061_v15  ;;  %v8151_v14 = vld [vmem:[#allocation8 + $0xe44] ss:$16 sps:$4 sm:$0xff]   ;;  %v8154_v15 = vld [vmem:[#allocation8 + $0xe4c] ss:$16 sps:$4 sm:$0xff]  }
 0x312   :  { %4484 = vmatprep.subr.bf16.mxu0 %v8064_v16  ;;  %v8149_v16 = vld [vmem:[#allocation8 + $0xe40] ss:$16 sps:$4 sm:$0xff]  }
 0x314   :  { %4157 = vmatpush1.bf16.msra.mxu1 %v8059_v17  ;;  %v8152_v17 = vld [vmem:[#allocation8 + $0xe48] ss:$16 sps:$4 sm:$0xff]  }
 0x315   :  { %4485 = vmatpush1.bf16.msra.mxu0 %v8062_v18  ;;  %4158 = vmatprep.subr.bf16.mxu1 %v8067_v19  ;;  %v8157_v18 = vld [vmem:[#allocation8 + $0xe64] ss:$16 sps:$4 sm:$0xff]   ;;  %v8160_v19 = vld [vmem:[#allocation8 + $0xe6c] ss:$16 sps:$4 sm:$0xff]  }
 0x316   :  { %4486 = vmatprep.subr.bf16.mxu0 %v8070_v20  ;;  %v8155_v20 = vld [vmem:[#allocation8 + $0xe60] ss:$16 sps:$4 sm:$0xff]  }
 0x318   :  { %4159 = vmatpush1.bf16.msra.mxu1 %v8065_v21  ;;  %v8158_v21 = vld [vmem:[#allocation8 + $0xe68] ss:$16 sps:$4 sm:$0xff]  }
 0x319   :  { %4487 = vmatpush1.bf16.msra.mxu0 %v8068_v22  ;;  %4160 = vmatprep.subr.bf16.mxu1 %v8073_v23  ;;  %v8163_v22 = vld [vmem:[#allocation8 + $0xe84] ss:$16 sps:$4 sm:$0xff]   ;;  %v8166_v23 = vld [vmem:[#allocation8 + $0xe8c] ss:$16 sps:$4 sm:$0xff]  }
 0x31a   :  { %4488 = vmatprep.subr.bf16.mxu0 %v8076_v24  ;;  %v8161_v24 = vld [vmem:[#allocation8 + $0xe80] ss:$16 sps:$4 sm:$0xff]  }
 0x31c   :  { %4161 = vmatpush1.bf16.msra.mxu1 %v8071_v25  ;;  %v8164_v25 = vld [vmem:[#allocation8 + $0xe88] ss:$16 sps:$4 sm:$0xff]  }
 0x31d   :  { %4489 = vmatpush1.bf16.msra.mxu0 %v8074_v26  ;;  %4162 = vmatprep.subr.bf16.mxu1 %v8079_v27  ;;  %v8169_v26 = vld [vmem:[#allocation8 + $0xea4] ss:$16 sps:$4 sm:$0xff]   ;;  %v8172_v27 = vld [vmem:[#allocation8 + $0xeac] ss:$16 sps:$4 sm:$0xff]  }
 0x31e   :  { %4490 = vmatprep.subr.bf16.mxu0 %v8082_v28  ;;  %v8167_v28 = vld [vmem:[#allocation8 + $0xea0] ss:$16 sps:$4 sm:$0xff]  }
 0x320   :  { %4163 = vmatpush1.bf16.msra.mxu1 %v8077_v29  ;;  %v8170_v29 = vld [vmem:[#allocation8 + $0xea8] ss:$16 sps:$4 sm:$0xff]  }
 0x321   :  { %4491 = vmatpush1.bf16.msra.mxu0 %v8080_v30  ;;  %4164 = vmatprep.subr.bf16.mxu1 %v8085_v31  ;;  %v8175_v30 = vld [vmem:[#allocation8 + $0xec4] ss:$16 sps:$4 sm:$0xff]   ;;  %v8178_v31 = vld [vmem:[#allocation8 + $0xecc] ss:$16 sps:$4 sm:$0xff]  }
 0x322   :  { %4492 = vmatprep.subr.bf16.mxu0 %v8088_v32  ;;  %v8173_v32 = vld [vmem:[#allocation8 + $0xec0] ss:$16 sps:$4 sm:$0xff]  }
 0x324   :  { %4165 = vmatpush1.bf16.msra.mxu1 %v8083_v33  ;;  %v8176_v33 = vld [vmem:[#allocation8 + $0xec8] ss:$16 sps:$4 sm:$0xff]  }
 0x325   :  { %4493 = vmatpush1.bf16.msra.mxu0 %v8086_v34  ;;  %4166 = vmatprep.subr.bf16.mxu1 %v8091_v35  ;;  %v8181_v34 = vld [vmem:[#allocation8 + $0xee4] ss:$16 sps:$4 sm:$0xff]   ;;  %v8184_v35 = vld [vmem:[#allocation8 + $0xeec] ss:$16 sps:$4 sm:$0xff]  }
 0x326   :  { %4494 = vmatprep.subr.bf16.mxu0 %v8094_v36  ;;  %v8179_v36 = vld [vmem:[#allocation8 + $0xee0] ss:$16 sps:$4 sm:$0xff]  }
 0x328   :  { %4167 = vmatpush1.bf16.msra.mxu1 %v8089_v37  ;;  %v8182_v37 = vld [vmem:[#allocation8 + $0xee8] ss:$16 sps:$4 sm:$0xff]  }
 0x329   :  { %4495 = vmatpush1.bf16.msra.mxu0 %v8092_v38  ;;  %4168 = vmatprep.subr.bf16.mxu1 %v8097_v39  ;;  %v8187_v38 = vld [vmem:[#allocation8 + $0xf04] ss:$16 sps:$4 sm:$0xff]   ;;  %v8190_v39 = vld [vmem:[#allocation8 + $0xf0c] ss:$16 sps:$4 sm:$0xff]  }
 0x32a   :  { %4496 = vmatprep.subr.bf16.mxu0 %v8100_v40  ;;  %v8185_v40 = vld [vmem:[#allocation8 + $0xf00] ss:$16 sps:$4 sm:$0xff]  }
 0x32c   :  { %4169 = vmatpush1.bf16.msra.mxu1 %v8095_v42  ;;  %v8188_v42 = vld [vmem:[#allocation8 + $0xf08] ss:$16 sps:$4 sm:$0xff]  }
 0x32d   :  { %4497 = vmatpush1.bf16.msra.mxu0 %v8098_v43  ;;  %4170 = vmatprep.subr.bf16.mxu1 %v8103_v44  ;;  %v8193_v43 = vld [vmem:[#allocation8 + $0xf24] ss:$16 sps:$4 sm:$0xff]   ;;  %v8196_v44 = vld [vmem:[#allocation8 + $0xf2c] ss:$16 sps:$4 sm:$0xff]  }
 0x32e   :  { %4498 = vmatprep.subr.bf16.mxu0 %v8106_v45  ;;  %v8191_v45 = vld [vmem:[#allocation8 + $0xf20] ss:$16 sps:$4 sm:$0xff]  }
 0x330   :  { %4171 = vmatpush1.bf16.msra.mxu1 %v8101_v46  ;;  %v8194_v46 = vld [vmem:[#allocation8 + $0xf28] ss:$16 sps:$4 sm:$0xff]  }
 0x331   :  { %4499 = vmatpush1.bf16.msra.mxu0 %v8104_v47  ;;  %4172 = vmatprep.subr.bf16.mxu1 %v8109_v48  ;;  %v8199_v47 = vld [vmem:[#allocation8 + $0xf44] ss:$16 sps:$4 sm:$0xff]   ;;  %v8202_v48 = vld [vmem:[#allocation8 + $0xf4c] ss:$16 sps:$4 sm:$0xff]  }
 0x332   :  { %4500 = vmatprep.subr.bf16.mxu0 %v8112_v49  ;;  %v8197_v49 = vld [vmem:[#allocation8 + $0xf40] ss:$16 sps:$4 sm:$0xff]  }
 0x334   :  { %4173 = vmatpush1.bf16.msra.mxu1 %v8107_v50  ;;  %v8200_v50 = vld [vmem:[#allocation8 + $0xf48] ss:$16 sps:$4 sm:$0xff]  }
 0x335   :  { %4501 = vmatpush1.bf16.msra.mxu0 %v8110_v51  ;;  %4174 = vmatprep.subr.bf16.mxu1 %v8115_v52  ;;  %v8205_v51 = vld [vmem:[#allocation8 + $0xf64] ss:$16 sps:$4 sm:$0xff]   ;;  %v8208_v52 = vld [vmem:[#allocation8 + $0xf6c] ss:$16 sps:$4 sm:$0xff]  }
 0x336   :  { %4502 = vmatprep.subr.bf16.mxu0 %v8118_v53  ;;  %v8203_v53 = vld [vmem:[#allocation8 + $0xf60] ss:$16 sps:$4 sm:$0xff]  }
 0x338   :  { %4175 = vmatpush1.bf16.msra.mxu1 %v8113_v54  ;;  %v8206_v54 = vld [vmem:[#allocation8 + $0xf68] ss:$16 sps:$4 sm:$0xff]  }
 0x339   :  { %4503 = vmatpush1.bf16.msra.mxu0 %v8116_v55  ;;  %4176 = vmatprep.subr.bf16.mxu1 %v8121_v56  ;;  %v8211_v55 = vld [vmem:[#allocation8 + $0xf84] ss:$16 sps:$4 sm:$0xff]   ;;  %v8214_v56 = vld [vmem:[#allocation8 + $0xf8c] ss:$16 sps:$4 sm:$0xff]  }
 0x33a   :  { %4504 = vmatprep.subr.bf16.mxu0 %v8124_v57  ;;  %v8209_v57 = vld [vmem:[#allocation8 + $0xf80] ss:$16 sps:$4 sm:$0xff]  }
 0x33c   :  { %4177 = vmatpush1.bf16.msra.mxu1 %v8119_v58  ;;  %v8212_v58 = vld [vmem:[#allocation8 + $0xf88] ss:$16 sps:$4 sm:$0xff]  }
 0x33d   :  { %4505 = vmatpush1.bf16.msra.mxu0 %v8122_v59  ;;  %4178 = vmatprep.subr.bf16.mxu1 %v8127_v61  ;;  %v8217_v59 = vld [vmem:[#allocation8 + $0xfa4] ss:$16 sps:$4 sm:$0xff]   ;;  %v8220_v61 = vld [vmem:[#allocation8 + $0xfac] ss:$16 sps:$4 sm:$0xff]  }
 0x33e   :  { %4506 = vmatprep.subr.bf16.mxu0 %v8130_v62  ;;  %v8215_v62 = vld [vmem:[#allocation8 + $0xfa0] ss:$16 sps:$4 sm:$0xff]  }
 0x340   :  { %4179 = vmatpush1.bf16.msra.mxu1 %v8125_v63  ;;  %v8218_v63 = vld [vmem:[#allocation8 + $0xfa8] ss:$16 sps:$4 sm:$0xff]  }
 0x341   :  { %4507 = vmatpush1.bf16.msra.mxu0 %v8128_v0  ;;  %4180 = vmatprep.subr.bf16.mxu1 %v8133_v1  ;;  %v8223_v0 = vld [vmem:[#allocation8 + $0xfc4] ss:$16 sps:$4 sm:$0xff]   ;;  %v8226_v1 = vld [vmem:[#allocation8 + $0xfcc] ss:$16 sps:$4 sm:$0xff]  }
 0x342   :  { %4508 = vmatprep.subr.bf16.mxu0 %v8136_v2  ;;  %v8221_v2 = vld [vmem:[#allocation8 + $0xfc0] ss:$16 sps:$4 sm:$0xff]  }
 0x344   :  { %4181 = vmatpush1.bf16.msra.mxu1 %v8131_v3  ;;  %v8224_v3 = vld [vmem:[#allocation8 + $0xfc8] ss:$16 sps:$4 sm:$0xff]  }
 0x345   :  { %4509 = vmatpush1.bf16.msra.mxu0 %v8134_v4  ;;  %4191 = vmatprep.subr.bf16.mxu1 %v8139_v5  ;;  %v8229_v4 = vld [vmem:[#allocation8 + $0xfe4] ss:$16 sps:$4 sm:$0xff]   ;;  %v8232_v5 = vld [vmem:[#allocation8 + $0xfec] ss:$16 sps:$4 sm:$0xff]  }
 0x346   :  { %4519 = vmatprep.subr.bf16.mxu0 %v8142_v6  ;;  %v8227_v6 = vld [vmem:[#allocation8 + $0xfe0] ss:$16 sps:$4 sm:$0xff]  }
 0x347   :  { %4183 = vmatmul.mubr.bf16.vlgmr.msra.gmra.mrb[8].mxu1 %v802_v8 }
 0x348   :  { %4511 = vmatmul.mubr.bf16.vlgmr.msra.gmra.mrb[16].mxu0 %v802_v8  ;;  %4192 = vmatpush1.bf16.msra.mxu1 %v8137_v7  ;;  %v8230_v7 = vld [vmem:[#allocation8 + $0xfe8] ss:$16 sps:$4 sm:$0xff]   ;;  %v8235_v8 = vld [vmem:[%s9837_s5 + $0x4] ss:$16 sps:$4 sm:$0xff]  }
 0x349   :  { %4223 = vmatprep.mubr.bf16.mxu1 %v808_v10  ;;  %4520 = vmatpush1.bf16.msra.mxu0 %v8140_v41  ;;  %v8238_v41 = vld [vmem:[%s9837_s5 + $0xc] ss:$16 sps:$4 sm:$0xff]  }
 0x34a   :  { %4551 = vmatprep.mubr.bf16.mxu0 %v808_v10  ;;  %4193 = vmatprep.subr.bf16.mxu1 %v8145_v9  ;;  %v8233_v9 = vld [vmem:[%s9837_s5] ss:$16 sps:$4 sm:$0xff]   ;;  %v806_v10 = vrot.slane %v9179_v60, 6 }
 0x34b   :  { %4521 = vmatprep.subr.bf16.mxu0 %v8148_v11  ;;  %v8236_v11 = vld [vmem:[%s9837_s5 + $0x8] ss:$16 sps:$4 sm:$0xff]   ;;  %v8239_v60 = vld [vmem:[%s9837_s5 + $0x20] ss:$16 sps:$4 sm:$0xff]  }
 0x34c   :  { %4194 = vmatpush1.bf16.msra.mxu1 %v8143_v12  ;;  %v8241_v12 = vld [vmem:[%s9837_s5 + $0x24] ss:$16 sps:$4 sm:$0xff]  }
 0x34d   :  { %4522 = vmatpush1.bf16.msra.mxu0 %v8146_v13  ;;  %4195 = vmatprep.subr.bf16.mxu1 %v8151_v14  ;;  %v8244_v13 = vld [vmem:[%s9837_s5 + $0x2c] ss:$16 sps:$4 sm:$0xff]   ;;  %v8242_v14 = vld [vmem:[%s9837_s5 + $0x28] ss:$16 sps:$4 sm:$0xff]  }
 0x34e   :  { %4523 = vmatprep.subr.bf16.mxu0 %v8154_v15  ;;  %v8247_v15 = vld [vmem:[%s9837_s5 + $0x44] ss:$16 sps:$4 sm:$0xff]  }
 0x350   :  { %4196 = vmatpush1.bf16.msra.mxu1 %v8149_v16  ;;  %v8250_v16 = vld [vmem:[%s9837_s5 + $0x4c] ss:$16 sps:$4 sm:$0xff]  }
 0x351   :  { %4524 = vmatpush1.bf16.msra.mxu0 %v8152_v17  ;;  %4197 = vmatprep.subr.bf16.mxu1 %v8157_v18  ;;  %v8245_v17 = vld [vmem:[%s9837_s5 + $0x40] ss:$16 sps:$4 sm:$0xff]   ;;  %v8248_v18 = vld [vmem:[%s9837_s5 + $0x48] ss:$16 sps:$4 sm:$0xff]  }
 0x352   :  { %4525 = vmatprep.subr.bf16.mxu0 %v8160_v19  ;;  %v8253_v19 = vld [vmem:[%s9837_s5 + $0x64] ss:$16 sps:$4 sm:$0xff]  }
 0x354   :  { %4198 = vmatpush1.bf16.msra.mxu1 %v8155_v20  ;;  %v8256_v20 = vld [vmem:[%s9837_s5 + $0x6c] ss:$16 sps:$4 sm:$0xff]  }
 0x355   :  { %4526 = vmatpush1.bf16.msra.mxu0 %v8158_v21  ;;  %4199 = vmatprep.subr.bf16.mxu1 %v8163_v22  ;;  %v8251_v21 = vld [vmem:[%s9837_s5 + $0x60] ss:$16 sps:$4 sm:$0xff]   ;;  %v8254_v22 = vld [vmem:[%s9837_s5 + $0x68] ss:$16 sps:$4 sm:$0xff]  }
 0x356   :  { %4527 = vmatprep.subr.bf16.mxu0 %v8166_v23  ;;  %v8259_v23 = vld [vmem:[%s9837_s5 + $0x84] ss:$16 sps:$4 sm:$0xff]  }
 0x358   :  { %4200 = vmatpush1.bf16.msra.mxu1 %v8161_v24  ;;  %v8262_v24 = vld [vmem:[%s9837_s5 + $0x8c] ss:$16 sps:$4 sm:$0xff]  }
 0x359   :  { %4528 = vmatpush1.bf16.msra.mxu0 %v8164_v25  ;;  %4201 = vmatprep.subr.bf16.mxu1 %v8169_v26  ;;  %v8257_v25 = vld [vmem:[%s9837_s5 + $0x80] ss:$16 sps:$4 sm:$0xff]   ;;  %v8260_v26 = vld [vmem:[%s9837_s5 + $0x88] ss:$16 sps:$4 sm:$0xff]  }
 0x35a   :  { %4529 = vmatprep.subr.bf16.mxu0 %v8172_v27  ;;  %v8265_v27 = vld [vmem:[%s9837_s5 + $0xa4] ss:$16 sps:$4 sm:$0xff]  }
 0x35c   :  { %4202 = vmatpush1.bf16.msra.mxu1 %v8167_v28  ;;  %v8268_v28 = vld [vmem:[%s9837_s5 + $0xac] ss:$16 sps:$4 sm:$0xff]  }
 0x35d   :  { %4530 = vmatpush1.bf16.msra.mxu0 %v8170_v29  ;;  %4203 = vmatprep.subr.bf16.mxu1 %v8175_v30  ;;  %v8263_v29 = vld [vmem:[%s9837_s5 + $0xa0] ss:$16 sps:$4 sm:$0xff]   ;;  %v8266_v30 = vld [vmem:[%s9837_s5 + $0xa8] ss:$16 sps:$4 sm:$0xff]  }
 0x35e   :  { %4531 = vmatprep.subr.bf16.mxu0 %v8178_v31  ;;  %v8271_v31 = vld [vmem:[%s9837_s5 + $0xc4] ss:$16 sps:$4 sm:$0xff]  }
 0x360   :  { %4204 = vmatpush1.bf16.msra.mxu1 %v8173_v32  ;;  %v8274_v32 = vld [vmem:[%s9837_s5 + $0xcc] ss:$16 sps:$4 sm:$0xff]  }
 0x361   :  { %4532 = vmatpush1.bf16.msra.mxu0 %v8176_v33  ;;  %4205 = vmatprep.subr.bf16.mxu1 %v8181_v34  ;;  %v8269_v33 = vld [vmem:[%s9837_s5 + $0xc0] ss:$16 sps:$4 sm:$0xff]   ;;  %v8272_v34 = vld [vmem:[%s9837_s5 + $0xc8] ss:$16 sps:$4 sm:$0xff]  }
 0x362   :  { %4533 = vmatprep.subr.bf16.mxu0 %v8184_v35  ;;  %v8277_v35 = vld [vmem:[%s9837_s5 + $0xe4] ss:$16 sps:$4 sm:$0xff]  }
 0x364   :  { %4206 = vmatpush1.bf16.msra.mxu1 %v8179_v36  ;;  %v8280_v36 = vld [vmem:[%s9837_s5 + $0xec] ss:$16 sps:$4 sm:$0xff]  }
 0x365   :  { %4534 = vmatpush1.bf16.msra.mxu0 %v8182_v37  ;;  %4207 = vmatprep.subr.bf16.mxu1 %v8187_v38  ;;  %v8275_v37 = vld [vmem:[%s9837_s5 + $0xe0] ss:$16 sps:$4 sm:$0xff]   ;;  %v8278_v38 = vld [vmem:[%s9837_s5 + $0xe8] ss:$16 sps:$4 sm:$0xff]  }
 0x366   :  { %4535 = vmatprep.subr.bf16.mxu0 %v8190_v39  ;;  %v8283_v39 = vld [vmem:[%s9837_s5 + $0x104] ss:$16 sps:$4 sm:$0xff]  }
 0x368   :  { %4208 = vmatpush1.bf16.msra.mxu1 %v8185_v40  ;;  %v8286_v40 = vld [vmem:[%s9837_s5 + $0x10c] ss:$16 sps:$4 sm:$0xff]  }
 0x369   :  { %4536 = vmatpush1.bf16.msra.mxu0 %v8188_v42  ;;  %4209 = vmatprep.subr.bf16.mxu1 %v8193_v43  ;;  %v8281_v42 = vld [vmem:[%s9837_s5 + $0x100] ss:$16 sps:$4 sm:$0xff]   ;;  %v8284_v43 = vld [vmem:[%s9837_s5 + $0x108] ss:$16 sps:$4 sm:$0xff]  }
 0x36a   :  { %4537 = vmatprep.subr.bf16.mxu0 %v8196_v44  ;;  %v8289_v44 = vld [vmem:[%s9837_s5 + $0x124] ss:$16 sps:$4 sm:$0xff]  }
 0x36c   :  { %4210 = vmatpush1.bf16.msra.mxu1 %v8191_v45  ;;  %v8292_v45 = vld [vmem:[%s9837_s5 + $0x12c] ss:$16 sps:$4 sm:$0xff]  }
 0x36d   :  { %4538 = vmatpush1.bf16.msra.mxu0 %v8194_v46  ;;  %4211 = vmatprep.subr.bf16.mxu1 %v8199_v47  ;;  %v8287_v46 = vld [vmem:[%s9837_s5 + $0x120] ss:$16 sps:$4 sm:$0xff]   ;;  %v8290_v47 = vld [vmem:[%s9837_s5 + $0x128] ss:$16 sps:$4 sm:$0xff]  }
 0x36e   :  { %4539 = vmatprep.subr.bf16.mxu0 %v8202_v48  ;;  %v8295_v48 = vld [vmem:[%s9837_s5 + $0x144] ss:$16 sps:$4 sm:$0xff]  }
 0x370   :  { %4212 = vmatpush1.bf16.msra.mxu1 %v8197_v49  ;;  %v8298_v49 = vld [vmem:[%s9837_s5 + $0x14c] ss:$16 sps:$4 sm:$0xff]  }
 0x371   :  { %4540 = vmatpush1.bf16.msra.mxu0 %v8200_v50  ;;  %4213 = vmatprep.subr.bf16.mxu1 %v8205_v51  ;;  %v8293_v50 = vld [vmem:[%s9837_s5 + $0x140] ss:$16 sps:$4 sm:$0xff]   ;;  %v8296_v51 = vld [vmem:[%s9837_s5 + $0x148] ss:$16 sps:$4 sm:$0xff]  }
 0x372   :  { %4541 = vmatprep.subr.bf16.mxu0 %v8208_v52  ;;  %v8301_v52 = vld [vmem:[%s9837_s5 + $0x164] ss:$16 sps:$4 sm:$0xff]  }
 0x374   :  { %4214 = vmatpush1.bf16.msra.mxu1 %v8203_v53  ;;  %v8304_v53 = vld [vmem:[%s9837_s5 + $0x16c] ss:$16 sps:$4 sm:$0xff]  }
 0x375   :  { %4542 = vmatpush1.bf16.msra.mxu0 %v8206_v54  ;;  %4215 = vmatprep.subr.bf16.mxu1 %v8211_v55  ;;  %v8299_v54 = vld [vmem:[%s9837_s5 + $0x160] ss:$16 sps:$4 sm:$0xff]   ;;  %v8302_v55 = vld [vmem:[%s9837_s5 + $0x168] ss:$16 sps:$4 sm:$0xff]  }
 0x376   :  { %4543 = vmatprep.subr.bf16.mxu0 %v8214_v56  ;;  %v8307_v56 = vld [vmem:[%s9837_s5 + $0x184] ss:$16 sps:$4 sm:$0xff]  }
 0x378   :  { %4216 = vmatpush1.bf16.msra.mxu1 %v8209_v57  ;;  %v8310_v57 = vld [vmem:[%s9837_s5 + $0x18c] ss:$16 sps:$4 sm:$0xff]  }
 0x379   :  { %4544 = vmatpush1.bf16.msra.mxu0 %v8212_v58  ;;  %4217 = vmatprep.subr.bf16.mxu1 %v8217_v59  ;;  %v8305_v58 = vld [vmem:[%s9837_s5 + $0x180] ss:$16 sps:$4 sm:$0xff]   ;;  %v8308_v59 = vld [vmem:[%s9837_s5 + $0x188] ss:$16 sps:$4 sm:$0xff]  }
 0x37a   :  { %4545 = vmatprep.subr.bf16.mxu0 %v8220_v61  ;;  %v8313_v61 = vld [vmem:[%s9837_s5 + $0x1a4] ss:$16 sps:$4 sm:$0xff]  }
 0x37c   :  { %4218 = vmatpush1.bf16.msra.mxu1 %v8215_v62  ;;  %v8316_v62 = vld [vmem:[%s9837_s5 + $0x1ac] ss:$16 sps:$4 sm:$0xff]  }
 0x37d   :  { %4546 = vmatpush1.bf16.msra.mxu0 %v8218_v63  ;;  %4219 = vmatprep.subr.bf16.mxu1 %v8223_v0  ;;  %v8311_v63 = vld [vmem:[%s9837_s5 + $0x1a0] ss:$16 sps:$4 sm:$0xff]   ;;  %v8314_v0 = vld [vmem:[%s9837_s5 + $0x1a8] ss:$16 sps:$4 sm:$0xff]  }
 0x37e   :  { %4547 = vmatprep.subr.bf16.mxu0 %v8226_v1  ;;  %v8319_v1 = vld [vmem:[%s9837_s5 + $0x1c4] ss:$16 sps:$4 sm:$0xff]  }
 0x380   :  { %4220 = vmatpush1.bf16.msra.mxu1 %v8221_v2  ;;  %v8322_v2 = vld [vmem:[%s9837_s5 + $0x1cc] ss:$16 sps:$4 sm:$0xff]  }
 0x381   :  { %4548 = vmatpush1.bf16.msra.mxu0 %v8224_v3  ;;  %4221 = vmatprep.subr.bf16.mxu1 %v8229_v4  ;;  %v8317_v3 = vld [vmem:[%s9837_s5 + $0x1c0] ss:$16 sps:$4 sm:$0xff]   ;;  %v8320_v4 = vld [vmem:[%s9837_s5 + $0x1c8] ss:$16 sps:$4 sm:$0xff]  }
 0x382   :  { %4549 = vmatprep.subr.bf16.mxu0 %v8232_v5  ;;  %v8325_v5 = vld [vmem:[%s9837_s5 + $0x1e4] ss:$16 sps:$4 sm:$0xff]  }
 0x384   :  { %4222 = vmatpush1.bf16.msra.mxu1 %v8227_v6  ;;  %v8328_v6 = vld [vmem:[%s9837_s5 + $0x1ec] ss:$16 sps:$4 sm:$0xff]  }
 0x385   :  { %4550 = vmatpush1.bf16.msra.mxu0 %v8230_v7  ;;  %5354 = vmatprep.subr.bf16.mxu1 %v8235_v8  ;;  %v8323_v7 = vld [vmem:[%s9837_s5 + $0x1e0] ss:$16 sps:$4 sm:$0xff]   ;;  %v8326_v8 = vld [vmem:[%s9837_s5 + $0x1e8] ss:$16 sps:$4 sm:$0xff]  }
 0x386   :  { %5436 = vmatprep.subr.bf16.mxu0 %v8238_v41  ;;  %v8331_v41 = vld [vmem:[%s9837_s5 + $0x204] ss:$16 sps:$4 sm:$0xff]  }
 0x387   :  { %4224 = vmatmul.mubr.bf16.vlgmr.msra.gmra.mrb[8].mxu1 %v806_v10 }
 0x388   :  { %4552 = vmatmul.mubr.bf16.vlgmr.msra.gmra.mrb[16].mxu0 %v806_v10  ;;  %5355 = vmatpush1.bf16.msra.mxu1 %v8233_v9  ;;  %v8334_v9 = vld [vmem:[%s9837_s5 + $0x20c] ss:$16 sps:$4 sm:$0xff]   ;;  %v1324_v10 = vlaneseq }
 0x389   :  { %5437 = vmatpush1.bf16.msra.mxu0 %v8236_v11  ;;  %5356 = vmatprep.subr.bf16.mxu1 %v8241_v12 }
 0x38a   :  { %5438 = vmatprep.subr.bf16.mxu0 %v8244_v13  ;;  %v9393_v11 = vshrl.u32 %v1324_v10, 7  ;;  %v9396_v13 = vld [vmem:[#allocation10] sm:$0xf]  ;;  %v8392_v10 = vld [vmem:[%s9837_s5 + $0x348] ss:$16 sps:$4 sm:$0xff]  }
 0x38c   :  { %5357 = vmatpush1.bf16.msra.mxu1 %v8239_v60  ;;  %v1326_v12 = vsub.s32 0, %v9393_v11  ;;  %v1330_v60 = vsub.s32 1, %v9393_v11 }
 0x38d   :  { %5439 = vmatpush1.bf16.msra.mxu0 %v8242_v14  ;;  %5358 = vmatprep.subr.bf16.mxu1 %v8247_v15  ;;  %v1338_v14 = vsub.s32 3, %v9393_v11 }
 0x38e   :  { %5440 = vmatprep.subr.bf16.mxu0 %v8250_v16  ;;  %v1327_v15 = vrot.slane %v9396_v13, %v1326_v12  ;;  %v1331_v16 = vrot.slane %v9396_v13, %v1330_v60 }
 0x390   :  { %5359 = vmatpush1.bf16.msra.mxu1 %v8245_v17  ;;  %v1339_v17 = vrot.slane %v9396_v13, %v1338_v14 }
 0x391   :  { %5441 = vmatpush1.bf16.msra.mxu0 %v8248_v18  ;;  %5360 = vmatprep.subr.bf16.mxu1 %v8253_v19 }
 0x392   :  { %5442 = vmatprep.subr.bf16.mxu0 %v8256_v20 }
 0x394   :  { %5361 = vmatpush1.bf16.msra.mxu1 %v8251_v21 }
 0x395   :  { %5443 = vmatpush1.bf16.msra.mxu0 %v8254_v22  ;;  %5362 = vmatprep.subr.bf16.mxu1 %v8259_v23 }
 0x396   :  { %5444 = vmatprep.subr.bf16.mxu0 %v8262_v24 }
 0x398   :  { %5363 = vmatpush1.bf16.msra.mxu1 %v8257_v25 }
 0x399   :  { %5445 = vmatpush1.bf16.msra.mxu0 %v8260_v26  ;;  %5364 = vmatprep.subr.bf16.mxu1 %v8265_v27 }
 0x39a   :  { %5446 = vmatprep.subr.bf16.mxu0 %v8268_v28 }
 0x39c   :  { %5365 = vmatpush1.bf16.msra.mxu1 %v8263_v29 }
 0x39d   :  { %5447 = vmatpush1.bf16.msra.mxu0 %v8266_v30  ;;  %5366 = vmatprep.subr.bf16.mxu1 %v8271_v31  ;;  %v8329_v30 = vld [vmem:[%s9837_s5 + $0x200] ss:$16 sps:$4 sm:$0xff]   ;;  %v8332_v31 = vld [vmem:[%s9837_s5 + $0x208] ss:$16 sps:$4 sm:$0xff]  }
 0x39e   :  { %5448 = vmatprep.subr.bf16.mxu0 %v8274_v32 }
 0x3a0   :  { %5367 = vmatpush1.bf16.msra.mxu1 %v8269_v33  ;;  %v8337_v33 = vld [vmem:[%s9837_s5 + $0x224] ss:$16 sps:$4 sm:$0xff]  }
 0x3a1   :  { %5449 = vmatpush1.bf16.msra.mxu0 %v8272_v34  ;;  %5368 = vmatprep.subr.bf16.mxu1 %v8277_v35  ;;  %v8340_v34 = vld [vmem:[%s9837_s5 + $0x22c] ss:$16 sps:$4 sm:$0xff]  }
 0x3a2   :  { %5450 = vmatprep.subr.bf16.mxu0 %v8280_v36  ;;  %v8335_v36 = vld [vmem:[%s9837_s5 + $0x220] ss:$16 sps:$4 sm:$0xff]  }
 0x3a4   :  { %5369 = vmatpush1.bf16.msra.mxu1 %v8275_v37  ;;  %v8338_v37 = vld [vmem:[%s9837_s5 + $0x228] ss:$16 sps:$4 sm:$0xff]  }
 0x3a5   :  { %5451 = vmatpush1.bf16.msra.mxu0 %v8278_v38  ;;  %5370 = vmatprep.subr.bf16.mxu1 %v8283_v39  ;;  %v8343_v38 = vld [vmem:[%s9837_s5 + $0x244] ss:$16 sps:$4 sm:$0xff]   ;;  %v8346_v39 = vld [vmem:[%s9837_s5 + $0x24c] ss:$16 sps:$4 sm:$0xff]  }
 0x3a6   :  { %5452 = vmatprep.subr.bf16.mxu0 %v8286_v40  ;;  %v8341_v40 = vld [vmem:[%s9837_s5 + $0x240] ss:$16 sps:$4 sm:$0xff]  }
 0x3a8   :  { %5371 = vmatpush1.bf16.msra.mxu1 %v8281_v42  ;;  %v8344_v42 = vld [vmem:[%s9837_s5 + $0x248] ss:$16 sps:$4 sm:$0xff]  }
 0x3a9   :  { %5453 = vmatpush1.bf16.msra.mxu0 %v8284_v43  ;;  %5372 = vmatprep.subr.bf16.mxu1 %v8289_v44  ;;  %v8349_v43 = vld [vmem:[%s9837_s5 + $0x264] ss:$16 sps:$4 sm:$0xff]   ;;  %v8352_v44 = vld [vmem:[%s9837_s5 + $0x26c] ss:$16 sps:$4 sm:$0xff]  }
 0x3aa   :  { %5454 = vmatprep.subr.bf16.mxu0 %v8292_v45  ;;  %v8347_v45 = vld [vmem:[%s9837_s5 + $0x260] ss:$16 sps:$4 sm:$0xff]  }
 0x3ac   :  { %5373 = vmatpush1.bf16.msra.mxu1 %v8287_v46  ;;  %v8350_v46 = vld [vmem:[%s9837_s5 + $0x268] ss:$16 sps:$4 sm:$0xff]  }
 0x3ad   :  { %5455 = vmatpush1.bf16.msra.mxu0 %v8290_v47  ;;  %5374 = vmatprep.subr.bf16.mxu1 %v8295_v48  ;;  %v8355_v47 = vld [vmem:[%s9837_s5 + $0x284] ss:$16 sps:$4 sm:$0xff]   ;;  %v8358_v48 = vld [vmem:[%s9837_s5 + $0x28c] ss:$16 sps:$4 sm:$0xff]  }
 0x3ae   :  { %5456 = vmatprep.subr.bf16.mxu0 %v8298_v49  ;;  %v8353_v49 = vld [vmem:[%s9837_s5 + $0x280] ss:$16 sps:$4 sm:$0xff]  }
 0x3b0   :  { %5375 = vmatpush1.bf16.msra.mxu1 %v8293_v50  ;;  %v8356_v50 = vld [vmem:[%s9837_s5 + $0x288] ss:$16 sps:$4 sm:$0xff]  }
 0x3b1   :  { %5457 = vmatpush1.bf16.msra.mxu0 %v8296_v51  ;;  %5376 = vmatprep.subr.bf16.mxu1 %v8301_v52  ;;  %v8361_v51 = vld [vmem:[%s9837_s5 + $0x2a4] ss:$16 sps:$4 sm:$0xff]   ;;  %v8364_v52 = vld [vmem:[%s9837_s5 + $0x2ac] ss:$16 sps:$4 sm:$0xff]  }
 0x3b2   :  { %5458 = vmatprep.subr.bf16.mxu0 %v8304_v53  ;;  %v8359_v53 = vld [vmem:[%s9837_s5 + $0x2a0] ss:$16 sps:$4 sm:$0xff]  }
 0x3b4   :  { %5377 = vmatpush1.bf16.msra.mxu1 %v8299_v54  ;;  %v8362_v54 = vld [vmem:[%s9837_s5 + $0x2a8] ss:$16 sps:$4 sm:$0xff]  }
 0x3b5   :  { %5459 = vmatpush1.bf16.msra.mxu0 %v8302_v55  ;;  %5378 = vmatprep.subr.bf16.mxu1 %v8307_v56  ;;  %v8367_v55 = vld [vmem:[%s9837_s5 + $0x2c4] ss:$16 sps:$4 sm:$0xff]   ;;  %v8370_v56 = vld [vmem:[%s9837_s5 + $0x2cc] ss:$16 sps:$4 sm:$0xff]  }
 0x3b6   :  { %5460 = vmatprep.subr.bf16.mxu0 %v8310_v57  ;;  %v8365_v57 = vld [vmem:[%s9837_s5 + $0x2c0] ss:$16 sps:$4 sm:$0xff]  }
 0x3b8   :  { %5379 = vmatpush1.bf16.msra.mxu1 %v8305_v58  ;;  %v8368_v58 = vld [vmem:[%s9837_s5 + $0x2c8] ss:$16 sps:$4 sm:$0xff]  }
 0x3b9   :  { %5461 = vmatpush1.bf16.msra.mxu0 %v8308_v59  ;;  %5380 = vmatprep.subr.bf16.mxu1 %v8313_v61  ;;  %v8373_v59 = vld [vmem:[%s9837_s5 + $0x2e4] ss:$16 sps:$4 sm:$0xff]   ;;  %v8376_v61 = vld [vmem:[%s9837_s5 + $0x2ec] ss:$16 sps:$4 sm:$0xff]  }
 0x3ba   :  { %5462 = vmatprep.subr.bf16.mxu0 %v8316_v62  ;;  %v8371_v62 = vld [vmem:[%s9837_s5 + $0x2e0] ss:$16 sps:$4 sm:$0xff]  }
 0x3bc   :  { %5381 = vmatpush1.bf16.msra.mxu1 %v8311_v63  ;;  %v8374_v63 = vld [vmem:[%s9837_s5 + $0x2e8] ss:$16 sps:$4 sm:$0xff]  }
 0x3bd   :  { %5463 = vmatpush1.bf16.msra.mxu0 %v8314_v0  ;;  %5382 = vmatprep.subr.bf16.mxu1 %v8319_v1  ;;  %v8379_v0 = vld [vmem:[%s9837_s5 + $0x304] ss:$16 sps:$4 sm:$0xff]   ;;  %v8382_v1 = vld [vmem:[%s9837_s5 + $0x30c] ss:$16 sps:$4 sm:$0xff]  }
 0x3be   :  { %5464 = vmatprep.subr.bf16.mxu0 %v8322_v2  ;;  %v8377_v2 = vld [vmem:[%s9837_s5 + $0x300] ss:$16 sps:$4 sm:$0xff]  }
 0x3c0   :  { %5383 = vmatpush1.bf16.msra.mxu1 %v8317_v3  ;;  %v8380_v3 = vld [vmem:[%s9837_s5 + $0x308] ss:$16 sps:$4 sm:$0xff]  }
 0x3c1   :  { %5465 = vmatpush1.bf16.msra.mxu0 %v8320_v4  ;;  %5384 = vmatprep.subr.bf16.mxu1 %v8325_v5  ;;  %v8385_v4 = vld [vmem:[%s9837_s5 + $0x324] ss:$16 sps:$4 sm:$0xff]   ;;  %v8388_v5 = vld [vmem:[%s9837_s5 + $0x32c] ss:$16 sps:$4 sm:$0xff]  }
 0x3c2   :  { %5466 = vmatprep.subr.bf16.mxu0 %v8328_v6  ;;  %v8383_v6 = vld [vmem:[%s9837_s5 + $0x320] ss:$16 sps:$4 sm:$0xff]  }
 0x3c4   :  { %5385 = vmatpush1.bf16.msra.mxu1 %v8323_v7  ;;  %v8386_v7 = vld [vmem:[%s9837_s5 + $0x328] ss:$16 sps:$4 sm:$0xff]  }
 0x3c5   :  { %5467 = vmatpush1.bf16.msra.mxu0 %v8326_v8  ;;  %5395 = vmatprep.subr.bf16.mxu1 %v8331_v41  ;;  %v8391_v8 = vld [vmem:[%s9837_s5 + $0x344] ss:$16 sps:$4 sm:$0xff]   ;;  %v8394_v41 = vld [vmem:[%s9837_s5 + $0x34c] ss:$16 sps:$4 sm:$0xff]  }
 0x3c6   :  { %5477 = vmatprep.subr.bf16.mxu0 %v8334_v9  ;;  %v8389_v9 = vld [vmem:[%s9837_s5 + $0x340] ss:$16 sps:$4 sm:$0xff]  }
 0x45a   :  { %v4225_v18 = vpop.f32.mrb[8].mxu1 }
 0x45b   :  { %v7302_v19 = vadd.f32 %v4225_v18, %v1327_v15  ;;  %v9409_v20 = vpop.f32.mrb[16].mxu0  ;;  %v4227_v21 = vpop.f32.mrb[9].mxu1  ;;  %v8397_v15 = vld [vmem:[%s9837_s5 + $0x364] ss:$16 sps:$4 sm:$0xff]   ;;  %v8398_v18 = vld [vmem:[%s9837_s5 + $0x368] ss:$16 sps:$4 sm:$0xff]  }
 0x45c   :  { %v7303_v22 = vadd.f32 %v4227_v21, %v1331_v16  ;;  %v4555_v23 = vpop.f32.mrb[17].mxu0  ;;  %v4229_v24 = vpop.f32.mrb[10].mxu1  ;;  %v8400_v16 = vld [vmem:[%s9837_s5 + $0x36c] ss:$16 sps:$4 sm:$0xff]  }
 0x45d   :  { %v7305_v25 = vadd.f32 %v4555_v23, %v1339_v17  ;;  %v4557_v26 = vpop.f32.mrb[18].mxu0  ;;  %v4230_v27 = vpop.f32.mrb[11].mxu1  ;;  %v4560_v32 = vpack.c.bf16 %v7302_v19, %v7302_v19  ;;  %v8395_v17 = vld [vmem:[%s9837_s5 + $0x360] ss:$16 sps:$4 sm:$0xff]   ;;  %v8403_v19 = vld [vmem:[%s9837_s5 + $0x384] ss:$16 sps:$4 sm:$0xff]  }
 0x45e   :  { %v4561_v28 = vpack.c.bf16 %v7303_v22, %v7303_v22  ;;  %v4558_v29 = vpop.f32.mrb[19].mxu0  ;;  %v8406_v21 = vld [vmem:[%s9837_s5 + $0x38c] ss:$16 sps:$4 sm:$0xff]   ;;  %v8401_v22 = vld [vmem:[%s9837_s5 + $0x380] ss:$16 sps:$4 sm:$0xff]  }
 0x45f   :  { %v4563_v35 = vpack.c.bf16 %v7305_v25, %v7305_v25  ;;  %v8404_v23 = vld [vmem:[%s9837_s5 + $0x388] ss:$16 sps:$4 sm:$0xff]   ;;  %v8409_v24 = vld [vmem:[%s9837_s5 + $0x3a4] ss:$16 sps:$4 sm:$0xff]   ;;  %v8412_v25 = vld [vmem:[%s9837_s5 + $0x3ac] ss:$16 sps:$4 sm:$0xff]  }
 0x460   :  { %5386 = vmatprep.mubr.bf16.mxu1 %v4561_v28  ;;  %5468 = vmatprep.mubr.bf16.mxu0 %v4561_v28  ;;  %v8407_v26 = vld [vmem:[%s9837_s5 + $0x3a0] ss:$16 sps:$4 sm:$0xff]   ;;  %v8410_v27 = vld [vmem:[%s9837_s5 + $0x3a8] ss:$16 sps:$4 sm:$0xff]   ;;  %v1334_v28 = vsub.s32 2, %v9393_v11 }
 0x461   :  { %5387 = vmatmul.mubr.bf16.vlgmr.msra.gmra.mrb[12].mxu1 %v4560_v32  ;;  %5469 = vmatmul.mubr.bf16.vlgmr.msra.gmra.mrb[20].mxu0 %v4560_v32  ;;  %v8415_v29 = vld [vmem:[%s9837_s5 + $0x3c4] ss:$16 sps:$4 sm:$0xff]   ;;  %v8416_v32 = vld [vmem:[%s9837_s5 + $0x3c8] ss:$16 sps:$4 sm:$0xff]  }
 0x462   :  { %5396 = vmatpush1.bf16.msra.mxu1 %v8329_v30  ;;  %5478 = vmatpush1.bf16.msra.mxu0 %v8332_v31  ;;  %v8418_v30 = vld [vmem:[%s9837_s5 + $0x3cc] ss:$16 sps:$4 sm:$0xff]   ;;  %v8413_v31 = vld [vmem:[%s9837_s5 + $0x3c0] ss:$16 sps:$4 sm:$0xff]  }
 0x463   :  { %5427 = vmatprep.mubr.bf16.mxu1 %v4563_v35  ;;  %5509 = vmatprep.mubr.bf16.mxu0 %v4563_v35  ;;  %v8424_v35 = vld [vmem:[%s9837_s5 + $0x3ec] ss:$16 sps:$4 sm:$0xff]  }
 0x464   :  { %5397 = vmatprep.subr.bf16.mxu1 %v8337_v33  ;;  %5479 = vmatprep.subr.bf16.mxu0 %v8340_v34  ;;  %v1335_v33 = vrot.slane %v9396_v13, %v1334_v28  ;;  %v8421_v34 = vld [vmem:[%s9837_s5 + $0x3e4] ss:$16 sps:$4 sm:$0xff]   ;;  %v8422_v13 = vld [vmem:[%s9837_s5 + $0x3e8] ss:$16 sps:$4 sm:$0xff]  }
 0x466   :  { %5398 = vmatpush1.bf16.msra.mxu1 %v8335_v36  ;;  %5480 = vmatpush1.bf16.msra.mxu0 %v8338_v37  ;;  %v8419_v36 = vld [vmem:[%s9837_s5 + $0x3e0] ss:$16 sps:$4 sm:$0xff]   ;;  %v7304_v37 = vadd.f32 %v9409_v20, %v1335_v33  ;;  %v9620_v20 = vld [vmem:[%s9838_s6 + $0x8] ss:$16 sps:$4 sm:$0xff]  }
 0x467   :  { %5399 = vmatprep.subr.bf16.mxu1 %v8343_v38  ;;  %5481 = vmatprep.subr.bf16.mxu0 %v8346_v39  ;;  %v9605_v38 = vld [vmem:[%s9838_s6 + $0x4] ss:$16 sps:$4 sm:$0xff]   ;;  %v9610_v39 = vld [vmem:[%s9838_s6 + $0xc] ss:$16 sps:$4 sm:$0xff]  }
 0x46a   :  { %5400 = vmatpush1.bf16.msra.mxu1 %v8341_v40  ;;  %5482 = vmatpush1.bf16.msra.mxu0 %v8344_v42  ;;  %v9615_v40 = vld [vmem:[%s9838_s6] ss:$16 sps:$4 sm:$0xff]   ;;  %v4562_v42 = vpack.c.bf16 %v7304_v37, %v7304_v37 }
 0x46b   :  { %5401 = vmatprep.subr.bf16.mxu1 %v8349_v43  ;;  %5483 = vmatprep.subr.bf16.mxu0 %v8352_v44  ;;  %v9627_v43 = vld [vmem:[%s9838_s6 + $0x24] ss:$16 sps:$4 sm:$0xff]   ;;  %v9632_v44 = vld [vmem:[%s9838_s6 + $0x2c] ss:$16 sps:$4 sm:$0xff]  }
 0x46e   :  { %5402 = vmatpush1.bf16.msra.mxu1 %v8347_v45  ;;  %5484 = vmatpush1.bf16.msra.mxu0 %v8350_v46  ;;  %v9639_v45 = vld [vmem:[%s9838_s6 + $0x20] ss:$16 sps:$4 sm:$0xff]   ;;  %v9644_v46 = vld [vmem:[%s9838_s6 + $0x28] ss:$16 sps:$4 sm:$0xff]  }
 0x46f   :  { %5403 = vmatprep.subr.bf16.mxu1 %v8355_v47  ;;  %5485 = vmatprep.subr.bf16.mxu0 %v8358_v48  ;;  %v9651_v47 = vld [vmem:[%s9838_s6 + $0x44] ss:$16 sps:$4 sm:$0xff]   ;;  %v9656_v48 = vld [vmem:[%s9838_s6 + $0x4c] ss:$16 sps:$4 sm:$0xff]  }
 0x472   :  { %5404 = vmatpush1.bf16.msra.mxu1 %v8353_v49  ;;  %5486 = vmatpush1.bf16.msra.mxu0 %v8356_v50  ;;  %v8770_v49 = vmov 0   ;;  %v8437_v50 = vld [vmem:[%s9838_s6 + $0x40] ss:$16 sps:$4 sm:$0xff]  }
 0x473   :  { %5405 = vmatprep.subr.bf16.mxu1 %v8361_v51  ;;  %5487 = vmatprep.subr.bf16.mxu0 %v8364_v52  ;;  %v8440_v51 = vld [vmem:[%s9838_s6 + $0x48] ss:$16 sps:$4 sm:$0xff]   ;;  %v8445_v52 = vld [vmem:[%s9838_s6 + $0x64] ss:$16 sps:$4 sm:$0xff]  }
 0x476   :  { %5406 = vmatpush1.bf16.msra.mxu1 %v8359_v53  ;;  %5488 = vmatpush1.bf16.msra.mxu0 %v8362_v54  ;;  %v8448_v53 = vld [vmem:[%s9838_s6 + $0x6c] ss:$16 sps:$4 sm:$0xff]   ;;  %v8443_v54 = vld [vmem:[%s9838_s6 + $0x60] ss:$16 sps:$4 sm:$0xff]  }
 0x477   :  { %5407 = vmatprep.subr.bf16.mxu1 %v8367_v55  ;;  %5489 = vmatprep.subr.bf16.mxu0 %v8370_v56  ;;  %v8446_v55 = vld [vmem:[%s9838_s6 + $0x68] ss:$16 sps:$4 sm:$0xff]   ;;  %v8451_v56 = vld [vmem:[%s9838_s6 + $0x84] ss:$16 sps:$4 sm:$0xff]  }
 0x47a   :  { %5408 = vmatpush1.bf16.msra.mxu1 %v8365_v57  ;;  %5490 = vmatpush1.bf16.msra.mxu0 %v8368_v58  ;;  %v8454_v57 = vld [vmem:[%s9838_s6 + $0x8c] ss:$16 sps:$4 sm:$0xff]   ;;  %v8449_v58 = vld [vmem:[%s9838_s6 + $0x80] ss:$16 sps:$4 sm:$0xff]  }
 0x47b   :  { %5409 = vmatprep.subr.bf16.mxu1 %v8373_v59  ;;  %5491 = vmatprep.subr.bf16.mxu0 %v8376_v61  ;;  %v8452_v59 = vld [vmem:[%s9838_s6 + $0x88] ss:$16 sps:$4 sm:$0xff]   ;;  %v8457_v61 = vld [vmem:[%s9838_s6 + $0xa4] ss:$16 sps:$4 sm:$0xff]  }
 0x47e   :  { %5410 = vmatpush1.bf16.msra.mxu1 %v8371_v62  ;;  %5492 = vmatpush1.bf16.msra.mxu0 %v8374_v63  ;;  %v8460_v62 = vld [vmem:[%s9838_s6 + $0xac] ss:$16 sps:$4 sm:$0xff]   ;;  %v8455_v63 = vld [vmem:[%s9838_s6 + $0xa0] ss:$16 sps:$4 sm:$0xff]  }
 0x47f   :  { %5411 = vmatprep.subr.bf16.mxu1 %v8379_v0  ;;  %5493 = vmatprep.subr.bf16.mxu0 %v8382_v1  ;;  %v8458_v0 = vld [vmem:[%s9838_s6 + $0xa8] ss:$16 sps:$4 sm:$0xff]   ;;  %v8463_v1 = vld [vmem:[%s9838_s6 + $0xc4] ss:$16 sps:$4 sm:$0xff]  }
 0x482   :  { %5412 = vmatpush1.bf16.msra.mxu1 %v8377_v2  ;;  %5494 = vmatpush1.bf16.msra.mxu0 %v8380_v3  ;;  %v8466_v2 = vld [vmem:[%s9838_s6 + $0xcc] ss:$16 sps:$4 sm:$0xff]   ;;  %v8461_v3 = vld [vmem:[%s9838_s6 + $0xc0] ss:$16 sps:$4 sm:$0xff]  }
 0x483   :  { %5413 = vmatprep.subr.bf16.mxu1 %v8385_v4  ;;  %5495 = vmatprep.subr.bf16.mxu0 %v8388_v5  ;;  %v8464_v4 = vld [vmem:[%s9838_s6 + $0xc8] ss:$16 sps:$4 sm:$0xff]   ;;  %v8469_v5 = vld [vmem:[%s9838_s6 + $0xe4] ss:$16 sps:$4 sm:$0xff]  }
 0x486   :  { %5414 = vmatpush1.bf16.msra.mxu1 %v8383_v6  ;;  %5496 = vmatpush1.bf16.msra.mxu0 %v8386_v7  ;;  %v8472_v6 = vld [vmem:[%s9838_s6 + $0xec] ss:$16 sps:$4 sm:$0xff]   ;;  %v8467_v7 = vld [vmem:[%s9838_s6 + $0xe0] ss:$16 sps:$4 sm:$0xff]  }
 0x487   :  { %5415 = vmatprep.subr.bf16.mxu1 %v8391_v8  ;;  %5497 = vmatprep.subr.bf16.mxu0 %v8394_v41  ;;  %v8470_v8 = vld [vmem:[%s9838_s6 + $0xe8] ss:$16 sps:$4 sm:$0xff]   ;;  %s8773_s6 = smov 32  }
 0x48a   :  { %5416 = vmatpush1.bf16.msra.mxu1 %v8389_v9  ;;  %5498 = vmatpush1.bf16.msra.mxu0 %v8392_v10 }
 0x48b   :  { %5417 = vmatprep.subr.bf16.mxu1 %v8397_v15  ;;  %5499 = vmatprep.subr.bf16.mxu0 %v8400_v16 }
 0x48e   :  { %5418 = vmatpush1.bf16.msra.mxu1 %v8395_v17  ;;  %5500 = vmatpush1.bf16.msra.mxu0 %v8398_v18 }
 0x48f   :  { %5419 = vmatprep.subr.bf16.mxu1 %v8403_v19  ;;  %5501 = vmatprep.subr.bf16.mxu0 %v8406_v21  ;;  %v4692_v21 = vld [vmem:[#allocation11] sm:$0xf] }
 0x492   :  { %5420 = vmatpush1.bf16.msra.mxu1 %v8401_v22  ;;  %5502 = vmatpush1.bf16.msra.mxu0 %v8404_v23  ;;  %v4697_v22 = vrot.slane %v4692_v21, %v1326_v12  ;;  %v4701_v23 = vrot.slane %v4692_v21, %v1330_v60 }
 0x493   :  { %5421 = vmatprep.subr.bf16.mxu1 %v8409_v24  ;;  %5503 = vmatprep.subr.bf16.mxu0 %v8412_v25 }
 0x496   :  { %5422 = vmatpush1.bf16.msra.mxu1 %v8407_v26  ;;  %5504 = vmatpush1.bf16.msra.mxu0 %v8410_v27 }
 0x497   :  { %5423 = vmatprep.subr.bf16.mxu1 %v8415_v29  ;;  %5505 = vmatprep.subr.bf16.mxu0 %v8418_v30 }
 0x49a   :  { %5424 = vmatpush1.bf16.msra.mxu1 %v8413_v31  ;;  %5506 = vmatpush1.bf16.msra.mxu0 %v8416_v32  ;;  %v4709_v32 = vrot.slane %v4692_v21, %v1338_v14 }
 0x49b   :  { %5425 = vmatprep.subr.bf16.mxu1 %v8421_v34  ;;  %5507 = vmatprep.subr.bf16.mxu0 %v8424_v35 }
 0x49e   :  { %5426 = vmatpush1.bf16.msra.mxu1 %v8419_v36  ;;  %5508 = vmatpush1.bf16.msra.mxu0 %v8422_v13 }
 0x49f   :  { %5710 = vmatprep.subr.bf16.mxu1 %v9605_v38  ;;  %5751 = vmatprep.subr.bf16.mxu0 %v9610_v39 }
 0x4a1   :  { %5428 = vmatmul.mubr.bf16.vlgmr.msra.gmra.mrb[12].mxu1 %v4562_v42  ;;  %5510 = vmatmul.mubr.bf16.vlgmr.msra.gmra.mrb[20].mxu0 %v4562_v42 }
 0x4a2   :  { %5711 = vmatpush1.bf16.msra.mxu1 %v9615_v40  ;;  %5752 = vmatpush1.bf16.msra.mxu0 %v9620_v20 }
 0x4a3   :  { %5712 = vmatprep.subr.bf16.mxu1 %v9627_v43  ;;  %5753 = vmatprep.subr.bf16.mxu0 %v9632_v44 }
 0x4a4   :  { %5742 = vmatprep.mubr.bf16.mxu1 %v8770_v49  ;;  %5783 = vmatprep.mubr.bf16.mxu0 %v8770_v49 }
 0x4a6   :  { %5713 = vmatpush1.bf16.msra.mxu1 %v9639_v45  ;;  %5754 = vmatpush1.bf16.msra.mxu0 %v9644_v46 }
 0x4a7   :  { %5714 = vmatprep.subr.bf16.mxu1 %v9651_v47  ;;  %5755 = vmatprep.subr.bf16.mxu0 %v9656_v48 }
 0x4aa   :  { %5715 = vmatpush1.bf16.msra.mxu1 %v8437_v50  ;;  %5756 = vmatpush1.bf16.msra.mxu0 %v8440_v51 }
 0x4ab   :  { %5716 = vmatprep.subr.bf16.mxu1 %v8445_v52  ;;  %5757 = vmatprep.subr.bf16.mxu0 %v8448_v53 }
 0x4ae   :  { %5717 = vmatpush1.bf16.msra.mxu1 %v8443_v54  ;;  %5758 = vmatpush1.bf16.msra.mxu0 %v8446_v55 }
 0x4af   :  { %5718 = vmatprep.subr.bf16.mxu1 %v8451_v56  ;;  %5759 = vmatprep.subr.bf16.mxu0 %v8454_v57 }
 0x4b2   :  { %5719 = vmatpush1.bf16.msra.mxu1 %v8449_v58  ;;  %5760 = vmatpush1.bf16.msra.mxu0 %v8452_v59 }
 0x4b3   :  { %5720 = vmatprep.subr.bf16.mxu1 %v8457_v61  ;;  %5761 = vmatprep.subr.bf16.mxu0 %v8460_v62 }
 0x4b6   :  { %5721 = vmatpush1.bf16.msra.mxu1 %v8455_v63  ;;  %5762 = vmatpush1.bf16.msra.mxu0 %v8458_v0 }
 0x4b7   :  { %5722 = vmatprep.subr.bf16.mxu1 %v8463_v1  ;;  %5763 = vmatprep.subr.bf16.mxu0 %v8466_v2 }
 0x4ba   :  { %5723 = vmatpush1.bf16.msra.mxu1 %v8461_v3  ;;  %5764 = vmatpush1.bf16.msra.mxu0 %v8464_v4 }
 0x4bb   :  { %5724 = vmatprep.subr.bf16.mxu1 %v8469_v5  ;;  %5765 = vmatprep.subr.bf16.mxu0 %v8472_v6 }
 0x4be   :  { %5725 = vmatpush1.bf16.msra.mxu1 %v8467_v7  ;;  %5766 = vmatpush1.bf16.msra.mxu0 %v8470_v8 }
 0x4bf   :  { %5821 = vmatprep.subr.bf16.mxu1 %v9605_v38  ;;  %5862 = vmatprep.subr.bf16.mxu0 %v9610_v39  ;;  %v4705_v38 = vrot.slane %v4692_v21, %v1334_v28 }
 0x4c1   :  { %5743 = vmatmul.mubr.bf16.vlgmr.msra.gmra.mrb[16].mxu1 %v8770_v49  ;;  %5784 = vmatmul.mubr.bf16.vlgmr.msra.gmra.mrb[24].mxu0 %v8770_v49 }
 0x4c2   :  { %5822 = vmatpush1.bf16.msra.mxu1 %v9615_v40  ;;  %5863 = vmatpush1.bf16.msra.mxu0 %v9620_v20 }
 0x4c3   :  { %5823 = vmatprep.subr.bf16.mxu1 %v9627_v43  ;;  %5864 = vmatprep.subr.bf16.mxu0 %v9632_v44 }
 0x4c4   :  { %5853 = vmatprep.mubr.bf16.mxu1 %v8770_v49  ;;  %5894 = vmatprep.mubr.bf16.mxu0 %v8770_v49 }
 0x4c6   :  { %5824 = vmatpush1.bf16.msra.mxu1 %v9639_v45  ;;  %5865 = vmatpush1.bf16.msra.mxu0 %v9644_v46 }
 0x4c7   :  { %5825 = vmatprep.subr.bf16.mxu1 %v9651_v47  ;;  %5866 = vmatprep.subr.bf16.mxu0 %v9656_v48 }
 0x4ca   :  { %5826 = vmatpush1.bf16.msra.mxu1 %v8437_v50  ;;  %5867 = vmatpush1.bf16.msra.mxu0 %v8440_v51 }
 0x4cb   :  { %5827 = vmatprep.subr.bf16.mxu1 %v8445_v52  ;;  %5868 = vmatprep.subr.bf16.mxu0 %v8448_v53 }
 0x4ce   :  { %5828 = vmatpush1.bf16.msra.mxu1 %v8443_v54  ;;  %5869 = vmatpush1.bf16.msra.mxu0 %v8446_v55 }
 0x4cf   :  { %5829 = vmatprep.subr.bf16.mxu1 %v8451_v56  ;;  %5870 = vmatprep.subr.bf16.mxu0 %v8454_v57  ;;  %v8473_v57 = vld [vmem:[#allocation13] sm:$0xff]  }
 0x4d2   :  { %5830 = vmatpush1.bf16.msra.mxu1 %v8449_v58  ;;  %5871 = vmatpush1.bf16.msra.mxu0 %v8452_v59  ;;  %v8771_v58 = vmov 0.0   ;;  %v8474_v59 = vld [vmem:[#allocation13 + $0x8] sm:$0xff]  }
 0x4d3   :  { %5831 = vmatprep.subr.bf16.mxu1 %v8457_v61  ;;  %5872 = vmatprep.subr.bf16.mxu0 %v8460_v62  ;;  %v8475_v61 = vld [vmem:[#allocation13 + $0x10] sm:$0xff]   ;;  %v8476_v62 = vld [vmem:[#allocation13 + $0x18] sm:$0xff]  }
 0x4d6   :  { %5832 = vmatpush1.bf16.msra.mxu1 %v8455_v63  ;;  %5873 = vmatpush1.bf16.msra.mxu0 %v8458_v0  ;;  %v8477_v63 = vld [vmem:[#allocation13 + $0x20] sm:$0xff]  }
 0x4d7   :  { %5833 = vmatprep.subr.bf16.mxu1 %v8463_v1  ;;  %5874 = vmatprep.subr.bf16.mxu0 %v8466_v2  ;;  %v9777_v0 = vld [vmem:[#allocation14] sm:$0xff]   ;;  %v8478_v1 = vld [vmem:[#allocation13 + $0x28] sm:$0xff]  }
 0x4d8   :  { %v9784_v2 = vld [vmem:[#allocation14 + $0x8] sm:$0xff]  }
 0x4da   :  { %5834 = vmatpush1.bf16.msra.mxu1 %v8461_v3  ;;  %5875 = vmatpush1.bf16.msra.mxu0 %v8464_v4  ;;  %v8480_v3 = vld [vmem:[#allocation13 + $0x30] sm:$0xff]   ;;  %v8482_v4 = vld [vmem:[#allocation13 + $0x38] sm:$0xff]  }
 0x4db   :  { %5835 = vmatprep.subr.bf16.mxu1 %v8469_v5  ;;  %5876 = vmatprep.subr.bf16.mxu0 %v8472_v6 }
 0x4de   :  { %5836 = vmatpush1.bf16.msra.mxu1 %v8467_v7  ;;  %5877 = vmatpush1.bf16.msra.mxu0 %v8470_v8 }
 0x4df   :  { %7258 = vmatprep.subr.bf16.mxu1 %v8771_v58  ;;  %7278 = vmatprep.subr.bf16.mxu0 %v8771_v58 }
 0x574   :  { %v5429_v41 = vpop.f32.mrb[12].mxu1  ;;  %v5511_v9 = vpop.f32.mrb[20].mxu0 }
 0x575   :  { %v5431_v10 = vpop.f32.mrb[13].mxu1  ;;  %v5513_v15 = vpop.f32.mrb[21].mxu0  ;;  %v9748_v24 = vadd.f32 %v5429_v41, %v4697_v22  ;;  %v9761_v40 = vadd.f32 %v5511_v9, %v4705_v38 }
 0x576   :  { %v5433_v16 = vpop.f32.mrb[14].mxu1  ;;  %v5515_v17 = vpop.f32.mrb[22].mxu0  ;;  %v9750_v25 = vadd.f32 %v5431_v10, %v4701_v23  ;;  %v9756_v37 = vadd.f32 %v5513_v15, %v4709_v32 }
 0x577   :  { %v5434_v18 = vpop.f32.mrb[15].mxu1  ;;  %v5516_v19 = vpop.f32.mrb[23].mxu0 }
 0x594   :  { %v5744_v26 = vpop.f32.mrb[16].mxu1  ;;  %v5785_v27 = vpop.f32.mrb[24].mxu0 }
 0x595   :  { %v5792_v29 = vadd.f32 %v9748_v24, %v5744_v26  ;;  %v5746_v30 = vpop.f32.mrb[17].mxu1  ;;  %v5787_v31 = vpop.f32.mrb[25].mxu0  ;;  %v5794_v20 = vadd.f32 %v9761_v40, %v5785_v27 }
 0x596   :  { %v5793_v33 = vadd.f32 %v9750_v25, %v5746_v30  ;;  %v5748_v34 = vpop.f32.mrb[18].mxu1  ;;  %v5789_v12 = vpop.f32.mrb[26].mxu0  ;;  %v5795_v39 = vadd.f32 %v9756_v37, %v5787_v31 }
 0x597   :  { %v7128_v35 = vmul.f32 -1.442695, %v5792_v29  ;;  %v5749_v36 = vpop.f32.mrb[19].mxu1  ;;  %v5790_v60 = vpop.f32.mrb[27].mxu0 }
 0x598   :  { %v7129_v13 = vmul.f32 -1.442695, %v5793_v33  ;;  %v7130_v14 = vmul.f32 -1.442695, %v5795_v39 }
 0x599   :  { %8485 = vpow2.f32 %v7128_v35 }
 0x59a   :  { %8487 = vpow2.f32 %v7129_v13 }
 0x59b   :  { %8489 = vpow2.f32 %v7130_v14 }
 0x59c   :  { %8491 = vtanh.f32 %v5794_v20 }
 0x5a3   :  { %v8486_v42 = vpop.eup %8485 }
 0x5a4   :  { %v8488_v43 = vpop.eup %8487  ;;  %v5799_v44 = vadd.f32 1.0, %v8486_v42 }
 0x5a5   :  { %v5805_v45 = vadd.f32 1.0, %v8488_v43  ;;  %v8490_v46 = vpop.eup %8489 }
 0x5a6   :  { %8493 = vrcp.f32 %v5799_v44  ;;  %v8492_v47 = vpop.eup %8491  ;;  %v5812_v50 = vadd.f32 1.0, %v8490_v46  ;;  %v7134_v46 = vld [vmem:[#allocation16] ss:$0 sm:$0xff] }
 0x5a7   :  { %8495 = vrcp.f32 %v5805_v45 }
 0x5a8   :  { %8497 = vrcp.f32 %v5812_v50 }
 0x5b0   :  { %v8494_v48 = vpop.eup %8493 }
 0x5b1   :  { %v8496_v11 = vpop.eup %8495  ;;  %v5816_v28 = vmul.f32 %v8494_v48, %v8492_v47 }
 0x5b2   :  { %v5815_v51 = vmul.f32 0.0, %v8496_v11  ;;  %v8498_v53 = vpop.eup %8497 }
 0x5b4   :  { %v9764_v52 = vadd.f32 %v5816_v28, %v5815_v51 }
 0x5b6   :  { %8499 = vtanh.f32 %v9764_v52  ;;  %v5939_v12 = vrot.slane %v9764_v52, 7 }
 0x5c0   :  { %v8500_v54 = vpop.eup %8499 }
 0x5c1   :  { %v9767_v55 = vmul.f32 %v8500_v54, %v8498_v53 }
 0x5c3   :  { %v5820_v56 = vpack.c.bf16 %v9767_v55, %v9767_v55 }
 0x5c5   :  { %5854 = vmatmul.mubr.bf16.vlgmr.msra.gmra.mrb[20].mxu1 %v5820_v56  ;;  %5895 = vmatmul.mubr.bf16.vlgmr.msra.gmra.mrb[28].mxu0 %v5820_v56 }
 0x5c6   :  { %7259 = vmatpush3.bf16.msra.mxu1 %v8473_v57  ;;  %7282 = vmatprep.mubr.msk.bf16.mxu0 %vm8772_vm0, %v8771_v58 }
 0x5c7   :  { %7260 = vmatprep.subr.bf16.mxu1 %v8771_v58  ;;  %7274 = vmatprep.mubr.msk.bf16.mxu1 %vm8772_vm0, %v8771_v58 }
 0x5c8   :  { %7279 = vmatpush3.bf16.msra.mxu0 %v9777_v0 }
 0x5c9   :  { %7280 = vmatprep.subr.bf16.mxu0 %v8771_v58 }
 0x5ca   :  { %7261 = vmatpush3.bf16.msra.mxu1 %v8474_v59 }
 0x5cb   :  { %7262 = vmatprep.subr.bf16.mxu1 %v8771_v58 }
 0x5cc   :  { %7281 = vmatpush3.bf16.msra.mxu0 %v9784_v2 }
 0x5cd   :  { %7294 = vmatprep.subr.bf16.mxu0 %v8771_v58 }
 0x5ce   :  { %7263 = vmatpush3.bf16.msra.mxu1 %v8475_v61 }
 0x5cf   :  { %7264 = vmatprep.subr.bf16.mxu1 %v8771_v58  ;;  %7283 = vmatmul.mubr.bf16.vlgmr.msra.gmra.mrb[32].mxu0 %v8770_v49 }
 0x5d0   :  { %7298 = vmatprep.mubr.msk.bf16.mxu0 %vm8772_vm0, %v8771_v58 }
 0x5d2   :  { %7265 = vmatpush3.bf16.msra.mxu1 %v8476_v62 }
 0x5d3   :  { %7266 = vmatprep.subr.bf16.mxu1 %v8771_v58 }
 0x5d6   :  { %7267 = vmatpush3.bf16.msra.mxu1 %v8477_v63 }
 0x5d7   :  { %7268 = vmatprep.subr.bf16.mxu1 %v8771_v58 }
 0x5da   :  { %7269 = vmatpush3.bf16.msra.mxu1 %v8478_v1 }
 0x5db   :  { %7270 = vmatprep.subr.bf16.mxu1 %v8771_v58 }
 0x5de   :  { %7271 = vmatpush3.bf16.msra.mxu1 %v8480_v3 }
 0x5df   :  { %7272 = vmatprep.subr.bf16.mxu1 %v8771_v58 }
 0x5e2   :  { %7273 = vmatpush3.bf16.msra.mxu1 %v8482_v4 }
 0x5e3   :  { %7286 = vmatprep.subr.bf16.mxu1 %v8771_v58 }
 0x698   :  { %v5855_v5 = vpop.f32.mrb[20].mxu1  ;;  %v5896_v6 = vpop.f32.mrb[28].mxu0 }
 0x699   :  { %v5907_v7 = vrot.slane %v5855_v5, 7  ;;  %v5857_v8 = vpop.f32.mrb[21].mxu1  ;;  %v5898_v41 = vpop.f32.mrb[29].mxu0  ;;  %v5909_v26 = vrot.slane %v5896_v6, 7 }
 0x69a   :  { %v5908_v9 = vrot.slane %v5857_v8, 7  ;;  %v5859_v10 = vpop.f32.mrb[22].mxu1  ;;  %v5900_v15 = vpop.f32.mrb[30].mxu0  ;;  %v5910_v22 = vrot.slane %v5898_v41, 7 }
 0x69b   :  { %v5915_v49 = vadd.f32 %v9748_v24, %v5907_v7  ;;  %v5860_v16 = vpop.f32.mrb[23].mxu1  ;;  %v5901_v17 = vpop.f32.mrb[31].mxu0  ;;  %v5917_v29 = vadd.f32 %v9761_v40, %v5909_v26 }
 0x69c   :  { %v5916_v18 = vadd.f32 %v9750_v25, %v5908_v9  ;;  %v5918_v23 = vadd.f32 %v9756_v37, %v5910_v22 }
 0x69d   :  { %v7131_v19 = vmul.f32 -1.442695, %v5915_v49 }
 0x69e   :  { %v7132_v21 = vmul.f32 -1.442695, %v5916_v18  ;;  %v7133_v27 = vmul.f32 -1.442695, %v5918_v23 }
 0x69f   :  { %8501 = vpow2.f32 %v7131_v19 }
 0x6a0   :  { %8503 = vpow2.f32 %v7132_v21 }
 0x6a1   :  { %8505 = vpow2.f32 %v7133_v27  ;;  %v8483_v27 = vld [vmem:[%s9843_s11] sm:$0xff]  }
 0x6a2   :  { %8507 = vtanh.f32 %v5917_v29  ;;  %v6114_v42 = vpop.f32.mrb[32].mxu0  ;;  %7295 = vmatpush3.bf16.msra.mxu0 %v8483_v27  ;;  %v8484_v29 = vld [vmem:[%s9843_s11 + $0x8] sm:$0xff]   ;;  %s8774_s11 = smov 126  }
 0x6a3   :  { %v7284_v43 = vpop.f32.mrb[33].mxu0  ;;  %7296 = vmatprep.subr.bf16.mxu0 %v8771_v58 }
 0x6a4   :  { %v6117_v44 = vpop.f32.mrb[34].mxu0 }
 0x6a5   :  { %v7285_v45 = vpop.f32.mrb[35].mxu0 }
 0x6a6   :  { %7297 = vmatpush3.bf16.msra.mxu0 %v8484_v29 }
 0x6a9   :  { %v8502_v30 = vpop.eup %8501 }
 0x6aa   :  { %v8504_v31 = vpop.eup %8503  ;;  %v5922_v32 = vadd.f32 1.0, %v8502_v30 }
 0x6ab   :  { %v5928_v24 = vadd.f32 1.0, %v8504_v31  ;;  %v8506_v25 = vpop.eup %8505 }
 0x6ac   :  { %8509 = vrcp.f32 %v5922_v32  ;;  %v8508_v33 = vpop.eup %8507  ;;  %v5935_v60 = vadd.f32 1.0, %v8506_v25 }
 0x6ad   :  { %8511 = vrcp.f32 %v5928_v24 }
 0x6ae   :  { %8513 = vrcp.f32 %v5935_v60 }
 0x6b6   :  { %v8510_v34 = vpop.eup %8509 }
 0x6b7   :  { %v8512_v35 = vpop.eup %8511  ;;  %v5942_v36 = vmul.f32 %v8510_v34, %v8508_v33  ;;  %v6294_v34 = vld [vmem:[#allocation17] sm:$0x1] }
 0x6b8   :  { %v5941_v13 = vmul.f32 %v8512_v35, %v5939_v12  ;;  %v8514_v38 = vpop.eup %8513  ;;  %v6295_v12 = vunpack.c.l.bf16 %v6294_v34  ;;  %v7148_v35 = vld [vmem:[#allocation19] ss:$0 sm:$0xff] }
 0x6ba   :  { %v5943_v37 = vadd.f32 %v5942_v36, %v5941_v13  ;;  %v6296_v36 = vmul.f32 0.0, %v6295_v12 }
 0x6bc   :  { %8515 = vtanh.f32 %v5943_v37 }
 0x6c6   :  { %v8516_v39 = vpop.eup %8515 }
 0x6c7   :  { %v5945_v40 = vmul.f32 %v8516_v39, %v8514_v38 }
 0x6c9   :  { %v5947_v14 = vsel %vm5946_vm1, %v9767_v55, %v5945_v40 }
 0x6ca   :  { %v5948_v20 = vpack.c.bf16 %v5947_v14, %v5947_v14 }
 0x6cc   :  { %7275 = vmatmul.mubr.bf16.vlgmr.msra.gmra.mrb[24].mxu1 %v5948_v20 }
 0x6cd   :  { %7287 = vmatpush3.bf16.msra.mxu1 %v9777_v0  ;;  %7290 = vmatprep.mubr.msk.bf16.mxu1 %vm8772_vm0, %v8771_v58 }
 0x6ce   :  { %7288 = vmatprep.subr.bf16.mxu1 %v8771_v58 }
 0x6d1   :  { %7289 = vmatpush3.bf16.msra.mxu1 %v9784_v2 }
 0x79f   :  { %v6054_v47 = vpop.f32.mrb[24].mxu1 }
 0x7a0   :  { %v6055_v48 = vadd.f32 %v7134_v46, %v6054_v47  ;;  %v7276_v11 = vpop.f32.mrb[25].mxu1 }
 0x7a1   :  { %v6057_v28 = vpop.f32.mrb[26].mxu1  ;;  %v8776_v11 = vmov 3  }
 0x7a2   :  { %v6120_v50 = vadd.f32 %v6114_v42, %v6055_v48  ;;  %v7277_v51 = vpop.f32.mrb[27].mxu1  ;;  %7397 = vset.pattern.permute.xlu1 %v8776_v11  ;;  %7398 = vset.pattern.permute.xlu0 %v8776_v11 }
 0x7a4   :  { %8517 = vtanh.f32 %v6120_v50  ;;  %v7145_v53 = vmul.f32 -1.442695, %v6120_v50 }
 0x7a6   :  { %8519 = vpow2.f32 %v7145_v53 }
 0x7ae   :  { %v8518_v52 = vpop.eup %8517 }
 0x7af   :  { %6130 = vrot.lane.b32.xlu0 %v8518_v52, %s8763_s23 }
 0x7b0   :  { %v8520_v54 = vpop.eup %8519 }
 0x7b1   :  { %v6124_v55 = vadd.f32 1.0, %v8520_v54 }
 0x7b3   :  { %8521 = vrcp.f32 %v6124_v55 }
 0x7bd   :  { %v8522_v56 = vpop.eup %8521 }
 0x7be   :  { %v6128_v61 = vmul.f32 0.0, %v8522_v56 }
 0x821   :  { %v6131_v57 = vpop.permute.xlu0 %6130 }
 0x822   :  { %v6133_v59 = vmul.f32 %v8522_v56, %v6131_v57 }
 0x824   :  { %6135 = vrot.lane.b32.xlu0 %v6133_v59, %s8773_s6 }
 0x896   :  { %v6136_v62 = vpop.permute.xlu0 %6135 }
 0x897   :  { %v6138_v63 = vadd.f32 %v6136_v62, %v6128_v61 }
 0x899   :  { %8523 = vtanh.f32 %v6138_v63  ;;  %v6204_v21 = vrot.slane %v6138_v63, 7 }
 0x8a3   :  { %v8524_v0 = vpop.eup %8523 }
 0x8a4   :  { %6141 = vrot.lane.b32.xlu1 %v8524_v0, %s8763_s23 }
 0x916   :  { %v6142_v1 = vpop.permute.xlu1 %6141 }
 0x917   :  { %v6144_v2 = vmul.f32 %v8522_v56, %v6142_v1  ;;  %v7154_v1 = vld [vmem:[#allocation4] ss:$0 sm:$0xff] }
 0x919   :  { %v6145_v3 = vpack.c.bf16 %v6144_v2, %v6144_v2 }
 0x91b   :  { %6147 = vrot.lane.b32.xlu1 %v6145_v3, %s8773_s6 }
 0x98d   :  { %v6148_v4 = vpop.permute.xlu1 %6147 }
 0x98e   :  { %7291 = vmatmul.mubr.msk.bf16.vlgmr.msra.gmra.mrb[28].mxu1 %vm6076_vm2, %v6148_v4 }
 0xa61   :  { %v6186_v5 = vpop.f32.mrb[28].mxu1 }
 0xa62   :  { %v6193_v6 = vrot.slane %v6186_v5, 7  ;;  %v7292_v7 = vpop.f32.mrb[29].mxu1 }
 0xa63   :  { %v6189_v8 = vpop.f32.mrb[30].mxu1  ;;  %v7155_v7 = vld [vmem:[#allocation5] ss:$0 sm:$0xff] }
 0xa64   :  { %v6195_v41 = vadd.f32 %v6193_v6, %v6055_v48  ;;  %v7293_v9 = vpop.f32.mrb[31].mxu1 }
 0xa66   :  { %8525 = vtanh.f32 %v6195_v41  ;;  %v7147_v15 = vmul.f32 -1.442695, %v6195_v41 }
 0xa68   :  { %8527 = vpow2.f32 %v7147_v15 }
 0xa70   :  { %v8526_v10 = vpop.eup %8525 }
 0xa71   :  { %6208 = vrot.lane.b32.xlu0 %v8526_v10, %s8763_s23 }
 0xa72   :  { %v8528_v49 = vpop.eup %8527 }
 0xa73   :  { %v6199_v16 = vadd.f32 1.0, %v8528_v49 }
 0xa75   :  { %8529 = vrcp.f32 %v6199_v16 }
 0xa7f   :  { %v8530_v17 = vpop.eup %8529 }
 0xa80   :  { %v6206_v22 = vmul.f32 %v8530_v17, %v6204_v21 }
 0xae3   :  { %v6209_v18 = vpop.permute.xlu0 %6208 }
 0xae4   :  { %v6211_v19 = vmul.f32 %v8530_v17, %v6209_v18 }
 0xae6   :  { %6213 = vrot.lane.b32.xlu1 %v6211_v19, %s8773_s6 }
 0xb58   :  { %v6214_v23 = vpop.permute.xlu1 %6213 }
 0xb59   :  { %v6216_v26 = vadd.f32 %v6214_v23, %v6206_v22 }
 0xb5b   :  { %8531 = vtanh.f32 %v6216_v26 }
 0xb65   :  { %v8532_v30 = vpop.eup %8531 }
 0xb66   :  { %6219 = vrot.lane.b32.xlu0 %v8532_v30, %s8763_s23  ;;  %s8775_s23 = smov 1  }
 0xbd8   :  { %v6220_v31 = vpop.permute.xlu0 %6219 }
 0xbd9   :  { %v6222_v32 = vmul.f32 %v8530_v17, %v6220_v31 }
 0xbdb   :  { %v6223_v24 = vsel %vm5946_vm1, %v6144_v2, %v6222_v32 }
 0xbdc   :  { %v6224_v25 = vpack.c.bf16 %v6223_v24, %v6223_v24 }
 0xbde   :  { %6237 = vrot.lane.b32.xlu1 %v6224_v25, %s8773_s6 }
 0xc50   :  { %v6238_v33 = vpop.permute.xlu1 %6237 }
 0xc51   :  { %7299 = vmatmul.mubr.msk.bf16.vlgmr.msra.gmra.mrb[36].mxu0 %vm6076_vm2, %v6238_v33 }
 0xd24   :  { %v6288_v60 = vpop.f32.mrb[36].mxu0 }
 0xd25   :  { %v6289_v58 = vadd.f32 %v7148_v35, %v6288_v60  ;;  %v7300_v13 = vpop.f32.mrb[37].mxu0 }
 0xd26   :  { %v6291_v37 = vpop.f32.mrb[38].mxu0 }
 0xd27   :  { %v6297_v38 = vadd.f32 %v6296_v36, %v6289_v58  ;;  %v7301_v39 = vpop.f32.mrb[39].mxu0 }
 0xd29   :  { %8533 = vtanh.f32 %v6297_v38  ;;  %v7152_v14 = vmul.f32 -1.442695, %v6297_v38 }
 0xd2b   :  { %8535 = vpow2.f32 %v7152_v14 }
 0xd33   :  { %v8534_v40 = vpop.eup %8533 }
 0xd34   :  { %6307 = vrot.lane.b32.xlu0 %v8534_v40, %s8774_s11 }
 0xd35   :  { %v8536_v20 = vpop.eup %8535 }
 0xd36   :  { %v6301_v42 = vadd.f32 1.0, %v8536_v20 }
 0xd38   :  { %8537 = vrcp.f32 %v6301_v42 }
 0xd42   :  { %v8538_v43 = vpop.eup %8537 }
 0xd43   :  { %v6305_v46 = vmul.f32 0.0, %v8538_v43 }
 0xda6   :  { %v6308_v44 = vpop.permute.xlu0 %6307 }
 0xda7   :  { %v6310_v45 = vmul.f32 %v8538_v43, %v6308_v44 }
 0xda9   :  { %6312 = vrot.lane.b32.xlu1 %v6310_v45, %s8775_s23 }
 0xe1b   :  { %v6313_v47 = vpop.permute.xlu1 %6312 }
 0xe1c   :  { %v6315_v48 = vadd.f32 %v6313_v47, %v6305_v46 }
 0xe1e   :  { %8539 = vtanh.f32 %v6315_v48  ;;  %v6340_v2 = vrot.slane %v6315_v48, 7 }
 0xe28   :  { %v8540_v28 = vpop.eup %8539 }
 0xe29   :  { %6318 = vrot.lane.b32.xlu0 %v8540_v28, %s8777_s14 }
 0xe9b   :  { %v6319_v50 = vpop.permute.xlu0 %6318 }
 0xe9c   :  { %v6321_v51 = vmul.f32 %v8538_v43, %v6319_v50 }
 0xe9e   :  { %6324 = vperm.xlu1 %7397, %v6321_v51  }
 0xf1d   :  { %v6325_v52 = vpop.permute.xlu1 %6324 }
 0xf1e   :  { %v6327_v53 = vmul.f32 %v6325_v52, %v6295_v12 }
 0xf20   :  { %v6329_v54 = vrot.slane %v6327_v53, 7 }
 0xf22   :  { %v6331_v55 = vadd.f32 %v6329_v54, %v6289_v58 }
 0xf24   :  { %8541 = vtanh.f32 %v6331_v55  ;;  %v7153_v57 = vmul.f32 -1.442695, %v6331_v55 }
 0xf26   :  { %8543 = vpow2.f32 %v7153_v57 }
 0xf2e   :  { %v8542_v56 = vpop.eup %8541 }
 0xf2f   :  { %6344 = vrot.lane.b32.xlu0 %v8542_v56, %s8774_s11 }
 0xf30   :  { %v8544_v59 = vpop.eup %8543 }
 0xf31   :  { %v6335_v61 = vadd.f32 1.0, %v8544_v59 }
 0xf33   :  { %8545 = vrcp.f32 %v6335_v61 }
 0xf3d   :  { %v8546_v62 = vpop.eup %8545 }
 0xf3e   :  { %v6342_v3 = vmul.f32 %v8546_v62, %v6340_v2 }
 0xfa1   :  { %v6345_v63 = vpop.permute.xlu0 %6344 }
 0xfa2   :  { %v6347_v0 = vmul.f32 %v8546_v62, %v6345_v63 }
 0xfa4   :  { %6349 = vrot.lane.b32.xlu1 %v6347_v0, %s8775_s23 }
 0xfa8   :  { %6366 = vrot.lane.b32.xlu1 %v7154_v1, %s8778_s2 }
0x1016   :  { %v6350_v4 = vpop.permute.xlu1 %6349 }
0x1017   :  { %v6352_v5 = vadd.f32 %v6350_v4, %v6342_v3 }
0x1019   :  { %8547 = vtanh.f32 %v6352_v5 }
0x101a   :  { %v6367_v9 = vpop.permute.xlu1 %6366 }
0x1023   :  { %v8548_v6 = vpop.eup %8547 }
0x1024   :  { %6355 = vrot.lane.b32.xlu0 %v8548_v6, %s8777_s14 }
0x1028   :  { %6376 = vrot.lane.b32.xlu0 %v7155_v7, %s8778_s2 }
0x1096   :  { %v6356_v8 = vpop.permute.xlu0 %6355 }
0x1097   :  { %v6358_v41 = vmul.f32 %v8546_v62, %v6356_v8 }
0x1099   :  { %v6359_v10 = vsel %vm5946_vm1, %v6321_v51, %v6358_v41 }
0x109a   :  { %v6369_v15 = vmul.f32 %v6367_v9, %v6359_v10  ;;  %v6377_v49 = vpop.permute.xlu0 %6376 }
0x109c   :  { %v6379_v16 = vadd.f32 %v6377_v49, %v6369_v15 }
0x109e   :  { %6381 = vrot.lane.b32.xlu1 %v6379_v16, %s8779_s27 }
0x1110   :  { %v6382_v17 = vpop.permute.xlu1 %6381 }
0x1111   :  { %6385 = vst.msk [vmem:[%s9847_s16] sm:$0x3] %vm6384_vm3, %v6382_v17 }
0x1112   :  { %6390 = vsyncpa [#allocation7], 1 }
0x1113   :  { %6391 = vsyncpa [#allocation9], 1 }
0x1114   :  { %6392 = vsyncpa [#allocation12], 1 }
0x1115   :  { %6393 = vsyncpa [#allocation15], 1 }
0x1116   :  { %6394 = vsyncpa [#allocation18], 1 }

</bundles_post_ra>
